<compile_context>
chip_gen: v5e
topology: v5e:2x2
jax: 0.10.0
libtpu: 0.0.40
codegen_flags: <defaults>
</compile_context>

<pallas_src>
import math
import jax
import jax.numpy as jnp
from jax import lax
from jax.experimental import pallas as pl
from jax.experimental.pallas import tpu as pltpu


# ----------------------------- config ---------------------------------------
VOCAB_SIZE = 50
D_MODEL = 32
NUM_HEADS = 4
NUM_LAYERS = 2
D_FF = 64
MAX_SEQ_LEN = 16
BATCH = 2
SEQ = 8
LN_EPS = 1e-5

D_K = D_MODEL // NUM_HEADS
V_PAD = 128                       # lane-dense padded vocab for the LM head
EMB_ROWS = 64                     # vocab rows padded to 64 inside the f32 slab

# ---- f32 param slab layout (rows x 128 lanes) --------------------------------
PE_ROW = EMB_ROWS                                   # 64
P_LAYER_ROW = PE_ROW + MAX_SEQ_LEN                  # 80
P_LAYER_ROWS = 8
PF_ROW = P_LAYER_ROW + NUM_LAYERS * P_LAYER_ROWS    # 96
P_TOTAL_ROWS = PF_ROW + 8                           # 104 (2 used + pad)
# per-layer param-row offsets
R_QKV_B, R_BO, R_LN1G, R_LN1B, R_B1, R_B2, R_LN2G, R_LN2B = range(8)

# ---- bf16 weight slab layout (rows x 128 lanes) ------------------------------
W_QKV_OFF, W_O_OFF, W_1_OFF, W_2_OFF = 0, 32, 64, 96
W_LAYER_ROWS = 160                                  # qkv 32 | wo 32 | w1 32 | w2 64
HEAD_ROW = NUM_LAYERS * W_LAYER_ROWS                # 320
W_TOTAL_ROWS = HEAD_ROW + D_MODEL                   # 352


# ----------------------------- fused forward kernel --------------------------
def fused_lm_kernel(ids_ref, w_ref, p_ref, logits_ref, aw_ref):
    B, S = ids_ref.shape
    BS = B * S
    D, H, dk = D_MODEL, NUM_HEADS, D_K
    BH = B * H
    inv_sqrt_dk = 1.0 / math.sqrt(dk)

    # ---- token embedding gather (exact): one-hot f32 matmul on the idle MXU --
    emb = p_ref[0:EMB_ROWS, 0:D]                           # (64, 32), pre-scaled by sqrt(D)
    viota = lax.broadcasted_iota(jnp.int32, (1, EMB_ROWS), 1)
    rows = []
    for b in range(B):
        for s in range(S):
            rows.append((viota == ids_ref[b, s]).astype(jnp.float32))
    onehot = jnp.concatenate(rows, axis=0)                 # (BS, 64)
    x = jnp.dot(onehot, emb, preferred_element_type=jnp.float32)   # (BS, D), exact gather

    # ---- positional encoding (same pe row for every batch element) ----------
    pe_s = p_ref[PE_ROW:PE_ROW + S, 0:D]                   # (S, D)
    x = x + jnp.concatenate([pe_s] * B, axis=0)            # (BS, D)

    # causal mask shared by all layers / heads
    r_i = lax.broadcasted_iota(jnp.int32, (S, S), 0)
    c_i = lax.broadcasted_iota(jnp.int32, (S, S), 1)
    causal = (r_i >= c_i)[None, :, :]                      # (1, S, S)

    def layer_norm(v, g, b):
        mean = jnp.mean(v, axis=-1, keepdims=True)
        var = jnp.mean((v - mean) ** 2, axis=-1, keepdims=True)
        return (v - mean) * lax.rsqrt(var + LN_EPS) * g + b

    def split_heads(t):                                    # (BS, D) -> (B*H, S, dk)
        return jnp.stack([t[b * S:(b + 1) * S, h * dk:(h + 1) * dk]
                          for b in range(B) for h in range(H)], axis=0)

    for l in range(NUM_LAYERS):                            # static unroll (2 layers)
        wb = l * W_LAYER_ROWS
        pb = P_LAYER_ROW + l * P_LAYER_ROWS

        x_bf = x.astype(jnp.bfloat16)

        # fused QKV projection: one lane-dense (BS,32)x(32,128) matmul
        w_qkv = w_ref[wb + W_QKV_OFF: wb + W_QKV_OFF + D, :]          # (32, 128) bf16
        qkv = (jnp.dot(x_bf, w_qkv, preferred_element_type=jnp.float32)
               + p_ref[pb + R_QKV_B: pb + R_QKV_B + 1, :])            # (BS, 128) f32
        q = qkv[:, 0:D] * inv_sqrt_dk                                 # scale folded into Q
        k = qkv[:, D:2 * D]
        v = qkv[:, 2 * D:3 * D]

        q3 = split_heads(q).astype(jnp.bfloat16)                      # (BH, S, dk)
        k3 = split_heads(k).astype(jnp.bfloat16)
        v3 = split_heads(v).astype(jnp.bfloat16)

        # scaled dot-product attention over all (batch, head) pairs at once
        scores = jnp.einsum('bqd,bkd->bqk', q3, k3,
                            preferred_element_type=jnp.float32)       # (BH, S, S) f32
        scores = jnp.where(causal, scores, -1e9)
        scores = scores - jnp.max(scores, axis=-1, keepdims=True)
        e = jnp.exp(scores)
        attn = e * pl.reciprocal(jnp.sum(e, axis=-1, keepdims=True), approx=False)

        aw_ref[l * BH:(l + 1) * BH] = attn                            # one store per layer

        ctx = jnp.einsum('bqk,bkd->bqd', attn.astype(jnp.bfloat16), v3,
                         preferred_element_type=jnp.float32)          # (BH, S, dk)

        # merge heads back to (BS, D)
        ctx_flat = jnp.concatenate(
            [jnp.concatenate([ctx[b * H + h] for h in range(H)], axis=1)
             for b in range(B)], axis=0)                              # (BS, D)

        # single (D, D) output projection
        w_o = w_ref[wb + W_O_OFF: wb + W_O_OFF + D, 0:D]
        attn_out = (jnp.dot(ctx_flat.astype(jnp.bfloat16), w_o,
                            preferred_element_type=jnp.float32)
                    + p_ref[pb + R_BO: pb + R_BO + 1, 0:D])

        # residual + LayerNorm 1
        x1 = layer_norm(x + attn_out,
                        p_ref[pb + R_LN1G: pb + R_LN1G + 1, 0:D],
                        p_ref[pb + R_LN1B: pb + R_LN1B + 1, 0:D])

        # feed-forward
        w_1 = w_ref[wb + W_1_OFF: wb + W_1_OFF + D, 0:D_FF]
        w_2 = w_ref[wb + W_2_OFF: wb + W_2_OFF + D_FF, 0:D]
        hdn = (jnp.dot(x1.astype(jnp.bfloat16), w_1,
                       preferred_element_type=jnp.float32)
               + p_ref[pb + R_B1: pb + R_B1 + 1, 0:D_FF])
        hdn = jnp.maximum(hdn, 0.0)
        ff = (jnp.dot(hdn.astype(jnp.bfloat16), w_2,
                      preferred_element_type=jnp.float32)
              + p_ref[pb + R_B2: pb + R_B2 + 1, 0:D])

        # residual + LayerNorm 2
        x = layer_norm(x1 + ff,
                       p_ref[pb + R_LN2G: pb + R_LN2G + 1, 0:D],
                       p_ref[pb + R_LN2B: pb + R_LN2B + 1, 0:D])

    # final LayerNorm + LM head (lane-dense padded vocab, no bias per spec)
    xn = layer_norm(x,
                    p_ref[PF_ROW: PF_ROW + 1, 0:D],
                    p_ref[PF_ROW + 1: PF_ROW + 2, 0:D])
    w_head = w_ref[HEAD_ROW: HEAD_ROW + D, :]                         # (32, 128) bf16
    logits_ref[...] = jnp.dot(xn.astype(jnp.bfloat16), w_head,
                              preferred_element_type=jnp.float32)


# ----------------------------- wrapper ---------------------------------------
def _vmem_spec():
    return pl.BlockSpec(memory_space=pltpu.MemorySpace.VMEM)


def _forward(params, input_ids):
    B, S = input_ids.shape

    grid_spec = pltpu.PrefetchScalarGridSpec(
        num_scalar_prefetch=1,                 # input_ids -> SMEM scalars
        grid=(1,),                             # single fused step (batch folded in)
        in_specs=[_vmem_spec(), _vmem_spec()],         # w_slab, p_slab
        out_specs=(_vmem_spec(), _vmem_spec()),        # logits, attention weights
    )

    logits_pad, aw_all = pl.pallas_call(
        fused_lm_kernel,
        grid_spec=grid_spec,
        out_shape=(
            jax.ShapeDtypeStruct((B * S, V_PAD), jnp.float32),
            jax.ShapeDtypeStruct((NUM_LAYERS * B * NUM_HEADS, S, S), jnp.float32),
        ),
        compiler_params=pltpu.CompilerParams(
            dimension_semantics=("arbitrary",),
            # NOTE(v7x): a grid=(B,) "parallel" variant would put one batch row
            # per TensorCore, but per-row work is sub-microsecond and the weight
            # DMA would be duplicated per core; the fused single-step kernel is
            # used on all generations.
        ),
    )(input_ids, params["w_slab"], params["p_slab"])

    logits = logits_pad.reshape(B, S, V_PAD)[..., :VOCAB_SIZE]
    aw = aw_all.reshape(NUM_LAYERS, B, NUM_HEADS, S, S)
    attention_weights = [aw[l] for l in range(NUM_LAYERS)]
    # TODO(synk): cross-entropy loss path (targets is not None) not implemented;
    # this mirrors the eval / targets=None usage of the PyTorch module.
    loss = None
    return logits, loss, attention_weights


forward = jax.jit(_forward)


# ----------------------------- parameters ------------------------------------
def make_positional_encoding(max_seq_length, d_model):
    position = jnp.arange(max_seq_length, dtype=jnp.float32)[:, None]
    div_term = jnp.exp(jnp.arange(0, d_model, 2, dtype=jnp.float32)
                       * (-math.log(10000.0) / d_model))
    pe = jnp.zeros((max_seq_length, d_model), dtype=jnp.float32)
    pe = pe.at[:, 0::2].set(jnp.sin(position * div_term))
    pe = pe.at[:, 1::2].set(jnp.cos(position * div_term))
    return pe                                           # (max_seq, d_model)


def init_params(key):
    """PyTorch-equivalent init (normal(0, 0.02) weights, zero biases, LN=1/0),
       packed into two slabs:
         w_slab (352, 128) bf16 : per layer [Wq|Wk|Wv] (32x96, padded to 128),
                                  Wo (32x32), W1 (32x64), W2 (64x32); LM head
                                  (32x50 padded to 128) at rows 320:352.
         p_slab (104, 128) f32  : scaled embedding (rows 0:64), PE (64:80),
                                  per-layer biases + LN params (80:96),
                                  final LN (96:98)."""
    std = 0.02
    keys = jax.random.split(key, 2 + NUM_LAYERS)

    embedding = jax.random.normal(keys[0], (VOCAB_SIZE, D_MODEL), jnp.float32) * std
    head_w = jax.random.normal(keys[1], (D_MODEL, VOCAB_SIZE), jnp.float32) * std
    pe = make_positional_encoding(MAX_SEQ_LEN, D_MODEL)

    # ---- f32 param slab ----
    p_slab = jnp.zeros((P_TOTAL_ROWS, 128), jnp.float32)
    p_slab = p_slab.at[0:VOCAB_SIZE, 0:D_MODEL].set(embedding * math.sqrt(D_MODEL))
    p_slab = p_slab.at[PE_ROW:PE_ROW + MAX_SEQ_LEN, 0:D_MODEL].set(pe)
    for l in range(NUM_LAYERS):
        base = P_LAYER_ROW + l * P_LAYER_ROWS
        # all Linear biases are zero-initialized (rows stay zero); LN gamma = 1
        p_slab = p_slab.at[base + R_LN1G, 0:D_MODEL].set(1.0)
        p_slab = p_slab.at[base + R_LN2G, 0:D_MODEL].set(1.0)
    p_slab = p_slab.at[PF_ROW, 0:D_MODEL].set(1.0)      # final LN gamma

    # ---- bf16 matmul-weight slab ----
    w_slab = jnp.zeros((W_TOTAL_ROWS, 128), jnp.float32)
    for l in range(NUM_LAYERS):
        lk = jax.random.split(keys[2 + l], 6)
        lin = lambda k, fi, fo: jax.random.normal(k, (fi, fo), jnp.float32) * std
        wq = lin(lk[0], D_MODEL, D_MODEL)
        wk = lin(lk[1], D_MODEL, D_MODEL)
        wv = lin(lk[2], D_MODEL, D_MODEL)
        wo = lin(lk[3], D_MODEL, D_MODEL)
        w1 = lin(lk[4], D_MODEL, D_FF)
        w2 = lin(lk[5], D_FF, D_MODEL)

        base = l * W_LAYER_ROWS
        w_slab = w_slab.at[base + W_QKV_OFF: base + W_QKV_OFF + D_MODEL,
                           0:3 * D_MODEL].set(jnp.concatenate([wq, wk, wv], axis=1))
        w_slab = w_slab.at[base + W_O_OFF: base + W_O_OFF + D_MODEL,
                           0:D_MODEL].set(wo)
        w_slab = w_slab.at[base + W_1_OFF: base + W_1_OFF + D_MODEL,
                           0:D_FF].set(w1)
        w_slab = w_slab.at[base + W_2_OFF: base + W_2_OFF + D_FF,
                           0:D_MODEL].set(w2)
    w_slab = w_slab.at[HEAD_ROW:HEAD_ROW + D_MODEL, 0:VOCAB_SIZE].set(head_w)
    w_slab = w_slab.astype(jnp.bfloat16)

    return dict(w_slab=w_slab, p_slab=p_slab)


# ----------------------------- main -------------------------------------------
if __name__ == "__main__":
    key = jax.random.PRNGKey(0)
    pkey, dkey = jax.random.split(key)
    params = init_params(pkey)
    input_ids = jax.random.randint(dkey, (BATCH, SEQ), 0, VOCAB_SIZE,
                                   dtype=jnp.int32)

    logits, loss, attn_weights = forward(params, input_ids)
    jax.block_until_ready(logits)
    for aw in attn_weights:
        jax.block_until_ready(aw)

    assert logits.shape == (BATCH, SEQ, VOCAB_SIZE)
    assert loss is None
    assert len(attn_weights) == NUM_LAYERS
    assert attn_weights[0].shape == (BATCH, NUM_HEADS, SEQ, SEQ)
    assert bool(jnp.all(jnp.isfinite(logits)))
    # attention rows should sum to ~1 (softmax sanity)
    row_sums = jnp.sum(attn_weights[0], axis=-1)
    assert bool(jnp.all(jnp.abs(row_sums - 1.0) < 1e-3))
    print("KERNEL_OK")
</pallas_src>

<mosaic_0001>
module attributes {stable_mosaic.version = 11 : i64} {
  func.func @fused_lm_kernel(%arg0: i32, %arg1: memref<2x8xi32, #tpu.memory_space<smem>>, %arg2: memref<352x128xbf16, #tpu.memory_space<vmem>>, %arg3: memref<104x128xf32, #tpu.memory_space<vmem>>, %arg4: memref<16x128xf32, #tpu.memory_space<vmem>>, %arg5: memref<16x8x8xf32, #tpu.memory_space<vmem>>) attributes {dimension_semantics = [#tpu.dimension_semantics<arbitrary>], iteration_bounds = array<i64: 1>, scalar_prefetch = 1 : i64, scratch_operands = 0 : i64, tpu.core_type = #tpu.core_type<tc>, window_params = [{pipeline_mode = #tpu.pipeline_mode<synchronous>, transform_indices = @transform_0, window_bounds = array<i64: 352, 128>}, {pipeline_mode = #tpu.pipeline_mode<synchronous>, transform_indices = @transform_1, window_bounds = array<i64: 104, 128>}, {pipeline_mode = #tpu.pipeline_mode<synchronous>, transform_indices = @transform_2, window_bounds = array<i64: 16, 128>}, {pipeline_mode = #tpu.pipeline_mode<synchronous>, transform_indices = @transform_3, window_bounds = array<i64: 16, 8, 8>}]} {
    %c0 = arith.constant 0 : index
    %c0_0 = arith.constant 0 : index
    %0 = vector.load %arg3[%c0, %c0_0] : memref<104x128xf32, #tpu.memory_space<vmem>>, vector<64x32xf32>
    %1 = tpu.iota {dimensions = array<i32: 1>} : vector<1x64xi32>
    %c0_1 = arith.constant 0 : index
    %c0_2 = arith.constant 0 : index
    %2 = memref.load %arg1[%c0_1, %c0_2] : memref<2x8xi32, #tpu.memory_space<smem>>
    %3 = vector.broadcast %2 : i32 to vector<1x64xi32>
    %4 = arith.cmpi eq, %1, %3 : vector<1x64xi32>
    %5 = arith.extui %4 : vector<1x64xi1> to vector<1x64xi32>
    %6 = arith.sitofp %5 : vector<1x64xi32> to vector<1x64xf32>
    %c0_3 = arith.constant 0 : index
    %c1 = arith.constant 1 : index
    %7 = memref.load %arg1[%c0_3, %c1] : memref<2x8xi32, #tpu.memory_space<smem>>
    %8 = vector.broadcast %7 : i32 to vector<1x64xi32>
    %9 = arith.cmpi eq, %1, %8 : vector<1x64xi32>
    %10 = arith.extui %9 : vector<1x64xi1> to vector<1x64xi32>
    %11 = arith.sitofp %10 : vector<1x64xi32> to vector<1x64xf32>
    %c0_4 = arith.constant 0 : index
    %c2 = arith.constant 2 : index
    %12 = memref.load %arg1[%c0_4, %c2] : memref<2x8xi32, #tpu.memory_space<smem>>
    %13 = vector.broadcast %12 : i32 to vector<1x64xi32>
    %14 = arith.cmpi eq, %1, %13 : vector<1x64xi32>
    %15 = arith.extui %14 : vector<1x64xi1> to vector<1x64xi32>
    %16 = arith.sitofp %15 : vector<1x64xi32> to vector<1x64xf32>
    %c0_5 = arith.constant 0 : index
    %c3 = arith.constant 3 : index
    %17 = memref.load %arg1[%c0_5, %c3] : memref<2x8xi32, #tpu.memory_space<smem>>
    %18 = vector.broadcast %17 : i32 to vector<1x64xi32>
    %19 = arith.cmpi eq, %1, %18 : vector<1x64xi32>
    %20 = arith.extui %19 : vector<1x64xi1> to vector<1x64xi32>
    %21 = arith.sitofp %20 : vector<1x64xi32> to vector<1x64xf32>
    %c0_6 = arith.constant 0 : index
    %c4 = arith.constant 4 : index
    %22 = memref.load %arg1[%c0_6, %c4] : memref<2x8xi32, #tpu.memory_space<smem>>
    %23 = vector.broadcast %22 : i32 to vector<1x64xi32>
    %24 = arith.cmpi eq, %1, %23 : vector<1x64xi32>
    %25 = arith.extui %24 : vector<1x64xi1> to vector<1x64xi32>
    %26 = arith.sitofp %25 : vector<1x64xi32> to vector<1x64xf32>
    %c0_7 = arith.constant 0 : index
    %c5 = arith.constant 5 : index
    %27 = memref.load %arg1[%c0_7, %c5] : memref<2x8xi32, #tpu.memory_space<smem>>
    %28 = vector.broadcast %27 : i32 to vector<1x64xi32>
    %29 = arith.cmpi eq, %1, %28 : vector<1x64xi32>
    %30 = arith.extui %29 : vector<1x64xi1> to vector<1x64xi32>
    %31 = arith.sitofp %30 : vector<1x64xi32> to vector<1x64xf32>
    %c0_8 = arith.constant 0 : index
    %c6 = arith.constant 6 : index
    %32 = memref.load %arg1[%c0_8, %c6] : memref<2x8xi32, #tpu.memory_space<smem>>
    %33 = vector.broadcast %32 : i32 to vector<1x64xi32>
    %34 = arith.cmpi eq, %1, %33 : vector<1x64xi32>
    %35 = arith.extui %34 : vector<1x64xi1> to vector<1x64xi32>
    %36 = arith.sitofp %35 : vector<1x64xi32> to vector<1x64xf32>
    %c0_9 = arith.constant 0 : index
    %c7 = arith.constant 7 : index
    %37 = memref.load %arg1[%c0_9, %c7] : memref<2x8xi32, #tpu.memory_space<smem>>
    %38 = vector.broadcast %37 : i32 to vector<1x64xi32>
    %39 = arith.cmpi eq, %1, %38 : vector<1x64xi32>
    %40 = arith.extui %39 : vector<1x64xi1> to vector<1x64xi32>
    %41 = arith.sitofp %40 : vector<1x64xi32> to vector<1x64xf32>
    %c1_10 = arith.constant 1 : index
    %c0_11 = arith.constant 0 : index
    %42 = memref.load %arg1[%c1_10, %c0_11] : memref<2x8xi32, #tpu.memory_space<smem>>
    %43 = vector.broadcast %42 : i32 to vector<1x64xi32>
    %44 = arith.cmpi eq, %1, %43 : vector<1x64xi32>
    %45 = arith.extui %44 : vector<1x64xi1> to vector<1x64xi32>
    %46 = arith.sitofp %45 : vector<1x64xi32> to vector<1x64xf32>
    %c1_12 = arith.constant 1 : index
    %c1_13 = arith.constant 1 : index
    %47 = memref.load %arg1[%c1_12, %c1_13] : memref<2x8xi32, #tpu.memory_space<smem>>
    %48 = vector.broadcast %47 : i32 to vector<1x64xi32>
    %49 = arith.cmpi eq, %1, %48 : vector<1x64xi32>
    %50 = arith.extui %49 : vector<1x64xi1> to vector<1x64xi32>
    %51 = arith.sitofp %50 : vector<1x64xi32> to vector<1x64xf32>
    %c1_14 = arith.constant 1 : index
    %c2_15 = arith.constant 2 : index
    %52 = memref.load %arg1[%c1_14, %c2_15] : memref<2x8xi32, #tpu.memory_space<smem>>
    %53 = vector.broadcast %52 : i32 to vector<1x64xi32>
    %54 = arith.cmpi eq, %1, %53 : vector<1x64xi32>
    %55 = arith.extui %54 : vector<1x64xi1> to vector<1x64xi32>
    %56 = arith.sitofp %55 : vector<1x64xi32> to vector<1x64xf32>
    %c1_16 = arith.constant 1 : index
    %c3_17 = arith.constant 3 : index
    %57 = memref.load %arg1[%c1_16, %c3_17] : memref<2x8xi32, #tpu.memory_space<smem>>
    %58 = vector.broadcast %57 : i32 to vector<1x64xi32>
    %59 = arith.cmpi eq, %1, %58 : vector<1x64xi32>
    %60 = arith.extui %59 : vector<1x64xi1> to vector<1x64xi32>
    %61 = arith.sitofp %60 : vector<1x64xi32> to vector<1x64xf32>
    %c1_18 = arith.constant 1 : index
    %c4_19 = arith.constant 4 : index
    %62 = memref.load %arg1[%c1_18, %c4_19] : memref<2x8xi32, #tpu.memory_space<smem>>
    %63 = vector.broadcast %62 : i32 to vector<1x64xi32>
    %64 = arith.cmpi eq, %1, %63 : vector<1x64xi32>
    %65 = arith.extui %64 : vector<1x64xi1> to vector<1x64xi32>
    %66 = arith.sitofp %65 : vector<1x64xi32> to vector<1x64xf32>
    %c1_20 = arith.constant 1 : index
    %c5_21 = arith.constant 5 : index
    %67 = memref.load %arg1[%c1_20, %c5_21] : memref<2x8xi32, #tpu.memory_space<smem>>
    %68 = vector.broadcast %67 : i32 to vector<1x64xi32>
    %69 = arith.cmpi eq, %1, %68 : vector<1x64xi32>
    %70 = arith.extui %69 : vector<1x64xi1> to vector<1x64xi32>
    %71 = arith.sitofp %70 : vector<1x64xi32> to vector<1x64xf32>
    %c1_22 = arith.constant 1 : index
    %c6_23 = arith.constant 6 : index
    %72 = memref.load %arg1[%c1_22, %c6_23] : memref<2x8xi32, #tpu.memory_space<smem>>
    %73 = vector.broadcast %72 : i32 to vector<1x64xi32>
    %74 = arith.cmpi eq, %1, %73 : vector<1x64xi32>
    %75 = arith.extui %74 : vector<1x64xi1> to vector<1x64xi32>
    %76 = arith.sitofp %75 : vector<1x64xi32> to vector<1x64xf32>
    %c1_24 = arith.constant 1 : index
    %c7_25 = arith.constant 7 : index
    %77 = memref.load %arg1[%c1_24, %c7_25] : memref<2x8xi32, #tpu.memory_space<smem>>
    %78 = vector.broadcast %77 : i32 to vector<1x64xi32>
    %79 = arith.cmpi eq, %1, %78 : vector<1x64xi32>
    %80 = arith.extui %79 : vector<1x64xi1> to vector<1x64xi32>
    %81 = arith.sitofp %80 : vector<1x64xi32> to vector<1x64xf32>
    %82 = tpu.concatenate %6, %11, %16, %21, %26, %31, %36, %41, %46, %51, %56, %61, %66, %71, %76, %81 in 0 : vector<1x64xf32>, vector<1x64xf32>, vector<1x64xf32>, vector<1x64xf32>, vector<1x64xf32>, vector<1x64xf32>, vector<1x64xf32>, vector<1x64xf32>, vector<1x64xf32>, vector<1x64xf32>, vector<1x64xf32>, vector<1x64xf32>, vector<1x64xf32>, vector<1x64xf32>, vector<1x64xf32>, vector<1x64xf32> -> vector<16x64xf32>
    %cst = arith.constant dense<0.000000e+00> : vector<16x32xf32>
    %83 = tpu.matmul %82, %0, %cst {dimension_numbers = #tpu.dot_dimension_numbers<[1], [0], [0], [1], [0, 0, 1, 1], [], []>} : vector<16x64xf32>, vector<64x32xf32>, vector<16x32xf32> -> vector<16x32xf32>
    %c64 = arith.constant 64 : index
    %c0_26 = arith.constant 0 : index
    %84 = vector.load %arg3[%c64, %c0_26] : memref<104x128xf32, #tpu.memory_space<vmem>>, vector<8x32xf32>
    %85 = tpu.concatenate %84, %84 in 0 : vector<8x32xf32>, vector<8x32xf32> -> vector<16x32xf32>
    %86 = arith.addf %83, %85 : vector<16x32xf32>
    %87 = tpu.iota {dimensions = array<i32: 0>} : vector<8x8xi32>
    %88 = tpu.iota {dimensions = array<i32: 1>} : vector<8x8xi32>
    %89 = arith.cmpi sge, %87, %88 : vector<8x8xi32>
    %90 = vector.shape_cast %89 : vector<8x8xi1> to vector<1x8x8xi1>
    %91 = arith.truncf %86 : vector<16x32xf32> to vector<16x32xbf16>
    %c0_27 = arith.constant 0 : index
    %c0_28 = arith.constant 0 : index
    %92 = vector.load %arg2[%c0_27, %c0_28] : memref<352x128xbf16, #tpu.memory_space<vmem>>, vector<32x128xbf16>
    %cst_29 = arith.constant dense<0.000000e+00> : vector<16x128xf32>
    %93 = tpu.matmul %91, %92, %cst_29 {dimension_numbers = #tpu.dot_dimension_numbers<[1], [0], [0], [1], [0, 0, 1, 1], [], []>} : vector<16x32xbf16>, vector<32x128xbf16>, vector<16x128xf32> -> vector<16x128xf32>
    %c80 = arith.constant 80 : index
    %c0_30 = arith.constant 0 : index
    %94 = vector.load %arg3[%c80, %c0_30] : memref<104x128xf32, #tpu.memory_space<vmem>>, vector<1x128xf32>
    %95 = vector.broadcast %94 : vector<1x128xf32> to vector<16x128xf32>
    %96 = arith.addf %93, %95 : vector<16x128xf32>
    %97 = vector.extract_strided_slice %96 {offsets = [0, 0], sizes = [16, 32], strides = [1, 1]} : vector<16x128xf32> to vector<16x32xf32>
    %cst_31 = arith.constant 0.353553385 : f32
    %98 = vector.broadcast %cst_31 : f32 to vector<16x32xf32>
    %99 = arith.mulf %97, %98 : vector<16x32xf32>
    %100 = vector.extract_strided_slice %96 {offsets = [0, 32], sizes = [16, 32], strides = [1, 1]} : vector<16x128xf32> to vector<16x32xf32>
    %101 = vector.extract_strided_slice %96 {offsets = [0, 64], sizes = [16, 32], strides = [1, 1]} : vector<16x128xf32> to vector<16x32xf32>
    %102 = vector.extract_strided_slice %99 {offsets = [0, 0], sizes = [8, 8], strides = [1, 1]} : vector<16x32xf32> to vector<8x8xf32>
    %103 = vector.extract_strided_slice %99 {offsets = [0, 8], sizes = [8, 8], strides = [1, 1]} : vector<16x32xf32> to vector<8x8xf32>
    %104 = vector.extract_strided_slice %99 {offsets = [0, 16], sizes = [8, 8], strides = [1, 1]} : vector<16x32xf32> to vector<8x8xf32>
    %105 = vector.extract_strided_slice %99 {offsets = [0, 24], sizes = [8, 8], strides = [1, 1]} : vector<16x32xf32> to vector<8x8xf32>
    %106 = vector.extract_strided_slice %99 {offsets = [8, 0], sizes = [8, 8], strides = [1, 1]} : vector<16x32xf32> to vector<8x8xf32>
    %107 = vector.extract_strided_slice %99 {offsets = [8, 8], sizes = [8, 8], strides = [1, 1]} : vector<16x32xf32> to vector<8x8xf32>
    %108 = vector.extract_strided_slice %99 {offsets = [8, 16], sizes = [8, 8], strides = [1, 1]} : vector<16x32xf32> to vector<8x8xf32>
    %109 = vector.extract_strided_slice %99 {offsets = [8, 24], sizes = [8, 8], strides = [1, 1]} : vector<16x32xf32> to vector<8x8xf32>
    %110 = vector.shape_cast %102 : vector<8x8xf32> to vector<1x8x8xf32>
    %111 = vector.shape_cast %103 : vector<8x8xf32> to vector<1x8x8xf32>
    %112 = vector.shape_cast %104 : vector<8x8xf32> to vector<1x8x8xf32>
    %113 = vector.shape_cast %105 : vector<8x8xf32> to vector<1x8x8xf32>
    %114 = vector.shape_cast %106 : vector<8x8xf32> to vector<1x8x8xf32>
    %115 = vector.shape_cast %107 : vector<8x8xf32> to vector<1x8x8xf32>
    %116 = vector.shape_cast %108 : vector<8x8xf32> to vector<1x8x8xf32>
    %117 = vector.shape_cast %109 : vector<8x8xf32> to vector<1x8x8xf32>
    %118 = tpu.concatenate %110, %111, %112, %113, %114, %115, %116, %117 in 0 : vector<1x8x8xf32>, vector<1x8x8xf32>, vector<1x8x8xf32>, vector<1x8x8xf32>, vector<1x8x8xf32>, vector<1x8x8xf32>, vector<1x8x8xf32>, vector<1x8x8xf32> -> vector<8x8x8xf32>
    %119 = arith.truncf %118 : vector<8x8x8xf32> to vector<8x8x8xbf16>
    %120 = vector.extract_strided_slice %100 {offsets = [0, 0], sizes = [8, 8], strides = [1, 1]} : vector<16x32xf32> to vector<8x8xf32>
    %121 = vector.extract_strided_slice %100 {offsets = [0, 8], sizes = [8, 8], strides = [1, 1]} : vector<16x32xf32> to vector<8x8xf32>
    %122 = vector.extract_strided_slice %100 {offsets = [0, 16], sizes = [8, 8], strides = [1, 1]} : vector<16x32xf32> to vector<8x8xf32>
    %123 = vector.extract_strided_slice %100 {offsets = [0, 24], sizes = [8, 8], strides = [1, 1]} : vector<16x32xf32> to vector<8x8xf32>
    %124 = vector.extract_strided_slice %100 {offsets = [8, 0], sizes = [8, 8], strides = [1, 1]} : vector<16x32xf32> to vector<8x8xf32>
    %125 = vector.extract_strided_slice %100 {offsets = [8, 8], sizes = [8, 8], strides = [1, 1]} : vector<16x32xf32> to vector<8x8xf32>
    %126 = vector.extract_strided_slice %100 {offsets = [8, 16], sizes = [8, 8], strides = [1, 1]} : vector<16x32xf32> to vector<8x8xf32>
    %127 = vector.extract_strided_slice %100 {offsets = [8, 24], sizes = [8, 8], strides = [1, 1]} : vector<16x32xf32> to vector<8x8xf32>
    %128 = vector.shape_cast %120 : vector<8x8xf32> to vector<1x8x8xf32>
    %129 = vector.shape_cast %121 : vector<8x8xf32> to vector<1x8x8xf32>
    %130 = vector.shape_cast %122 : vector<8x8xf32> to vector<1x8x8xf32>
    %131 = vector.shape_cast %123 : vector<8x8xf32> to vector<1x8x8xf32>
    %132 = vector.shape_cast %124 : vector<8x8xf32> to vector<1x8x8xf32>
    %133 = vector.shape_cast %125 : vector<8x8xf32> to vector<1x8x8xf32>
    %134 = vector.shape_cast %126 : vector<8x8xf32> to vector<1x8x8xf32>
    %135 = vector.shape_cast %127 : vector<8x8xf32> to vector<1x8x8xf32>
    %136 = tpu.concatenate %128, %129, %130, %131, %132, %133, %134, %135 in 0 : vector<1x8x8xf32>, vector<1x8x8xf32>, vector<1x8x8xf32>, vector<1x8x8xf32>, vector<1x8x8xf32>, vector<1x8x8xf32>, vector<1x8x8xf32>, vector<1x8x8xf32> -> vector<8x8x8xf32>
    %137 = arith.truncf %136 : vector<8x8x8xf32> to vector<8x8x8xbf16>
    %138 = vector.extract_strided_slice %101 {offsets = [0, 0], sizes = [8, 8], strides = [1, 1]} : vector<16x32xf32> to vector<8x8xf32>
    %139 = vector.extract_strided_slice %101 {offsets = [0, 8], sizes = [8, 8], strides = [1, 1]} : vector<16x32xf32> to vector<8x8xf32>
    %140 = vector.extract_strided_slice %101 {offsets = [0, 16], sizes = [8, 8], strides = [1, 1]} : vector<16x32xf32> to vector<8x8xf32>
    %141 = vector.extract_strided_slice %101 {offsets = [0, 24], sizes = [8, 8], strides = [1, 1]} : vector<16x32xf32> to vector<8x8xf32>
    %142 = vector.extract_strided_slice %101 {offsets = [8, 0], sizes = [8, 8], strides = [1, 1]} : vector<16x32xf32> to vector<8x8xf32>
    %143 = vector.extract_strided_slice %101 {offsets = [8, 8], sizes = [8, 8], strides = [1, 1]} : vector<16x32xf32> to vector<8x8xf32>
    %144 = vector.extract_strided_slice %101 {offsets = [8, 16], sizes = [8, 8], strides = [1, 1]} : vector<16x32xf32> to vector<8x8xf32>
    %145 = vector.extract_strided_slice %101 {offsets = [8, 24], sizes = [8, 8], strides = [1, 1]} : vector<16x32xf32> to vector<8x8xf32>
    %146 = vector.shape_cast %138 : vector<8x8xf32> to vector<1x8x8xf32>
    %147 = vector.shape_cast %139 : vector<8x8xf32> to vector<1x8x8xf32>
    %148 = vector.shape_cast %140 : vector<8x8xf32> to vector<1x8x8xf32>
    %149 = vector.shape_cast %141 : vector<8x8xf32> to vector<1x8x8xf32>
    %150 = vector.shape_cast %142 : vector<8x8xf32> to vector<1x8x8xf32>
    %151 = vector.shape_cast %143 : vector<8x8xf32> to vector<1x8x8xf32>
    %152 = vector.shape_cast %144 : vector<8x8xf32> to vector<1x8x8xf32>
    %153 = vector.shape_cast %145 : vector<8x8xf32> to vector<1x8x8xf32>
    %154 = tpu.concatenate %146, %147, %148, %149, %150, %151, %152, %153 in 0 : vector<1x8x8xf32>, vector<1x8x8xf32>, vector<1x8x8xf32>, vector<1x8x8xf32>, vector<1x8x8xf32>, vector<1x8x8xf32>, vector<1x8x8xf32>, vector<1x8x8xf32> -> vector<8x8x8xf32>
    %155 = arith.truncf %154 : vector<8x8x8xf32> to vector<8x8x8xbf16>
    "tpu.trace_start"() <{level = 10 : i32, message = "bqd,bkd->bqk"}> : () -> ()
    %cst_32 = arith.constant dense<0.000000e+00> : vector<8x8x8xf32>
    %156 = tpu.matmul %119, %137, %cst_32 {dimension_numbers = #tpu.dot_dimension_numbers<[2], [2], [1], [1], [0, 0, 0, 1, 1, 1], [0], [0]>} : vector<8x8x8xbf16>, vector<8x8x8xbf16>, vector<8x8x8xf32> -> vector<8x8x8xf32>
    %cst_33 = arith.constant -1.000000e+09 : f32
    "tpu.trace_stop"() : () -> ()
    %157 = vector.shape_cast %90 : vector<1x8x8xi1> to vector<1x8x8xi1>
    %158 = vector.broadcast %157 : vector<1x8x8xi1> to vector<8x8x8xi1>
    %159 = vector.broadcast %cst_33 : f32 to vector<8x8x8xf32>
    %160 = arith.select %158, %156, %159 : vector<8x8x8xi1>, vector<8x8x8xf32>
    %cst_34 = arith.constant dense<0xFF800000> : vector<8x8xf32>
    %161 = vector.multi_reduction <maximumf>, %160, %cst_34 [2] : vector<8x8x8xf32> to vector<8x8xf32>
    %162 = vector.shape_cast %161 : vector<8x8xf32> to vector<8x8x1xf32>
    %163 = vector.broadcast %162 : vector<8x8x1xf32> to vector<8x8x8xf32>
    %164 = arith.subf %160, %163 : vector<8x8x8xf32>
    %165 = math.exp %164 : vector<8x8x8xf32>
    %cst_35 = arith.constant dense<0.000000e+00> : vector<8x8xf32>
    %166 = vector.multi_reduction <add>, %165, %cst_35 [2] : vector<8x8x8xf32> to vector<8x8xf32>
    %167 = vector.shape_cast %166 : vector<8x8xf32> to vector<8x8x1xf32>
    %168 = tpu.reciprocal %167 : vector<8x8x1xf32> -> vector<8x8x1xf32>
    %169 = vector.broadcast %168 : vector<8x8x1xf32> to vector<8x8x8xf32>
    %170 = arith.mulf %165, %169 : vector<8x8x8xf32>
    %c0_36 = arith.constant 0 : index
    %c0_37 = arith.constant 0 : index
    %c0_38 = arith.constant 0 : index
    %171 = vector.load %arg5[%c0_36, %c0_37, %c0_38] : memref<16x8x8xf32, #tpu.memory_space<vmem>>, vector<8x8x8xf32>
    tpu.vector_store %arg5[%c0_36, %c0_37, %c0_38], %170 {strides = array<i32>} : memref<16x8x8xf32, #tpu.memory_space<vmem>>, vector<8x8x8xf32>,
    %172 = arith.truncf %170 : vector<8x8x8xf32> to vector<8x8x8xbf16>
    "tpu.trace_start"() <{level = 10 : i32, message = "bqk,bkd->bqd"}> : () -> ()
    %cst_39 = arith.constant dense<0.000000e+00> : vector<8x8x8xf32>
    %173 = tpu.matmul %172, %155, %cst_39 {dimension_numbers = #tpu.dot_dimension_numbers<[2], [1], [1], [2], [0, 0, 0, 1, 1, 2], [0], [0]>} : vector<8x8x8xbf16>, vector<8x8x8xbf16>, vector<8x8x8xf32> -> vector<8x8x8xf32>
    "tpu.trace_stop"() : () -> ()
    %174 = vector.extract_strided_slice %173 {offsets = [0, 0, 0], sizes = [1, 8, 8], strides = [1, 1, 1]} : vector<8x8x8xf32> to vector<1x8x8xf32>
    %175 = vector.shape_cast %174 : vector<1x8x8xf32> to vector<8x8xf32>
    %176 = vector.extract_strided_slice %173 {offsets = [1, 0, 0], sizes = [1, 8, 8], strides = [1, 1, 1]} : vector<8x8x8xf32> to vector<1x8x8xf32>
    %177 = vector.shape_cast %176 : vector<1x8x8xf32> to vector<8x8xf32>
    %178 = vector.extract_strided_slice %173 {offsets = [2, 0, 0], sizes = [1, 8, 8], strides = [1, 1, 1]} : vector<8x8x8xf32> to vector<1x8x8xf32>
    %179 = vector.shape_cast %178 : vector<1x8x8xf32> to vector<8x8xf32>
    %180 = vector.extract_strided_slice %173 {offsets = [3, 0, 0], sizes = [1, 8, 8], strides = [1, 1, 1]} : vector<8x8x8xf32> to vector<1x8x8xf32>
    %181 = vector.shape_cast %180 : vector<1x8x8xf32> to vector<8x8xf32>
    %182 = tpu.concatenate %175, %177, %179, %181 in 1 : vector<8x8xf32>, vector<8x8xf32>, vector<8x8xf32>, vector<8x8xf32> -> vector<8x32xf32>
    %183 = vector.extract_strided_slice %173 {offsets = [4, 0, 0], sizes = [1, 8, 8], strides = [1, 1, 1]} : vector<8x8x8xf32> to vector<1x8x8xf32>
    %184 = vector.shape_cast %183 : vector<1x8x8xf32> to vector<8x8xf32>
    %185 = vector.extract_strided_slice %173 {offsets = [5, 0, 0], sizes = [1, 8, 8], strides = [1, 1, 1]} : vector<8x8x8xf32> to vector<1x8x8xf32>
    %186 = vector.shape_cast %185 : vector<1x8x8xf32> to vector<8x8xf32>
    %187 = vector.extract_strided_slice %173 {offsets = [6, 0, 0], sizes = [1, 8, 8], strides = [1, 1, 1]} : vector<8x8x8xf32> to vector<1x8x8xf32>
    %188 = vector.shape_cast %187 : vector<1x8x8xf32> to vector<8x8xf32>
    %189 = vector.extract_strided_slice %173 {offsets = [7, 0, 0], sizes = [1, 8, 8], strides = [1, 1, 1]} : vector<8x8x8xf32> to vector<1x8x8xf32>
    %190 = vector.shape_cast %189 : vector<1x8x8xf32> to vector<8x8xf32>
    %191 = tpu.concatenate %184, %186, %188, %190 in 1 : vector<8x8xf32>, vector<8x8xf32>, vector<8x8xf32>, vector<8x8xf32> -> vector<8x32xf32>
    %192 = tpu.concatenate %182, %191 in 0 : vector<8x32xf32>, vector<8x32xf32> -> vector<16x32xf32>
    %c32 = arith.constant 32 : index
    %c0_40 = arith.constant 0 : index
    %193 = vector.load %arg2[%c32, %c0_40] : memref<352x128xbf16, #tpu.memory_space<vmem>>, vector<32x32xbf16>
    %194 = arith.truncf %192 : vector<16x32xf32> to vector<16x32xbf16>
    %cst_41 = arith.constant dense<0.000000e+00> : vector<16x32xf32>
    %195 = tpu.matmul %194, %193, %cst_41 {dimension_numbers = #tpu.dot_dimension_numbers<[1], [0], [0], [1], [0, 0, 1, 1], [], []>} : vector<16x32xbf16>, vector<32x32xbf16>, vector<16x32xf32> -> vector<16x32xf32>
    %c81 = arith.constant 81 : index
    %c0_42 = arith.constant 0 : index
    %196 = vector.load %arg3[%c81, %c0_42] : memref<104x128xf32, #tpu.memory_space<vmem>>, vector<1x32xf32>
    %197 = vector.broadcast %196 : vector<1x32xf32> to vector<16x32xf32>
    %198 = arith.addf %195, %197 : vector<16x32xf32>
    %199 = arith.addf %86, %198 : vector<16x32xf32>
    %c82 = arith.constant 82 : index
    %c0_43 = arith.constant 0 : index
    %200 = vector.load %arg3[%c82, %c0_43] : memref<104x128xf32, #tpu.memory_space<vmem>>, vector<1x32xf32>
    %c83 = arith.constant 83 : index
    %c0_44 = arith.constant 0 : index
    %201 = vector.load %arg3[%c83, %c0_44] : memref<104x128xf32, #tpu.memory_space<vmem>>, vector<1x32xf32>
    %cst_45 = arith.constant dense<0.000000e+00> : vector<16xf32>
    %202 = vector.multi_reduction <add>, %199, %cst_45 [1] : vector<16x32xf32> to vector<16xf32>
    %203 = vector.shape_cast %202 : vector<16xf32> to vector<16x1xf32>
    %cst_46 = arith.constant 3.200000e+01 : f32
    %204 = vector.broadcast %cst_46 : f32 to vector<16x1xf32>
    %205 = arith.divf %203, %204 : vector<16x1xf32>
    %206 = vector.broadcast %205 : vector<16x1xf32> to vector<16x32xf32>
    %207 = arith.subf %199, %206 : vector<16x32xf32>
    %208 = arith.mulf %207, %207 : vector<16x32xf32>
    %cst_47 = arith.constant dense<0.000000e+00> : vector<16xf32>
    %209 = vector.multi_reduction <add>, %208, %cst_47 [1] : vector<16x32xf32> to vector<16xf32>
    %210 = vector.shape_cast %209 : vector<16xf32> to vector<16x1xf32>
    %cst_48 = arith.constant 3.200000e+01 : f32
    %211 = vector.broadcast %cst_48 : f32 to vector<16x1xf32>
    %212 = arith.divf %210, %211 : vector<16x1xf32>
    %213 = vector.broadcast %205 : vector<16x1xf32> to vector<16x32xf32>
    %214 = arith.subf %199, %213 : vector<16x32xf32>
    %cst_49 = arith.constant 9.99999974E-6 : f32
    %215 = vector.broadcast %cst_49 : f32 to vector<16x1xf32>
    %216 = arith.addf %212, %215 : vector<16x1xf32>
    %217 = math.rsqrt %216 : vector<16x1xf32>
    %218 = vector.broadcast %217 : vector<16x1xf32> to vector<16x32xf32>
    %219 = arith.mulf %214, %218 : vector<16x32xf32>
    %220 = vector.broadcast %200 : vector<1x32xf32> to vector<16x32xf32>
    %221 = arith.mulf %219, %220 : vector<16x32xf32>
    %222 = vector.broadcast %201 : vector<1x32xf32> to vector<16x32xf32>
    %223 = arith.addf %221, %222 : vector<16x32xf32>
    %c64_50 = arith.constant 64 : index
    %c0_51 = arith.constant 0 : index
    %224 = vector.load %arg2[%c64_50, %c0_51] : memref<352x128xbf16, #tpu.memory_space<vmem>>, vector<32x64xbf16>
    %c96 = arith.constant 96 : index
    %c0_52 = arith.constant 0 : index
    %225 = vector.load %arg2[%c96, %c0_52] : memref<352x128xbf16, #tpu.memory_space<vmem>>, vector<64x32xbf16>
    %226 = arith.truncf %223 : vector<16x32xf32> to vector<16x32xbf16>
    %cst_53 = arith.constant dense<0.000000e+00> : vector<16x64xf32>
    %227 = tpu.matmul %226, %224, %cst_53 {dimension_numbers = #tpu.dot_dimension_numbers<[1], [0], [0], [1], [0, 0, 1, 1], [], []>} : vector<16x32xbf16>, vector<32x64xbf16>, vector<16x64xf32> -> vector<16x64xf32>
    %c84 = arith.constant 84 : index
    %c0_54 = arith.constant 0 : index
    %228 = vector.load %arg3[%c84, %c0_54] : memref<104x128xf32, #tpu.memory_space<vmem>>, vector<1x64xf32>
    %229 = vector.broadcast %228 : vector<1x64xf32> to vector<16x64xf32>
    %230 = arith.addf %227, %229 : vector<16x64xf32>
    %cst_55 = arith.constant 0.000000e+00 : f32
    %231 = vector.broadcast %cst_55 : f32 to vector<16x64xf32>
    %232 = arith.maximumf %230, %231 : vector<16x64xf32>
    %233 = arith.truncf %232 : vector<16x64xf32> to vector<16x64xbf16>
    %cst_56 = arith.constant dense<0.000000e+00> : vector<16x32xf32>
    %234 = tpu.matmul %233, %225, %cst_56 {dimension_numbers = #tpu.dot_dimension_numbers<[1], [0], [0], [1], [0, 0, 1, 1], [], []>} : vector<16x64xbf16>, vector<64x32xbf16>, vector<16x32xf32> -> vector<16x32xf32>
    %c85 = arith.constant 85 : index
    %c0_57 = arith.constant 0 : index
    %235 = vector.load %arg3[%c85, %c0_57] : memref<104x128xf32, #tpu.memory_space<vmem>>, vector<1x32xf32>
    %236 = vector.broadcast %235 : vector<1x32xf32> to vector<16x32xf32>
    %237 = arith.addf %234, %236 : vector<16x32xf32>
    %238 = arith.addf %223, %237 : vector<16x32xf32>
    %c86 = arith.constant 86 : index
    %c0_58 = arith.constant 0 : index
    %239 = vector.load %arg3[%c86, %c0_58] : memref<104x128xf32, #tpu.memory_space<vmem>>, vector<1x32xf32>
    %c87 = arith.constant 87 : index
    %c0_59 = arith.constant 0 : index
    %240 = vector.load %arg3[%c87, %c0_59] : memref<104x128xf32, #tpu.memory_space<vmem>>, vector<1x32xf32>
    %cst_60 = arith.constant dense<0.000000e+00> : vector<16xf32>
    %241 = vector.multi_reduction <add>, %238, %cst_60 [1] : vector<16x32xf32> to vector<16xf32>
    %242 = vector.shape_cast %241 : vector<16xf32> to vector<16x1xf32>
    %cst_61 = arith.constant 3.200000e+01 : f32
    %243 = vector.broadcast %cst_61 : f32 to vector<16x1xf32>
    %244 = arith.divf %242, %243 : vector<16x1xf32>
    %245 = vector.broadcast %244 : vector<16x1xf32> to vector<16x32xf32>
    %246 = arith.subf %238, %245 : vector<16x32xf32>
    %247 = arith.mulf %246, %246 : vector<16x32xf32>
    %cst_62 = arith.constant dense<0.000000e+00> : vector<16xf32>
    %248 = vector.multi_reduction <add>, %247, %cst_62 [1] : vector<16x32xf32> to vector<16xf32>
    %249 = vector.shape_cast %248 : vector<16xf32> to vector<16x1xf32>
    %cst_63 = arith.constant 3.200000e+01 : f32
    %250 = vector.broadcast %cst_63 : f32 to vector<16x1xf32>
    %251 = arith.divf %249, %250 : vector<16x1xf32>
    %252 = vector.broadcast %244 : vector<16x1xf32> to vector<16x32xf32>
    %253 = arith.subf %238, %252 : vector<16x32xf32>
    %cst_64 = arith.constant 9.99999974E-6 : f32
    %254 = vector.broadcast %cst_64 : f32 to vector<16x1xf32>
    %255 = arith.addf %251, %254 : vector<16x1xf32>
    %256 = math.rsqrt %255 : vector<16x1xf32>
    %257 = vector.broadcast %256 : vector<16x1xf32> to vector<16x32xf32>
    %258 = arith.mulf %253, %257 : vector<16x32xf32>
    %259 = vector.broadcast %239 : vector<1x32xf32> to vector<16x32xf32>
    %260 = arith.mulf %258, %259 : vector<16x32xf32>
    %261 = vector.broadcast %240 : vector<1x32xf32> to vector<16x32xf32>
    %262 = arith.addf %260, %261 : vector<16x32xf32>
    %263 = arith.truncf %262 : vector<16x32xf32> to vector<16x32xbf16>
    %c160 = arith.constant 160 : index
    %c0_65 = arith.constant 0 : index
    %264 = vector.load %arg2[%c160, %c0_65] : memref<352x128xbf16, #tpu.memory_space<vmem>>, vector<32x128xbf16>
    %cst_66 = arith.constant dense<0.000000e+00> : vector<16x128xf32>
    %265 = tpu.matmul %263, %264, %cst_66 {dimension_numbers = #tpu.dot_dimension_numbers<[1], [0], [0], [1], [0, 0, 1, 1], [], []>} : vector<16x32xbf16>, vector<32x128xbf16>, vector<16x128xf32> -> vector<16x128xf32>
    %c88 = arith.constant 88 : index
    %c0_67 = arith.constant 0 : index
    %266 = vector.load %arg3[%c88, %c0_67] : memref<104x128xf32, #tpu.memory_space<vmem>>, vector<1x128xf32>
    %267 = vector.broadcast %266 : vector<1x128xf32> to vector<16x128xf32>
    %268 = arith.addf %265, %267 : vector<16x128xf32>
    %269 = vector.extract_strided_slice %268 {offsets = [0, 0], sizes = [16, 32], strides = [1, 1]} : vector<16x128xf32> to vector<16x32xf32>
    %cst_68 = arith.constant 0.353553385 : f32
    %270 = vector.broadcast %cst_68 : f32 to vector<16x32xf32>
    %271 = arith.mulf %269, %270 : vector<16x32xf32>
    %272 = vector.extract_strided_slice %268 {offsets = [0, 32], sizes = [16, 32], strides = [1, 1]} : vector<16x128xf32> to vector<16x32xf32>
    %273 = vector.extract_strided_slice %268 {offsets = [0, 64], sizes = [16, 32], strides = [1, 1]} : vector<16x128xf32> to vector<16x32xf32>
    %274 = vector.extract_strided_slice %271 {offsets = [0, 0], sizes = [8, 8], strides = [1, 1]} : vector<16x32xf32> to vector<8x8xf32>
    %275 = vector.extract_strided_slice %271 {offsets = [0, 8], sizes = [8, 8], strides = [1, 1]} : vector<16x32xf32> to vector<8x8xf32>
    %276 = vector.extract_strided_slice %271 {offsets = [0, 16], sizes = [8, 8], strides = [1, 1]} : vector<16x32xf32> to vector<8x8xf32>
    %277 = vector.extract_strided_slice %271 {offsets = [0, 24], sizes = [8, 8], strides = [1, 1]} : vector<16x32xf32> to vector<8x8xf32>
    %278 = vector.extract_strided_slice %271 {offsets = [8, 0], sizes = [8, 8], strides = [1, 1]} : vector<16x32xf32> to vector<8x8xf32>
    %279 = vector.extract_strided_slice %271 {offsets = [8, 8], sizes = [8, 8], strides = [1, 1]} : vector<16x32xf32> to vector<8x8xf32>
    %280 = vector.extract_strided_slice %271 {offsets = [8, 16], sizes = [8, 8], strides = [1, 1]} : vector<16x32xf32> to vector<8x8xf32>
    %281 = vector.extract_strided_slice %271 {offsets = [8, 24], sizes = [8, 8], strides = [1, 1]} : vector<16x32xf32> to vector<8x8xf32>
    %282 = vector.shape_cast %274 : vector<8x8xf32> to vector<1x8x8xf32>
    %283 = vector.shape_cast %275 : vector<8x8xf32> to vector<1x8x8xf32>
    %284 = vector.shape_cast %276 : vector<8x8xf32> to vector<1x8x8xf32>
    %285 = vector.shape_cast %277 : vector<8x8xf32> to vector<1x8x8xf32>
    %286 = vector.shape_cast %278 : vector<8x8xf32> to vector<1x8x8xf32>
    %287 = vector.shape_cast %279 : vector<8x8xf32> to vector<1x8x8xf32>
    %288 = vector.shape_cast %280 : vector<8x8xf32> to vector<1x8x8xf32>
    %289 = vector.shape_cast %281 : vector<8x8xf32> to vector<1x8x8xf32>
    %290 = tpu.concatenate %282, %283, %284, %285, %286, %287, %288, %289 in 0 : vector<1x8x8xf32>, vector<1x8x8xf32>, vector<1x8x8xf32>, vector<1x8x8xf32>, vector<1x8x8xf32>, vector<1x8x8xf32>, vector<1x8x8xf32>, vector<1x8x8xf32> -> vector<8x8x8xf32>
    %291 = arith.truncf %290 : vector<8x8x8xf32> to vector<8x8x8xbf16>
    %292 = vector.extract_strided_slice %272 {offsets = [0, 0], sizes = [8, 8], strides = [1, 1]} : vector<16x32xf32> to vector<8x8xf32>
    %293 = vector.extract_strided_slice %272 {offsets = [0, 8], sizes = [8, 8], strides = [1, 1]} : vector<16x32xf32> to vector<8x8xf32>
    %294 = vector.extract_strided_slice %272 {offsets = [0, 16], sizes = [8, 8], strides = [1, 1]} : vector<16x32xf32> to vector<8x8xf32>
    %295 = vector.extract_strided_slice %272 {offsets = [0, 24], sizes = [8, 8], strides = [1, 1]} : vector<16x32xf32> to vector<8x8xf32>
    %296 = vector.extract_strided_slice %272 {offsets = [8, 0], sizes = [8, 8], strides = [1, 1]} : vector<16x32xf32> to vector<8x8xf32>
    %297 = vector.extract_strided_slice %272 {offsets = [8, 8], sizes = [8, 8], strides = [1, 1]} : vector<16x32xf32> to vector<8x8xf32>
    %298 = vector.extract_strided_slice %272 {offsets = [8, 16], sizes = [8, 8], strides = [1, 1]} : vector<16x32xf32> to vector<8x8xf32>
    %299 = vector.extract_strided_slice %272 {offsets = [8, 24], sizes = [8, 8], strides = [1, 1]} : vector<16x32xf32> to vector<8x8xf32>
    %300 = vector.shape_cast %292 : vector<8x8xf32> to vector<1x8x8xf32>
    %301 = vector.shape_cast %293 : vector<8x8xf32> to vector<1x8x8xf32>
    %302 = vector.shape_cast %294 : vector<8x8xf32> to vector<1x8x8xf32>
    %303 = vector.shape_cast %295 : vector<8x8xf32> to vector<1x8x8xf32>
    %304 = vector.shape_cast %296 : vector<8x8xf32> to vector<1x8x8xf32>
    %305 = vector.shape_cast %297 : vector<8x8xf32> to vector<1x8x8xf32>
    %306 = vector.shape_cast %298 : vector<8x8xf32> to vector<1x8x8xf32>
    %307 = vector.shape_cast %299 : vector<8x8xf32> to vector<1x8x8xf32>
    %308 = tpu.concatenate %300, %301, %302, %303, %304, %305, %306, %307 in 0 : vector<1x8x8xf32>, vector<1x8x8xf32>, vector<1x8x8xf32>, vector<1x8x8xf32>, vector<1x8x8xf32>, vector<1x8x8xf32>, vector<1x8x8xf32>, vector<1x8x8xf32> -> vector<8x8x8xf32>
    %309 = arith.truncf %308 : vector<8x8x8xf32> to vector<8x8x8xbf16>
    %310 = vector.extract_strided_slice %273 {offsets = [0, 0], sizes = [8, 8], strides = [1, 1]} : vector<16x32xf32> to vector<8x8xf32>
    %311 = vector.extract_strided_slice %273 {offsets = [0, 8], sizes = [8, 8], strides = [1, 1]} : vector<16x32xf32> to vector<8x8xf32>
    %312 = vector.extract_strided_slice %273 {offsets = [0, 16], sizes = [8, 8], strides = [1, 1]} : vector<16x32xf32> to vector<8x8xf32>
    %313 = vector.extract_strided_slice %273 {offsets = [0, 24], sizes = [8, 8], strides = [1, 1]} : vector<16x32xf32> to vector<8x8xf32>
    %314 = vector.extract_strided_slice %273 {offsets = [8, 0], sizes = [8, 8], strides = [1, 1]} : vector<16x32xf32> to vector<8x8xf32>
    %315 = vector.extract_strided_slice %273 {offsets = [8, 8], sizes = [8, 8], strides = [1, 1]} : vector<16x32xf32> to vector<8x8xf32>
    %316 = vector.extract_strided_slice %273 {offsets = [8, 16], sizes = [8, 8], strides = [1, 1]} : vector<16x32xf32> to vector<8x8xf32>
    %317 = vector.extract_strided_slice %273 {offsets = [8, 24], sizes = [8, 8], strides = [1, 1]} : vector<16x32xf32> to vector<8x8xf32>
    %318 = vector.shape_cast %310 : vector<8x8xf32> to vector<1x8x8xf32>
    %319 = vector.shape_cast %311 : vector<8x8xf32> to vector<1x8x8xf32>
    %320 = vector.shape_cast %312 : vector<8x8xf32> to vector<1x8x8xf32>
    %321 = vector.shape_cast %313 : vector<8x8xf32> to vector<1x8x8xf32>
    %322 = vector.shape_cast %314 : vector<8x8xf32> to vector<1x8x8xf32>
    %323 = vector.shape_cast %315 : vector<8x8xf32> to vector<1x8x8xf32>
    %324 = vector.shape_cast %316 : vector<8x8xf32> to vector<1x8x8xf32>
    %325 = vector.shape_cast %317 : vector<8x8xf32> to vector<1x8x8xf32>
    %326 = tpu.concatenate %318, %319, %320, %321, %322, %323, %324, %325 in 0 : vector<1x8x8xf32>, vector<1x8x8xf32>, vector<1x8x8xf32>, vector<1x8x8xf32>, vector<1x8x8xf32>, vector<1x8x8xf32>, vector<1x8x8xf32>, vector<1x8x8xf32> -> vector<8x8x8xf32>
    %327 = arith.truncf %326 : vector<8x8x8xf32> to vector<8x8x8xbf16>
    "tpu.trace_start"() <{level = 10 : i32, message = "bqd,bkd->bqk"}> : () -> ()
    %cst_69 = arith.constant dense<0.000000e+00> : vector<8x8x8xf32>
    %328 = tpu.matmul %291, %309, %cst_69 {dimension_numbers = #tpu.dot_dimension_numbers<[2], [2], [1], [1], [0, 0, 0, 1, 1, 1], [0], [0]>} : vector<8x8x8xbf16>, vector<8x8x8xbf16>, vector<8x8x8xf32> -> vector<8x8x8xf32>
    %cst_70 = arith.constant -1.000000e+09 : f32
    "tpu.trace_stop"() : () -> ()
    %329 = vector.shape_cast %90 : vector<1x8x8xi1> to vector<1x8x8xi1>
    %330 = vector.broadcast %329 : vector<1x8x8xi1> to vector<8x8x8xi1>
    %331 = vector.broadcast %cst_70 : f32 to vector<8x8x8xf32>
    %332 = arith.select %330, %328, %331 : vector<8x8x8xi1>, vector<8x8x8xf32>
    %cst_71 = arith.constant dense<0xFF800000> : vector<8x8xf32>
    %333 = vector.multi_reduction <maximumf>, %332, %cst_71 [2] : vector<8x8x8xf32> to vector<8x8xf32>
    %334 = vector.shape_cast %333 : vector<8x8xf32> to vector<8x8x1xf32>
    %335 = vector.broadcast %334 : vector<8x8x1xf32> to vector<8x8x8xf32>
    %336 = arith.subf %332, %335 : vector<8x8x8xf32>
    %337 = math.exp %336 : vector<8x8x8xf32>
    %cst_72 = arith.constant dense<0.000000e+00> : vector<8x8xf32>
    %338 = vector.multi_reduction <add>, %337, %cst_72 [2] : vector<8x8x8xf32> to vector<8x8xf32>
    %339 = vector.shape_cast %338 : vector<8x8xf32> to vector<8x8x1xf32>
    %340 = tpu.reciprocal %339 : vector<8x8x1xf32> -> vector<8x8x1xf32>
    %341 = vector.broadcast %340 : vector<8x8x1xf32> to vector<8x8x8xf32>
    %342 = arith.mulf %337, %341 : vector<8x8x8xf32>
    %c8 = arith.constant 8 : index
    %c0_73 = arith.constant 0 : index
    %c0_74 = arith.constant 0 : index
    %343 = vector.load %arg5[%c8, %c0_73, %c0_74] : memref<16x8x8xf32, #tpu.memory_space<vmem>>, vector<8x8x8xf32>
    tpu.vector_store %arg5[%c8, %c0_73, %c0_74], %342 {strides = array<i32>} : memref<16x8x8xf32, #tpu.memory_space<vmem>>, vector<8x8x8xf32>,
    %344 = arith.truncf %342 : vector<8x8x8xf32> to vector<8x8x8xbf16>
    "tpu.trace_start"() <{level = 10 : i32, message = "bqk,bkd->bqd"}> : () -> ()
    %cst_75 = arith.constant dense<0.000000e+00> : vector<8x8x8xf32>
    %345 = tpu.matmul %344, %327, %cst_75 {dimension_numbers = #tpu.dot_dimension_numbers<[2], [1], [1], [2], [0, 0, 0, 1, 1, 2], [0], [0]>} : vector<8x8x8xbf16>, vector<8x8x8xbf16>, vector<8x8x8xf32> -> vector<8x8x8xf32>
    "tpu.trace_stop"() : () -> ()
    %346 = vector.extract_strided_slice %345 {offsets = [0, 0, 0], sizes = [1, 8, 8], strides = [1, 1, 1]} : vector<8x8x8xf32> to vector<1x8x8xf32>
    %347 = vector.shape_cast %346 : vector<1x8x8xf32> to vector<8x8xf32>
    %348 = vector.extract_strided_slice %345 {offsets = [1, 0, 0], sizes = [1, 8, 8], strides = [1, 1, 1]} : vector<8x8x8xf32> to vector<1x8x8xf32>
    %349 = vector.shape_cast %348 : vector<1x8x8xf32> to vector<8x8xf32>
    %350 = vector.extract_strided_slice %345 {offsets = [2, 0, 0], sizes = [1, 8, 8], strides = [1, 1, 1]} : vector<8x8x8xf32> to vector<1x8x8xf32>
    %351 = vector.shape_cast %350 : vector<1x8x8xf32> to vector<8x8xf32>
    %352 = vector.extract_strided_slice %345 {offsets = [3, 0, 0], sizes = [1, 8, 8], strides = [1, 1, 1]} : vector<8x8x8xf32> to vector<1x8x8xf32>
    %353 = vector.shape_cast %352 : vector<1x8x8xf32> to vector<8x8xf32>
    %354 = tpu.concatenate %347, %349, %351, %353 in 1 : vector<8x8xf32>, vector<8x8xf32>, vector<8x8xf32>, vector<8x8xf32> -> vector<8x32xf32>
    %355 = vector.extract_strided_slice %345 {offsets = [4, 0, 0], sizes = [1, 8, 8], strides = [1, 1, 1]} : vector<8x8x8xf32> to vector<1x8x8xf32>
    %356 = vector.shape_cast %355 : vector<1x8x8xf32> to vector<8x8xf32>
    %357 = vector.extract_strided_slice %345 {offsets = [5, 0, 0], sizes = [1, 8, 8], strides = [1, 1, 1]} : vector<8x8x8xf32> to vector<1x8x8xf32>
    %358 = vector.shape_cast %357 : vector<1x8x8xf32> to vector<8x8xf32>
    %359 = vector.extract_strided_slice %345 {offsets = [6, 0, 0], sizes = [1, 8, 8], strides = [1, 1, 1]} : vector<8x8x8xf32> to vector<1x8x8xf32>
    %360 = vector.shape_cast %359 : vector<1x8x8xf32> to vector<8x8xf32>
    %361 = vector.extract_strided_slice %345 {offsets = [7, 0, 0], sizes = [1, 8, 8], strides = [1, 1, 1]} : vector<8x8x8xf32> to vector<1x8x8xf32>
    %362 = vector.shape_cast %361 : vector<1x8x8xf32> to vector<8x8xf32>
    %363 = tpu.concatenate %356, %358, %360, %362 in 1 : vector<8x8xf32>, vector<8x8xf32>, vector<8x8xf32>, vector<8x8xf32> -> vector<8x32xf32>
    %364 = tpu.concatenate %354, %363 in 0 : vector<8x32xf32>, vector<8x32xf32> -> vector<16x32xf32>
    %c192 = arith.constant 192 : index
    %c0_76 = arith.constant 0 : index
    %365 = vector.load %arg2[%c192, %c0_76] : memref<352x128xbf16, #tpu.memory_space<vmem>>, vector<32x32xbf16>
    %366 = arith.truncf %364 : vector<16x32xf32> to vector<16x32xbf16>
    %cst_77 = arith.constant dense<0.000000e+00> : vector<16x32xf32>
    %367 = tpu.matmul %366, %365, %cst_77 {dimension_numbers = #tpu.dot_dimension_numbers<[1], [0], [0], [1], [0, 0, 1, 1], [], []>} : vector<16x32xbf16>, vector<32x32xbf16>, vector<16x32xf32> -> vector<16x32xf32>
    %c89 = arith.constant 89 : index
    %c0_78 = arith.constant 0 : index
    %368 = vector.load %arg3[%c89, %c0_78] : memref<104x128xf32, #tpu.memory_space<vmem>>, vector<1x32xf32>
    %369 = vector.broadcast %368 : vector<1x32xf32> to vector<16x32xf32>
    %370 = arith.addf %367, %369 : vector<16x32xf32>
    %371 = arith.addf %262, %370 : vector<16x32xf32>
    %c90 = arith.constant 90 : index
    %c0_79 = arith.constant 0 : index
    %372 = vector.load %arg3[%c90, %c0_79] : memref<104x128xf32, #tpu.memory_space<vmem>>, vector<1x32xf32>
    %c91 = arith.constant 91 : index
    %c0_80 = arith.constant 0 : index
    %373 = vector.load %arg3[%c91, %c0_80] : memref<104x128xf32, #tpu.memory_space<vmem>>, vector<1x32xf32>
    %cst_81 = arith.constant dense<0.000000e+00> : vector<16xf32>
    %374 = vector.multi_reduction <add>, %371, %cst_81 [1] : vector<16x32xf32> to vector<16xf32>
    %375 = vector.shape_cast %374 : vector<16xf32> to vector<16x1xf32>
    %cst_82 = arith.constant 3.200000e+01 : f32
    %376 = vector.broadcast %cst_82 : f32 to vector<16x1xf32>
    %377 = arith.divf %375, %376 : vector<16x1xf32>
    %378 = vector.broadcast %377 : vector<16x1xf32> to vector<16x32xf32>
    %379 = arith.subf %371, %378 : vector<16x32xf32>
    %380 = arith.mulf %379, %379 : vector<16x32xf32>
    %cst_83 = arith.constant dense<0.000000e+00> : vector<16xf32>
    %381 = vector.multi_reduction <add>, %380, %cst_83 [1] : vector<16x32xf32> to vector<16xf32>
    %382 = vector.shape_cast %381 : vector<16xf32> to vector<16x1xf32>
    %cst_84 = arith.constant 3.200000e+01 : f32
    %383 = vector.broadcast %cst_84 : f32 to vector<16x1xf32>
    %384 = arith.divf %382, %383 : vector<16x1xf32>
    %385 = vector.broadcast %377 : vector<16x1xf32> to vector<16x32xf32>
    %386 = arith.subf %371, %385 : vector<16x32xf32>
    %cst_85 = arith.constant 9.99999974E-6 : f32
    %387 = vector.broadcast %cst_85 : f32 to vector<16x1xf32>
    %388 = arith.addf %384, %387 : vector<16x1xf32>
    %389 = math.rsqrt %388 : vector<16x1xf32>
    %390 = vector.broadcast %389 : vector<16x1xf32> to vector<16x32xf32>
    %391 = arith.mulf %386, %390 : vector<16x32xf32>
    %392 = vector.broadcast %372 : vector<1x32xf32> to vector<16x32xf32>
    %393 = arith.mulf %391, %392 : vector<16x32xf32>
    %394 = vector.broadcast %373 : vector<1x32xf32> to vector<16x32xf32>
    %395 = arith.addf %393, %394 : vector<16x32xf32>
    %c224 = arith.constant 224 : index
    %c0_86 = arith.constant 0 : index
    %396 = vector.load %arg2[%c224, %c0_86] : memref<352x128xbf16, #tpu.memory_space<vmem>>, vector<32x64xbf16>
    %c256 = arith.constant 256 : index
    %c0_87 = arith.constant 0 : index
    %397 = vector.load %arg2[%c256, %c0_87] : memref<352x128xbf16, #tpu.memory_space<vmem>>, vector<64x32xbf16>
    %398 = arith.truncf %395 : vector<16x32xf32> to vector<16x32xbf16>
    %cst_88 = arith.constant dense<0.000000e+00> : vector<16x64xf32>
    %399 = tpu.matmul %398, %396, %cst_88 {dimension_numbers = #tpu.dot_dimension_numbers<[1], [0], [0], [1], [0, 0, 1, 1], [], []>} : vector<16x32xbf16>, vector<32x64xbf16>, vector<16x64xf32> -> vector<16x64xf32>
    %c92 = arith.constant 92 : index
    %c0_89 = arith.constant 0 : index
    %400 = vector.load %arg3[%c92, %c0_89] : memref<104x128xf32, #tpu.memory_space<vmem>>, vector<1x64xf32>
    %401 = vector.broadcast %400 : vector<1x64xf32> to vector<16x64xf32>
    %402 = arith.addf %399, %401 : vector<16x64xf32>
    %cst_90 = arith.constant 0.000000e+00 : f32
    %403 = vector.broadcast %cst_90 : f32 to vector<16x64xf32>
    %404 = arith.maximumf %402, %403 : vector<16x64xf32>
    %405 = arith.truncf %404 : vector<16x64xf32> to vector<16x64xbf16>
    %cst_91 = arith.constant dense<0.000000e+00> : vector<16x32xf32>
    %406 = tpu.matmul %405, %397, %cst_91 {dimension_numbers = #tpu.dot_dimension_numbers<[1], [0], [0], [1], [0, 0, 1, 1], [], []>} : vector<16x64xbf16>, vector<64x32xbf16>, vector<16x32xf32> -> vector<16x32xf32>
    %c93 = arith.constant 93 : index
    %c0_92 = arith.constant 0 : index
    %407 = vector.load %arg3[%c93, %c0_92] : memref<104x128xf32, #tpu.memory_space<vmem>>, vector<1x32xf32>
    %408 = vector.broadcast %407 : vector<1x32xf32> to vector<16x32xf32>
    %409 = arith.addf %406, %408 : vector<16x32xf32>
    %410 = arith.addf %395, %409 : vector<16x32xf32>
    %c94 = arith.constant 94 : index
    %c0_93 = arith.constant 0 : index
    %411 = vector.load %arg3[%c94, %c0_93] : memref<104x128xf32, #tpu.memory_space<vmem>>, vector<1x32xf32>
    %c95 = arith.constant 95 : index
    %c0_94 = arith.constant 0 : index
    %412 = vector.load %arg3[%c95, %c0_94] : memref<104x128xf32, #tpu.memory_space<vmem>>, vector<1x32xf32>
    %cst_95 = arith.constant dense<0.000000e+00> : vector<16xf32>
    %413 = vector.multi_reduction <add>, %410, %cst_95 [1] : vector<16x32xf32> to vector<16xf32>
    %414 = vector.shape_cast %413 : vector<16xf32> to vector<16x1xf32>
    %cst_96 = arith.constant 3.200000e+01 : f32
    %415 = vector.broadcast %cst_96 : f32 to vector<16x1xf32>
    %416 = arith.divf %414, %415 : vector<16x1xf32>
    %417 = vector.broadcast %416 : vector<16x1xf32> to vector<16x32xf32>
    %418 = arith.subf %410, %417 : vector<16x32xf32>
    %419 = arith.mulf %418, %418 : vector<16x32xf32>
    %cst_97 = arith.constant dense<0.000000e+00> : vector<16xf32>
    %420 = vector.multi_reduction <add>, %419, %cst_97 [1] : vector<16x32xf32> to vector<16xf32>
    %421 = vector.shape_cast %420 : vector<16xf32> to vector<16x1xf32>
    %cst_98 = arith.constant 3.200000e+01 : f32
    %422 = vector.broadcast %cst_98 : f32 to vector<16x1xf32>
    %423 = arith.divf %421, %422 : vector<16x1xf32>
    %424 = vector.broadcast %416 : vector<16x1xf32> to vector<16x32xf32>
    %425 = arith.subf %410, %424 : vector<16x32xf32>
    %cst_99 = arith.constant 9.99999974E-6 : f32
    %426 = vector.broadcast %cst_99 : f32 to vector<16x1xf32>
    %427 = arith.addf %423, %426 : vector<16x1xf32>
    %428 = math.rsqrt %427 : vector<16x1xf32>
    %429 = vector.broadcast %428 : vector<16x1xf32> to vector<16x32xf32>
    %430 = arith.mulf %425, %429 : vector<16x32xf32>
    %431 = vector.broadcast %411 : vector<1x32xf32> to vector<16x32xf32>
    %432 = arith.mulf %430, %431 : vector<16x32xf32>
    %433 = vector.broadcast %412 : vector<1x32xf32> to vector<16x32xf32>
    %434 = arith.addf %432, %433 : vector<16x32xf32>
    %c96_100 = arith.constant 96 : index
    %c0_101 = arith.constant 0 : index
    %435 = vector.load %arg3[%c96_100, %c0_101] : memref<104x128xf32, #tpu.memory_space<vmem>>, vector<1x32xf32>
    %c97 = arith.constant 97 : index
    %c0_102 = arith.constant 0 : index
    %436 = vector.load %arg3[%c97, %c0_102] : memref<104x128xf32, #tpu.memory_space<vmem>>, vector<1x32xf32>
    %cst_103 = arith.constant dense<0.000000e+00> : vector<16xf32>
    %437 = vector.multi_reduction <add>, %434, %cst_103 [1] : vector<16x32xf32> to vector<16xf32>
    %438 = vector.shape_cast %437 : vector<16xf32> to vector<16x1xf32>
    %cst_104 = arith.constant 3.200000e+01 : f32
    %439 = vector.broadcast %cst_104 : f32 to vector<16x1xf32>
    %440 = arith.divf %438, %439 : vector<16x1xf32>
    %441 = vector.broadcast %440 : vector<16x1xf32> to vector<16x32xf32>
    %442 = arith.subf %434, %441 : vector<16x32xf32>
    %443 = arith.mulf %442, %442 : vector<16x32xf32>
    %cst_105 = arith.constant dense<0.000000e+00> : vector<16xf32>
    %444 = vector.multi_reduction <add>, %443, %cst_105 [1] : vector<16x32xf32> to vector<16xf32>
    %445 = vector.shape_cast %444 : vector<16xf32> to vector<16x1xf32>
    %cst_106 = arith.constant 3.200000e+01 : f32
    %446 = vector.broadcast %cst_106 : f32 to vector<16x1xf32>
    %447 = arith.divf %445, %446 : vector<16x1xf32>
    %448 = vector.broadcast %440 : vector<16x1xf32> to vector<16x32xf32>
    %449 = arith.subf %434, %448 : vector<16x32xf32>
    %cst_107 = arith.constant 9.99999974E-6 : f32
    %450 = vector.broadcast %cst_107 : f32 to vector<16x1xf32>
    %451 = arith.addf %447, %450 : vector<16x1xf32>
    %452 = math.rsqrt %451 : vector<16x1xf32>
    %453 = vector.broadcast %452 : vector<16x1xf32> to vector<16x32xf32>
    %454 = arith.mulf %449, %453 : vector<16x32xf32>
    %455 = vector.broadcast %435 : vector<1x32xf32> to vector<16x32xf32>
    %456 = arith.mulf %454, %455 : vector<16x32xf32>
    %457 = vector.broadcast %436 : vector<1x32xf32> to vector<16x32xf32>
    %458 = arith.addf %456, %457 : vector<16x32xf32>
    %c320 = arith.constant 320 : index
    %c0_108 = arith.constant 0 : index
    %459 = vector.load %arg2[%c320, %c0_108] : memref<352x128xbf16, #tpu.memory_space<vmem>>, vector<32x128xbf16>
    %460 = arith.truncf %458 : vector<16x32xf32> to vector<16x32xbf16>
    %cst_109 = arith.constant dense<0.000000e+00> : vector<16x128xf32>
    %461 = tpu.matmul %460, %459, %cst_109 {dimension_numbers = #tpu.dot_dimension_numbers<[1], [0], [0], [1], [0, 0, 1, 1], [], []>} : vector<16x32xbf16>, vector<32x128xbf16>, vector<16x128xf32> -> vector<16x128xf32>
    %c0_110 = arith.constant 0 : index
    %c0_111 = arith.constant 0 : index
    %462 = vector.load %arg4[%c0_110, %c0_111] : memref<16x128xf32, #tpu.memory_space<vmem>>, vector<16x128xf32>
    tpu.vector_store %arg4[%c0_110, %c0_111], %461 {strides = array<i32>} : memref<16x128xf32, #tpu.memory_space<vmem>>, vector<16x128xf32>,
    return
  }
  func.func @transform_0(%arg0: i32, %arg1: memref<2x8xi32, #tpu.memory_space<smem>>) -> (i32, i32) {
    %c0_i32 = arith.constant 0 : i32
    %c0_i32_0 = arith.constant 0 : i32
    %c0_i32_1 = arith.constant 0 : i32
    return %c0_i32, %c0_i32_0 : i32, i32
  }
  func.func @transform_1(%arg0: i32, %arg1: memref<2x8xi32, #tpu.memory_space<smem>>) -> (i32, i32) {
    %c0_i32 = arith.constant 0 : i32
    %c0_i32_0 = arith.constant 0 : i32
    %c0_i32_1 = arith.constant 0 : i32
    return %c0_i32, %c0_i32_0 : i32, i32
  }
  func.func @transform_2(%arg0: i32, %arg1: memref<2x8xi32, #tpu.memory_space<smem>>) -> (i32, i32) {
    %c0_i32 = arith.constant 0 : i32
    %c0_i32_0 = arith.constant 0 : i32
    %c0_i32_1 = arith.constant 0 : i32
    return %c0_i32, %c0_i32_0 : i32, i32
  }
  func.func @transform_3(%arg0: i32, %arg1: memref<2x8xi32, #tpu.memory_space<smem>>) -> (i32, i32, i32) {
    %c0_i32 = arith.constant 0 : i32
    %c0_i32_0 = arith.constant 0 : i32
    %c0_i32_1 = arith.constant 0 : i32
    %c0_i32_2 = arith.constant 0 : i32
    return %c0_i32, %c0_i32_0, %c0_i32_1 : i32, i32, i32
  }
}

</mosaic_0001>

<bundles_post_ra>
// kernel: _forward.1
= control target key start
LH: loop header
LB: loop body
LE: loop exit
PB: predicated region body
PF: predicated region fallthrough
CT: control target
= control target key end

     0   :  { %s2629_s18 = smov [#allocation3]   ;;  %s3303_s0 = inlined_call_operand.hbm [shape: s32[2,8], index: 0, kind: input, shape index: {}]   ;;  %s3304_s1 = inlined_call_operand.hbm [shape: bf16[352,128], index: 1, kind: input, shape index: {}]   ;;  %s3305_s2 = inlined_call_operand.hbm [shape: f32[104,128], index: 2, kind: input, shape index: {}]   ;;  %s3306_s3 = inlined_call_operand.hbm [shape: f32[16,128], index: 3, kind: output, shape index: {0}]   ;;  %s3307_s4 = inlined_call_operand.vmem [shape: f32[16,8,8], index: 4, kind: output, shape index: {1}]  }
   0x1   :  { %s11_s17 = sshll.u32 %s3303_s0, 4  ;;  %s12_s17 = int_to_ptr.hbm [resolvable:$true] %s11_s17 }
   0x2   :  { %14 = dma.hbm_to_smem %s12_s17, 32, %s2629_s18, [#allocation2] }
   0x3   :  { %2621 = dma.done.wait [#allocation2], 32 }
   0x4   :  { %2622 = vsyncadd [#allocation2], 4294967264 }
   0x5   :  { %17 = sfence }
   0x6   :  { %18 = vsyncpa [#allocation5], 0 }
   0x7   :  { %19 = vsyncpa [#allocation8], 0 }
   0x8   :  { %20 = vsyncpa [#allocation6], 0  ;;  %s25_s21 = sshll.u32 %s3304_s1, 4  ;;  %s2630_s22 = smov [#allocation4]   ;;  %s26_s21 = int_to_ptr.hbm [resolvable:$true] %s25_s21 }
   0x9   :  { %s27_s23 = sshll.u32 %s2630_s22, 4  ;;  %s38_s0 = sshll.u32 %s3305_s2, 4  ;;  %s28_s23 = int_to_ptr.vmem [resolvable:$true] %s27_s23  ;;  %s39_s0 = int_to_ptr.hbm [resolvable:$true] %s38_s0 }
   0xa   :  { %s2631_s26 = smov 64   ;;  %s2632_s27 = smov 4  }
   0xb   :  { %33 = dma.hbm_to_vmem [thread:$0]  %s26_s21, 2816, %s28_s23, [#allocation5], %s2631_s26, %s2631_s26, %s2632_s27  }
   0xc   :  { %s2633_s28 = smov [#allocation7]   ;;  %s2634_s30 = smov 128  }
   0xd   :  { %s40_s29 = sshll.u32 %s2633_s28, 4  ;;  %s2635_s5 = smov 8   ;;  %s41_s29 = int_to_ptr.vmem [resolvable:$true] %s40_s29 }
   0xe   :  { %46 = dma.hbm_to_vmem [thread:$0]  %s39_s0, 1664, %s41_s29, [#allocation8], %s2634_s30, %s2634_s30, %s2635_s5  }
   0xf   :  { %2623 = dma.done.wait [#allocation5], 2816  }
  0x10   :  { %2624 = vsyncadd [#allocation5], 4294964480 }
  0x11   :  { %2625 = dma.done.wait [#allocation8], 1664  }
  0x12   :  { %2626 = vsyncadd [#allocation8], 4294965632  ;;  %v64_v0 = vlaneseq  ;;  %s66_s1 = sld [smem:[#allocation3]]  ;;  %vm146_vm0 = vcmask 1040384   ;;  %v63_v2 = vld [vmem:[#allocation7 + $0x38] sm:$0xff]  ;;  %v62_v3 = vld [vmem:[#allocation7 + $0x30] sm:$0xff] }
  0x13   :  { %s2196_s2 = sld [smem:[#allocation3 + $0x1]]  ;;  %vm148_vm1 = vcmask 1041408   ;;  %vm150_vm2 = vcmask 1042432   ;;  %183 = vmatpush.msra.mxu0 %v63_v2  ;;  %vm152_vm4 = vcmask 1043456   ;;  %vm154_vm5 = vcmask 1044480   ;;  %v61_v6 = vld [vmem:[#allocation7 + $0x28] sm:$0xff] }
  0x14   :  { %s2198_s6 = sld [smem:[#allocation3 + $0x2]]  ;;  %v2685_v1 = vand.u32 127, %v64_v0  ;;  %v2636_v7 = vmov 0.0   ;;  %vm156_vm7 = vcmask 1045504   ;;  %vm158_vm9 = vcmask 1046528   ;;  %v60_v12 = vld [vmem:[#allocation7 + $0x20] sm:$0xff] }
  0x15   :  { %s2687_s7 = sld [smem:[#allocation3 + $0x3]]  ;;  %184 = vmatpush.msra.mxu0 %v62_v3  ;;  %vm168_vm12 = vcmask 523264   ;;  %v59_v19 = vld [vmem:[#allocation7 + $0x18] sm:$0xff]  ;;  %v58_v26 = vld [vmem:[#allocation7 + $0x10] sm:$0xff]  ;;  %v57_v33 = vld [vmem:[#allocation7 + $0x8] sm:$0xff]  ;;  %s2637_s20 = smov 112  }
  0x16   :  { %s2689_s8 = sld [smem:[#allocation3 + $0x4]]  ;;  %v56_v39 = vld [vmem:[#allocation7] sm:$0xff]  ;;  %v2366_v57 = vld [vmem:[#allocation4 + $0x8] sm:$0xff]  ;;  %v2365_v58 = vld [vmem:[#allocation4] sm:$0xff]  ;;  %s2638_s21 = smov 104  }
  0x17   :  { %s2691_s9 = sld [smem:[#allocation3 + $0x5]]  ;;  %185 = vmatpush.msra.mxu0 %v61_v6  ;;  %230 = vmatpush.bf16.msra.mxu1 %v2366_v57  ;;  %v167_v60 = vld [vmem:[#allocation7 + $0x40] sm:$0xff]  ;;  %v2433_v3 = vld [vmem:[#allocation7 + $0x50] ss:$0 sm:$0xff]  ;;  %s2639_s22 = smov 120  }
  0x18   :  { %v67_v4 = vstv %s66_s1  ;;  %s2693_s10 = sld [smem:[#allocation3 + $0x6]]  ;;  %s2640_s23 = smov 96  }
  0x19   :  { %vm68_vm3 = vcmp.eq.s32.totalorder %v2685_v1, %v67_v4  ;;  %v72_v5 = vstv %s2196_s2  ;;  %s2696_s11 = sld [smem:[#allocation3 + $0x7]]  ;;  %186 = vmatpush.msra.mxu0 %v60_v12 }
  0x1a   :  { %v2195_v8 = vsel %vm68_vm3, 1.0, %v2636_v7  ;;  %vm73_vm6 = vcmp.eq.s32.totalorder %v2685_v1, %v72_v5  ;;  %v77_v9 = vstv %s2198_s6  ;;  %s2700_s12 = sld [smem:[#allocation3 + $0x80]] }
  0x1b   :  { %v2197_v10 = vsel %vm73_vm6, 1.0, %v2636_v7  ;;  %vm78_vm8 = vcmp.eq.s32.totalorder %v2685_v1, %v77_v9  ;;  %v82_v11 = vstv %s2687_s7  ;;  %s2705_s13 = sld [smem:[#allocation3 + $0x81]]  ;;  %187 = vmatpush.msra.mxu0 %v59_v19  ;;  %231 = vmatpush.bf16.msra.mxu1 %v2365_v58 }
  0x1c   :  { %v2199_v13 = vsel %vm78_vm8, 1.0, %v2636_v7  ;;  %vm83_vm10 = vcmp.eq.s32.totalorder %v2685_v1, %v82_v11  ;;  %v87_v14 = vstv %s2689_s8  ;;  %v147_v15 = vsel %vm146_vm0, %v2195_v8, %v2197_v10  ;;  %s2711_s14 = sld [smem:[#allocation3 + $0x82]]  ;;  %s2177_s8 = sshll.u32 %s3306_s3, 4  ;;  %s2178_s8 = int_to_ptr.hbm [resolvable:$true] %s2177_s8 }
  0x1d   :  { %v2201_v16 = vsel %vm83_vm10, 1.0, %v2636_v7  ;;  %vm88_vm11 = vcmp.eq.s32.totalorder %v2685_v1, %v87_v14  ;;  %v92_v17 = vstv %s2691_s9  ;;  %v149_v18 = vsel %vm148_vm1, %v147_v15, %v2199_v13  ;;  %s2717_s15 = sld [smem:[#allocation3 + $0x83]]  ;;  %188 = vmatpush.msra.mxu0 %v58_v26 }
  0x1e   :  { %v2203_v20 = vsel %vm88_vm11, 1.0, %v2636_v7  ;;  %vm93_vm13 = vcmp.eq.s32.totalorder %v2685_v1, %v92_v17  ;;  %v97_v21 = vstv %s2693_s10  ;;  %v151_v22 = vsel %vm150_vm2, %v149_v18, %v2201_v16  ;;  %s2723_s16 = sld [smem:[#allocation3 + $0x84]] }
  0x1f   :  { %v2205_v23 = vsel %vm93_vm13, 1.0, %v2636_v7  ;;  %vm98_vm14 = vcmp.eq.s32.totalorder %v2685_v1, %v97_v21  ;;  %v102_v24 = vstv %s2696_s11  ;;  %v153_v25 = vsel %vm152_vm4, %v151_v22, %v2203_v20  ;;  %s2729_s17 = sld [smem:[#allocation3 + $0x85]]  ;;  %189 = vmatpush.msra.mxu0 %v57_v33 }
  0x20   :  { %v2207_v27 = vsel %vm98_vm14, 1.0, %v2636_v7  ;;  %vm103_vm15 = vcmp.eq.s32.totalorder %v2685_v1, %v102_v24  ;;  %v155_v28 = vsel %vm154_vm5, %v153_v25, %v2205_v23  ;;  %v107_v29 = vstv %s2700_s12  ;;  %s2735_s18 = sld [smem:[#allocation3 + $0x86]] }
  0x21   :  { %v2209_v30 = vsel %vm103_vm15, 1.0, %v2636_v7  ;;  %v157_v31 = vsel %vm156_vm7, %v155_v28, %v2207_v27  ;;  %vm108_vm3 = vcmp.eq.s32.totalorder %v2685_v1, %v107_v29  ;;  %v112_v32 = vstv %s2705_s13  ;;  %s2741_s19 = sld [smem:[#allocation3 + $0x87]]  ;;  %190 = vmatpush.msra.mxu0 %v56_v39 }
  0x22   :  { %v2211_v34 = vsel %vm108_vm3, 1.0, %v2636_v7  ;;  %vm113_vm6 = vcmp.eq.s32.totalorder %v2685_v1, %v112_v32  ;;  %v117_v35 = vstv %s2711_s14  ;;  %v159_v36 = vsel %vm158_vm9, %v157_v31, %v2209_v30  ;;  %s2641_s14 = smov 24  }
  0x23   :  { %v2213_v37 = vsel %vm113_vm6, 1.0, %v2636_v7  ;;  %vm118_vm8 = vcmp.eq.s32.totalorder %v2685_v1, %v117_v35  ;;  %v122_v38 = vstv %s2717_s15  ;;  %2226 = vmatmul.msk.f32.vlgmr.msra.gmra.mxu0 %vm168_vm12, %v159_v36  ;;  %s2642_s15 = smov 16  }
  0x24   :  { %v2215_v40 = vsel %vm118_vm8, 1.0, %v2636_v7  ;;  %vm123_vm10 = vcmp.eq.s32.totalorder %v2685_v1, %v122_v38  ;;  %v127_v41 = vstv %s2723_s16  ;;  %v160_v42 = vsel %vm146_vm0, %v2211_v34, %v2213_v37 }
  0x25   :  { %v2217_v43 = vsel %vm123_vm10, 1.0, %v2636_v7  ;;  %vm128_vm11 = vcmp.eq.s32.totalorder %v2685_v1, %v127_v41  ;;  %v132_v44 = vstv %s2729_s17  ;;  %v161_v45 = vsel %vm148_vm1, %v160_v42, %v2215_v40 }
  0x26   :  { %v2219_v46 = vsel %vm128_vm11, 1.0, %v2636_v7  ;;  %vm133_vm13 = vcmp.eq.s32.totalorder %v2685_v1, %v132_v44  ;;  %v137_v47 = vstv %s2735_s18  ;;  %v162_v48 = vsel %vm150_vm2, %v161_v45, %v2217_v43 }
  0x27   :  { %v2221_v49 = vsel %vm133_vm13, 1.0, %v2636_v7  ;;  %vm138_vm0 = vcmp.eq.s32.totalorder %v2685_v1, %v137_v47  ;;  %v142_v50 = vstv %s2741_s19  ;;  %v163_v51 = vsel %vm152_vm4, %v162_v48, %v2219_v46 }
  0x28   :  { %v2223_v52 = vsel %vm138_vm0, 1.0, %v2636_v7  ;;  %vm143_vm1 = vcmp.eq.s32.totalorder %v2685_v1, %v142_v50  ;;  %v164_v53 = vsel %vm154_vm5, %v163_v51, %v2221_v49  ;;  %vm220_vm2 = vcmask 261120  }
  0x29   :  { %v2225_v54 = vsel %vm143_vm1, 1.0, %v2636_v7  ;;  %v165_v55 = vsel %vm156_vm7, %v164_v53, %v2223_v52  ;;  %vm301_vm5 = vcmask 64512  }
  0x2a   :  { %v166_v56 = vsel %vm158_vm9, %v165_v55, %v2225_v54 }
  0x2b   :  { %2227 = vmatmul.msk.f32.gmra.mxu0 %vm168_vm12, %v166_v56 }
  0xa0   :  { %v192_v59 = vpop.f32.mrf.mxu0 }
  0xa1   :  { %v2774_v62 = vadd.f32 %v192_v59, %v167_v60 }
  0xa8   :  { %v195_v61 = vpop.f32.mrf.mxu0 }
  0xa9   :  { %v2776_v63 = vadd.f32 %v195_v61, %v167_v60 }
  0xab   :  { %v201_v2 = vpack.c.bf16 %v2776_v63, %v2774_v62 }
  0xad   :  { %2236 = vmatmul.msk.bf16.vlgmr.msra.gmra.mxu1 %vm220_vm2, %v201_v2 }
 0x12a   :  { %v233_v4 = vpop.f32.mrf.mxu1 }
 0x12b   :  { %v234_v5 = vadd.f32 %v2433_v3, %v233_v4 }
 0x12d   :  { %272 = vrot.lane.b32.xlu1 %v234_v5, %s2637_s20  ;;  %275 = vrot.lane.b32.xlu0 %v234_v5, %s2638_s21  ;;  %v288_v8 = vpack.c.bf16 %v234_v5, %v234_v5  ;;  %v238_v11 = vmul.f32 0.35355338, %v234_v5 }
 0x12f   :  { %v297_v9 = vunpack.c.l.b16 %v288_v8  ;;  %v260_v36 = vpack.c.bf16 %v238_v11, %v238_v11 }
 0x131   :  { %v2786_v10 = vpack.c.b16 %v297_v9, %v297_v9 }
 0x132   :  { %v235_v6 = vpop.f32.mrf.mxu1 }
 0x133   :  { %v236_v7 = vadd.f32 %v2433_v3, %v235_v6  ;;  %v199_v6 = vshrl.u32 %v64_v0, 7 }
 0x135   :  { %279 = vrot.lane.b32.xlu2 %v236_v7, %s2639_s22  ;;  %285 = vrot.lane.b32.xlu1 %v236_v7, %s2638_s21  ;;  %v239_v39 = vmul.f32 0.35355338, %v236_v7  ;;  %v292_v40 = vpack.c.bf16 %v236_v7, %v236_v7  ;;  %vm2841_vm7 = vcmp.ge.s32.totalorder %v199_v6, %v2685_v1 }
 0x136   :  { %269 = vrot.lane.b32.xlu0 %v234_v5, %s2639_s22 }
 0x137   :  { %v394_v41 = vunpack.c.l.b16 %v292_v40 }
 0x139   :  { %v2822_v42 = vpack.c.b16 %v394_v41, %v394_v41 }
 0x13d   :  { %282 = vrot.lane.b32.xlu2 %v236_v7, %s2637_s20 }
 0x13e   :  { %299 = vrot.lane.b32.xlu0 %v2786_v10, %s2640_s23 }
 0x146   :  { %247 = vrot.lane.b32.xlu0 %v238_v11, %s2638_s21 }
 0x18f   :  { %v280_v17 = vpop.permute.xlu2 %279 }
 0x190   :  { %v293_v24 = vpack.c.bf16 %v280_v17, %v280_v17 }
 0x192   :  { %v418_v28 = vunpack.c.l.b16 %v293_v24 }
 0x194   :  { %v2806_v33 = vpack.c.b16 %v418_v28, %v418_v28 }
 0x197   :  { %v283_v30 = vpop.permute.xlu2 %282 }
 0x198   :  { %v294_v34 = vpack.c.bf16 %v283_v30, %v283_v30 }
 0x19a   :  { %v442_v37 = vunpack.c.l.b16 %v294_v34 }
 0x19c   :  { %v2816_v38 = vpack.c.b16 %v442_v37, %v442_v37 }
 0x19f   :  { %v273_v12 = vpop.permute.xlu1 %272  ;;  %v276_v13 = vpop.permute.xlu0 %275 }
 0x1a0   :  { %v291_v14 = vpack.c.bf16 %v276_v13, %v276_v13  ;;  %v290_v26 = vpack.c.bf16 %v273_v12, %v273_v12 }
 0x1a2   :  { %v370_v15 = vunpack.c.l.b16 %v291_v14  ;;  %v346_v31 = vunpack.c.l.b16 %v290_v26  ;;  %v264_v14 = vpack.c.bf16 %v239_v39, %v239_v39 }
 0x1a4   :  { %v2792_v16 = vpack.c.b16 %v370_v15, %v370_v15  ;;  %v2808_v35 = vpack.c.b16 %v346_v31, %v346_v31 }
 0x1a6   :  { %372 = vrot.lane.b32.xlu1 %v2792_v16, %s2640_s23 }
 0x1a7   :  { %v286_v18 = vpop.permute.xlu1 %285 }
 0x1a8   :  { %v295_v19 = vpack.c.bf16 %v286_v18, %v286_v18  ;;  %v270_v20 = vpop.permute.xlu0 %269 }
 0x1a9   :  { %v289_v21 = vpack.c.bf16 %v270_v20, %v270_v20 }
 0x1aa   :  { %v466_v22 = vunpack.c.l.b16 %v295_v19 }
 0x1ab   :  { %v322_v23 = vunpack.c.l.b16 %v289_v21 }
 0x1ac   :  { %v2796_v25 = vpack.c.b16 %v466_v22, %v466_v22 }
 0x1ad   :  { %v2798_v27 = vpack.c.b16 %v322_v23, %v322_v23 }
 0x1ae   :  { %241 = vrot.lane.b32.xlu1 %v238_v11, %s2639_s22  ;;  %468 = vrot.lane.b32.xlu0 %v2796_v25, %s2640_s23 }
 0x1af   :  { %324 = vrot.lane.b32.xlu2 %v2798_v27, %s2640_s23 }
 0x1b0   :  { %v300_v29 = vpop.permute.xlu0 %299 }
 0x1b1   :  { %v306_v32 = vsel %vm301_vm5, %v300_v29, 0 }
 0x1b2   :  { %315 = vmatpush.bf16.xpose.msra.mxu2 %v306_v32 }
 0x1b6   :  { %244 = vrot.lane.b32.xlu1 %v238_v11, %s2637_s20  ;;  %420 = vrot.lane.b32.xlu0 %v2806_v33, %s2640_s23 }
 0x1b7   :  { %348 = vrot.lane.b32.xlu2 %v2808_v35, %s2640_s23 }
 0x1b8   :  { %v248_v47 = vpop.permute.xlu0 %247 }
 0x1b9   :  { %2237 = vmatmul.msk.bf16.vlgmr.msra.gmra.mxu2 %vm301_vm5, %v260_v36  ;;  %v263_v50 = vpack.c.bf16 %v248_v47, %v248_v47 }
 0x1be   :  { %444 = vrot.lane.b32.xlu1 %v2816_v38, %s2640_s23  ;;  %254 = vrot.lane.b32.xlu0 %v239_v39, %s2637_s20 }
 0x1bf   :  { %257 = vrot.lane.b32.xlu2 %v239_v39, %s2638_s21 }
 0x1c6   :  { %396 = vrot.lane.b32.xlu1 %v2822_v42, %s2640_s23 }
 0x1c7   :  { %251 = vrot.lane.b32.xlu2 %v239_v39, %s2639_s22 }
 0x209   :  { %v325_v43 = vpop.permute.xlu2 %324 }
 0x20a   :  { %v330_v44 = vsel %vm301_vm5, %v325_v43, 0 }
 0x20b   :  { %339 = vmatpush.bf16.xpose.msra.mxu3 %v330_v44 }
 0x211   :  { %v349_v45 = vpop.permute.xlu2 %348 }
 0x212   :  { %v354_v46 = vsel %vm301_vm5, %v349_v45, 0 }
 0x213   :  { %363 = vmatpush.bf16.xpose.msrb.mxu1 %v354_v46 }
 0x218   :  { %v373_v48 = vpop.permute.xlu1 %372 }
 0x219   :  { %v378_v49 = vsel %vm301_vm5, %v373_v48, 0  ;;  %v258_v55 = vpop.permute.xlu2 %257 }
 0x21a   :  { %387 = vmatpush.bf16.xpose.msrb.mxu2 %v378_v49  ;;  %v267_v61 = vpack.c.bf16 %v258_v55, %v258_v55 }
 0x220   :  { %v242_v51 = vpop.permute.xlu1 %241  ;;  %v469_v52 = vpop.permute.xlu0 %468 }
 0x221   :  { %v261_v53 = vpack.c.bf16 %v242_v51, %v242_v51  ;;  %v474_v54 = vsel %vm301_vm5, %v469_v52, 0  ;;  %2240 = vmatmul.msk.bf16.vlgmr.msrb.gmra.mxu2 %vm301_vm5, %v263_v50  ;;  %v252_v60 = vpop.permute.xlu2 %251 }
 0x222   :  { %483 = vmatpush.bf16.xpose.msra.mxu2 %v474_v54  ;;  %v265_v2 = vpack.c.bf16 %v252_v60, %v252_v60 }
 0x223   :  { %2238 = vmatmul.msk.bf16.vlgmr.msra.gmra.mxu3 %vm301_vm5, %v261_v53 }
 0x228   :  { %v245_v56 = vpop.permute.xlu1 %244  ;;  %v421_v57 = vpop.permute.xlu0 %420 }
 0x229   :  { %v262_v58 = vpack.c.bf16 %v245_v56, %v245_v56  ;;  %v426_v59 = vsel %vm301_vm5, %v421_v57, 0 }
 0x22a   :  { %435 = vmatpush.bf16.xpose.msrb.mxu0 %v426_v59 }
 0x22b   :  { %2239 = vmatmul.msk.bf16.vlgmr.msrb.gmra.mxu1 %vm301_vm5, %v262_v58 }
 0x230   :  { %v445_v3 = vpop.permute.xlu1 %444  ;;  %v255_v5 = vpop.permute.xlu0 %254 }
 0x231   :  { %v450_v4 = vsel %vm301_vm5, %v445_v3, 0  ;;  %2242 = vmatmul.msk.bf16.vlgmr.msrb.gmra.mxu0 %vm301_vm5, %v265_v2  ;;  %2244 = vmatmul.msk.bf16.vlgmr.msra.gmra.mxu2 %vm301_vm5, %v267_v61  ;;  %v266_v8 = vpack.c.bf16 %v255_v5, %v255_v5 }
 0x232   :  { %459 = vmatpush.bf16.xpose.msra.mxu1 %v450_v4 }
 0x238   :  { %v397_v7 = vpop.permute.xlu1 %396 }
 0x239   :  { %v402_v9 = vsel %vm301_vm5, %v397_v7, 0 }
 0x23a   :  { %411 = vmatpush.bf16.xpose.msrb.mxu3 %v402_v9 }
 0x23b   :  { %2243 = vmatmul.msk.bf16.vlgmr.msra.gmra.mxu1 %vm301_vm5, %v266_v8 }
 0x23c   :  { %v317_v12 = vpop.f32.mrf.mxu2 }
 0x23d   :  { %v2848_v13 = vsel %vm2841_vm7, %v317_v12, -1e+09 }
 0x23e   :  { %v499_v0 = vsel %vm301_vm5, %v2848_v13, -inf }
 0x23f   :  { %500 = vmax.xlane.f32.xlu1 %v499_v0 }
 0x241   :  { %2241 = vmatmul.msk.bf16.vlgmr.msrb.gmra.mxu3 %vm301_vm5, %v264_v14 }
 0x244   :  { %v319_v15 = vpop.f32.mrf.mxu2 }
 0x2a4   :  { %v389_v17 = vpop.f32.mrf.mxu2 }
 0x2a5   :  { %v494_v1 = vsel %vm2841_vm7, %v389_v17, -1e+09 }
 0x2a6   :  { %v341_v18 = vpop.f32.mrf.mxu3  ;;  %v508_v19 = vsel %vm301_vm5, %v494_v1, -inf }
 0x2a7   :  { %v492_v20 = vsel %vm2841_vm7, %v341_v18, -1e+09  ;;  %509 = vmax.xlane.f32.xlu2 %v508_v19 }
 0x2a8   :  { %v365_v21 = vpop.f32.mrf.mxu1  ;;  %v502_v22 = vsel %vm301_vm5, %v492_v20, -inf }
 0x2a9   :  { %v493_v23 = vsel %vm2841_vm7, %v365_v21, -1e+09  ;;  %503 = vmax.xlane.f32.xlu0 %v502_v22 }
 0x2aa   :  { %v505_v24 = vsel %vm301_vm5, %v493_v23, -inf }
 0x2ab   :  { %506 = vmax.xlane.f32.xlu1 %v505_v24 }
 0x2ac   :  { %v391_v26 = vpop.f32.mrf.mxu2 }
 0x2ae   :  { %v343_v28 = vpop.f32.mrf.mxu3  ;;  %v437_v29 = vpop.f32.mrf.mxu0 }
 0x2af   :  { %v496_v30 = vsel %vm2841_vm7, %v437_v29, -1e+09 }
 0x2b0   :  { %v367_v31 = vpop.f32.mrf.mxu1  ;;  %v514_v32 = vsel %vm301_vm5, %v496_v30, -inf }
 0x2b1   :  { %515 = vmax.xlane.f32.xlu2 %v514_v32 }
 0x2b2   :  { %v501_v50 = vpop.xlane.xlu1 %500 }
 0x2b3   :  { %v523_v28 = vsub.f32 %v2848_v13, %v501_v50 }
 0x2b4   :  { %v485_v34 = vpop.f32.mrf.mxu2 }
 0x2b5   :  { %v498_v36 = vsel %vm2841_vm7, %v485_v34, -1e+09  ;;  %v531_v29 = vmul.f32 1.442695, %v523_v28 }
 0x2b6   :  { %v439_v37 = vpop.f32.mrf.mxu0  ;;  %v520_v40 = vsel %vm301_vm5, %v498_v36, -inf }
 0x2b8   :  { %v461_v39 = vpop.f32.mrf.mxu1 }
 0x2b9   :  { %v497_v41 = vsel %vm2841_vm7, %v461_v39, -1e+09  ;;  %521 = vmax.xlane.f32.xlu2 %v520_v40 }
 0x2ba   :  { %v517_v43 = vsel %vm301_vm5, %v497_v41, -inf }
 0x2bb   :  { %518 = vmax.xlane.f32.xlu0 %v517_v43 }
 0x2bc   :  { %v487_v44 = vpop.f32.mrf.mxu2 }
 0x2c0   :  { %v463_v45 = vpop.f32.mrf.mxu1 }
 0x2c4   :  { %v413_v46 = vpop.f32.mrf.mxu3  ;;  %770 = vrot.lane.b32.xlu1 %v2792_v16, %s2631_s26 }
 0x2c5   :  { %v2879_v48 = vsel %vm2841_vm7, %v413_v46, -1e+09 }
 0x2c6   :  { %v511_v49 = vsel %vm301_vm5, %v2879_v48, -inf }
 0x2cc   :  { %v415_v47 = vpop.f32.mrf.mxu3 }
 0x2cf   :  { %749 = vrot.lane.b32.xlu0 %v2808_v35, %s2631_s26 }
 0x2d1   :  { %728 = vrot.lane.b32.xlu2 %v2798_v27, %s2631_s26 }
 0x2f9   :  { %512 = vmax.xlane.f32.xlu0 %v511_v49 }
 0x31a   :  { %v510_v51 = vpop.xlane.xlu2 %509 }
 0x31b   :  { %v526_v56 = vsub.f32 %v494_v1, %v510_v51 }
 0x31c   :  { %v504_v52 = vpop.xlane.xlu0 %503 }
 0x31d   :  { %v524_v53 = vsub.f32 %v492_v20, %v504_v52  ;;  %v537_v57 = vmul.f32 1.442695, %v526_v56 }
 0x31e   :  { %v507_v16 = vpop.xlane.xlu1 %506 }
 0x31f   :  { %v533_v54 = vmul.f32 1.442695, %v524_v53  ;;  %v525_v55 = vsub.f32 %v493_v23, %v507_v16 }
 0x321   :  { %2451 = vpow2.f32 %v533_v54  ;;  %v535_v35 = vmul.f32 1.442695, %v525_v55 }
 0x323   :  { %2453 = vpow2.f32 %v535_v35 }
 0x324   :  { %v516_v27 = vpop.xlane.xlu2 %515  ;;  %2455 = vpow2.f32 %v537_v57 }
 0x325   :  { %v528_v61 = vsub.f32 %v496_v30, %v516_v27 }
 0x327   :  { %v2883_v58 = vpop.eup %2451  ;;  %v541_v4 = vmul.f32 1.442695, %v528_v61 }
 0x328   :  { %v550_v59 = vsel %vm301_vm5, %v2883_v58, 0.0 }
 0x329   :  { %v2887_v60 = vpop.eup %2453  ;;  %551 = vadd.xlane.f32.xlu1 %v550_v59  ;;  %2457 = vpow2.f32 %v541_v4 }
 0x32a   :  { %v553_v2 = vsel %vm301_vm5, %v2887_v60, 0.0  ;;  %v2891_v6 = vpop.eup %2455 }
 0x32b   :  { %554 = vadd.xlane.f32.xlu2 %v553_v2  ;;  %v556_v12 = vsel %vm301_vm5, %v2891_v6, 0.0 }
 0x32c   :  { %v522_v3 = vpop.xlane.xlu2 %521 }
 0x32d   :  { %v530_v8 = vsub.f32 %v498_v36, %v522_v3 }
 0x32e   :  { %v519_v5 = vpop.xlane.xlu0 %518 }
 0x32f   :  { %v529_v7 = vsub.f32 %v497_v41, %v519_v5  ;;  %v545_v14 = vmul.f32 1.442695, %v530_v8  ;;  %v2896_v1 = vpop.eup %2457 }
 0x330   :  { %v562_v21 = vsel %vm301_vm5, %v2896_v1, 0.0 }
 0x331   :  { %v543_v9 = vmul.f32 1.442695, %v529_v7 }
 0x333   :  { %2459 = vpow2.f32 %v543_v9  ;;  %557 = vadd.xlane.f32.xlu2 %v556_v12 }
 0x334   :  { %v729_v0 = vpop.permute.xlu2 %728  ;;  %2461 = vpow2.f32 %v545_v14 }
 0x335   :  { %v734_v15 = vsel %vm152_vm4, %v729_v0, 0  ;;  %2463 = vpow2.f32 %v531_v29 }
 0x336   :  { %v771_v17 = vpop.permute.xlu1 %770  ;;  %743 = vmatpush.bf16.msra.mxu0 %v734_v15 }
 0x337   :  { %v776_v18 = vsel %vm152_vm4, %v771_v17, 0 }
 0x338   :  { %785 = vmatpush.bf16.msrb.mxu2 %v776_v18 }
 0x339   :  { %v2899_v19 = vpop.eup %2459 }
 0x33a   :  { %v565_v20 = vsel %vm301_vm5, %v2899_v19, 0.0  ;;  %v2905_v22 = vpop.eup %2461 }
 0x33b   :  { %566 = vadd.xlane.f32.xlu0 %v565_v20  ;;  %563 = vadd.xlane.f32.xlu2 %v562_v21  ;;  %v568_v26 = vsel %vm301_vm5, %v2905_v22, 0.0 }
 0x341   :  { %v750_v23 = vpop.permute.xlu0 %749 }
 0x342   :  { %v755_v24 = vsel %vm152_vm4, %v750_v23, 0  ;;  %854 = vrot.lane.b32.xlu1 %v2796_v25, %s2631_s26  ;;  %v2921_v25 = vpop.eup %2463 }
 0x343   :  { %764 = vmatpush.bf16.msrb.mxu1 %v755_v24  ;;  %569 = vadd.xlane.f32.xlu0 %v568_v26  ;;  %v547_v30 = vsel %vm301_vm5, %v2921_v25, 0.0 }
 0x353   :  { %833 = vrot.lane.b32.xlu2 %v2816_v38, %s2631_s26 }
 0x357   :  { %812 = vrot.lane.b32.xlu0 %v2806_v33, %s2631_s26 }
 0x35b   :  { %707 = vrot.lane.b32.xlu2 %v2786_v10, %s2631_s26 }
 0x363   :  { %791 = vrot.lane.b32.xlu2 %v2822_v42, %s2631_s26 }
 0x36c   :  { %v513_v31 = vpop.xlane.xlu0 %512  ;;  %548 = vadd.xlane.f32.xlu1 %v547_v30 }
 0x36d   :  { %v527_v38 = vsub.f32 %v2879_v48, %v513_v31 }
 0x36f   :  { %v539_v33 = vmul.f32 1.442695, %v527_v38 }
 0x371   :  { %2465 = vpow2.f32 %v539_v33 }
 0x377   :  { %v2926_v13 = vpop.eup %2465 }
 0x378   :  { %v559_v10 = vsel %vm301_vm5, %v2926_v13, 0.0 }
 0x381   :  { %560 = vadd.xlane.f32.xlu0 %v559_v10 }
 0x39c   :  { %v552_v32 = vpop.xlane.xlu1 %551 }
 0x39d   :  { %2467 = vrcp.f32 %v552_v32  ;;  %v596_v43 = vand.u32 2147483648, %v552_v32  ;;  %v594_v45 = vand.u32 2147483647, %v552_v32  ;;  %vm590_vm14 = vweird.f32 %v552_v32 }
 0x39e   :  { %v555_v42 = vpop.xlane.xlu2 %554 }
 0x39f   :  { %2469 = vrcp.f32 %v555_v42  ;;  %v610_v47 = vand.u32 2147483648, %v555_v42  ;;  %v608_v50 = vand.u32 2147483647, %v555_v42  ;;  %v597_v51 = vor.u32 1.1754944e-38, %v596_v43 }
 0x3a0   :  { %vm595_vm6 = vcmp.eq.f32.partialorder %v594_v45, 8.507059e+37  ;;  %vm604_vm8 = vweird.f32 %v555_v42 }
 0x3a1   :  { %v611_v55 = vor.u32 1.1754944e-38, %v610_v47  ;;  %vm609_vm11 = vcmp.eq.f32.partialorder %v608_v50, 8.507059e+37 }
 0x3a3   :  { %v2468_v34 = vpop.eup %2467 }
 0x3a4   :  { %v586_v36 = vmul.f32 %v2468_v34, %v552_v32  ;;  %vm591_vm9 = vweird.f32 %v2468_v34 }
 0x3a5   :  { %v2470_v37 = vpop.eup %2469  ;;  %vm592_vm3 = vmor %vm590_vm14, %vm591_vm9 }
 0x3a6   :  { %v587_v39 = vsub.f32 1.0, %v586_v36  ;;  %v600_v40 = vmul.f32 %v2470_v37, %v555_v42  ;;  %v558_v41 = vpop.xlane.xlu2 %557  ;;  %vm605_vm15 = vweird.f32 %v2470_v37 }
 0x3a7   :  { %2471 = vrcp.f32 %v558_v41  ;;  %vm606_vm10 = vmor %vm604_vm8, %vm605_vm15  ;;  %v622_v4 = vand.u32 2147483647, %v558_v41  ;;  %vm618_vm0 = vweird.f32 %v558_v41 }
 0x3a8   :  { %v588_v44 = vmul.f32 %v2468_v34, %v587_v39  ;;  %v601_v46 = vsub.f32 1.0, %v600_v40 }
 0x3a9   :  { %vm623_vm9 = vcmp.eq.f32.partialorder %v622_v4, 8.507059e+37 }
 0x3aa   :  { %v589_v48 = vadd.f32 %v2468_v34, %v588_v44  ;;  %v602_v49 = vmul.f32 %v2470_v37, %v601_v46 }
 0x3ac   :  { %v593_v52 = vsel %vm592_vm3, %v2468_v34, %v589_v48  ;;  %v603_v53 = vadd.f32 %v2470_v37, %v602_v49 }
 0x3ad   :  { %v2472_v16 = vpop.eup %2471  ;;  %v598_v54 = vsel %vm595_vm6, %v597_v51, %v593_v52 }
 0x3ae   :  { %v684_v56 = vmul.f32 %v2883_v58, %v598_v54  ;;  %v607_v35 = vsel %vm606_vm10, %v2470_v37, %v603_v53  ;;  %v614_v27 = vmul.f32 %v2472_v16, %v558_v41  ;;  %v567_v57 = vpop.xlane.xlu0 %566  ;;  %v2931_v59 = vpop.xlane.xlu2 %563  ;;  %v624_v58 = vand.u32 2147483648, %v558_v41 }
 0x3af   :  { %v612_v61 = vsel %vm609_vm11, %v611_v55, %v607_v35  ;;  %2473 = vrcp.f32 %v567_v57  ;;  %vm619_vm13 = vweird.f32 %v2472_v16  ;;  %v664_v29 = vand.u32 2147483647, %v567_v57 }
 0x3b0   :  { %692 = vst.msk [vmem:[%s3307_s4 + $0x8] sm:$0xff] %vm301_vm5, %v684_v56  ;;  %v685_v2 = vmul.f32 %v2887_v60, %v612_v61  ;;  %v615_v3 = vsub.f32 1.0, %v614_v27  ;;  %2475 = vrcp.f32 %v2931_v59  ;;  %v700_v7 = vpack.c.bf16 %v684_v56, %v684_v56  ;;  %vm620_vm1 = vmor %vm618_vm0, %vm619_vm13 }
 0x3b1   :  { %v625_v0 = vor.u32 1.1754944e-38, %v624_v58  ;;  %v666_v30 = vand.u32 2147483648, %v567_v57  ;;  %v652_v10 = vand.u32 2147483648, %v2931_v59  ;;  %vm660_vm3 = vweird.f32 %v567_v57 }
 0x3b2   :  { %693 = vst.msk [vmem:[%s3307_s4 + $0x10] sm:$0xff] %vm301_vm5, %v685_v2  ;;  %v616_v5 = vmul.f32 %v2472_v16, %v615_v3  ;;  %v701_v8 = vpack.c.bf16 %v685_v2, %v685_v2  ;;  %2246 = vmatmul.msk.bf16.vlgmr.msra.gmra.mxu0 %vm301_vm5, %v700_v7  ;;  %vm646_vm8 = vweird.f32 %v2931_v59  ;;  %vm665_vm10 = vcmp.eq.f32.partialorder %v664_v29, 8.507059e+37 }
 0x3b3   :  { %v667_v37 = vor.u32 1.1754944e-38, %v666_v30  ;;  %v653_v41 = vor.u32 1.1754944e-38, %v652_v10 }
 0x3b4   :  { %v617_v9 = vadd.f32 %v2472_v16, %v616_v5  ;;  %v855_v12 = vpop.permute.xlu1 %854  ;;  %2247 = vmatmul.msk.bf16.vlgmr.msrb.gmra.mxu1 %vm301_vm5, %v701_v8 }
 0x3b5   :  { %v2474_v60 = vpop.eup %2473  ;;  %v860_v14 = vsel %vm152_vm4, %v855_v12, 0 }
 0x3b6   :  { %v2476_v15 = vpop.eup %2475  ;;  %v621_v17 = vsel %vm620_vm1, %v2472_v16, %v617_v9  ;;  %v656_v18 = vmul.f32 %v2474_v60, %v567_v57  ;;  %869 = vmatpush.bf16.msra.mxu2 %v860_v14  ;;  %v570_v20 = vpop.xlane.xlu0 %569  ;;  %vm661_vm14 = vweird.f32 %v2474_v60 }
 0x3b7   :  { %v834_v21 = vpop.permute.xlu2 %833  ;;  %v626_v23 = vsel %vm623_vm9, %v625_v0, %v621_v17  ;;  %v642_v24 = vmul.f32 %v2476_v15, %v2931_v59  ;;  %2477 = vrcp.f32 %v570_v20  ;;  %vm647_vm15 = vweird.f32 %v2476_v15  ;;  %vm662_vm6 = vmor %vm660_vm3, %vm661_vm14 }
 0x3b8   :  { %v686_v26 = vmul.f32 %v2891_v6, %v626_v23  ;;  %v657_v28 = vsub.f32 1.0, %v656_v18  ;;  %v839_v38 = vsel %vm152_vm4, %v834_v21, 0  ;;  %v650_v6 = vand.u32 2147483647, %v2931_v59  ;;  %vm648_vm11 = vmor %vm646_vm8, %vm647_vm15 }
 0x3b9   :  { %v643_v31 = vsub.f32 1.0, %v642_v24  ;;  %848 = vmatpush.bf16.msra.mxu1 %v839_v38  ;;  %v680_v52 = vand.u32 2147483648, %v570_v20  ;;  %v678_v16 = vand.u32 2147483647, %v570_v20  ;;  %vm674_vm1 = vweird.f32 %v570_v20 }
 0x3ba   :  { %694 = vst.msk [vmem:[%s3307_s4 + $0x18] sm:$0xff] %vm301_vm5, %v686_v26  ;;  %v658_v33 = vmul.f32 %v2474_v60, %v657_v28  ;;  %v702_v32 = vpack.c.bf16 %v686_v26, %v686_v26  ;;  %vm651_vm13 = vcmp.eq.f32.partialorder %v650_v6, 8.507059e+37 }
 0x3bb   :  { %v644_v42 = vmul.f32 %v2476_v15, %v643_v31  ;;  %vm679_vm14 = vcmp.eq.f32.partialorder %v678_v16, 8.507059e+37 }
 0x3bc   :  { %v659_v34 = vadd.f32 %v2474_v60, %v658_v33  ;;  %2248 = vmatmul.msk.bf16.vlgmr.msrb.gmra.mxu2 %vm301_vm5, %v702_v32 }
 0x3bd   :  { %v2478_v36 = vpop.eup %2477  ;;  %v645_v39 = vadd.f32 %v2476_v15, %v644_v42 }
 0x3be   :  { %v663_v40 = vsel %vm662_vm6, %v2474_v60, %v659_v34  ;;  %v670_v43 = vmul.f32 %v2478_v36, %v570_v20  ;;  %vm675_vm0 = vweird.f32 %v2478_v36 }
 0x3bf   :  { %v708_v44 = vpop.permute.xlu2 %707  ;;  %v668_v45 = vsel %vm665_vm10, %v667_v37, %v663_v40  ;;  %v649_v46 = vsel %vm648_vm11, %v2476_v15, %v645_v39  ;;  %vm676_vm9 = vmor %vm674_vm1, %vm675_vm0  ;;  %vm888_vm1 = vcmask 130048  }
 0x3c0   :  { %v713_v47 = vsel %vm152_vm4, %v708_v44, 0  ;;  %v689_v48 = vmul.f32 %v2899_v19, %v668_v45  ;;  %v654_v49 = vsel %vm651_vm13, %v653_v41, %v649_v46  ;;  %v671_v50 = vsub.f32 1.0, %v670_v43 }
 0x3c1   :  { %722 = vmatpush.bf16.msra.mxu3 %v713_v47  ;;  %v688_v51 = vmul.f32 %v2896_v1, %v654_v49  ;;  %v681_v1 = vor.u32 1.1754944e-38, %v680_v52  ;;  %v2367_v52 = vld [vmem:[#allocation4 + $0x10] sm:$0xff] }
 0x3c2   :  { %697 = vst.msk [vmem:[%s3307_s4 + $0x30] sm:$0xff] %vm301_vm5, %v689_v48  ;;  %v672_v53 = vmul.f32 %v2478_v36, %v671_v50  ;;  %v705_v54 = vpack.c.bf16 %v689_v48, %v689_v48  ;;  %v2368_v50 = vld [vmem:[#allocation4 + $0x18] sm:$0xff] }
 0x3c3   :  { %696 = vst.msk [vmem:[%s3307_s4 + $0x28] sm:$0xff] %vm301_vm5, %v688_v51  ;;  %v704_v3 = vpack.c.bf16 %v688_v51, %v688_v51 }
 0x3c4   :  { %v673_v19 = vadd.f32 %v2478_v36, %v672_v53  ;;  %2251 = vmatmul.msk.bf16.vlgmr.msra.gmra.mxu1 %vm301_vm5, %v705_v54 }
 0x3c6   :  { %v677_v55 = vsel %vm676_vm9, %v2478_v36, %v673_v19  ;;  %vm890_vm9 = vcmask 195584  }
 0x3c7   :  { %v792_v56 = vpop.permute.xlu2 %791  ;;  %v682_v35 = vsel %vm679_vm14, %v681_v1, %v677_v55 }
 0x3c8   :  { %v797_v27 = vsel %vm152_vm4, %v792_v56, 0  ;;  %v690_v57 = vmul.f32 %v2905_v22, %v682_v35 }
 0x3c9   :  { %806 = vmatpush.bf16.msrb.mxu3 %v797_v27  ;;  %v813_v59 = vpop.permute.xlu0 %812 }
 0x3ca   :  { %698 = vst.msk [vmem:[%s3307_s4 + $0x38] sm:$0xff] %vm301_vm5, %v690_v57  ;;  %v818_v61 = vsel %vm152_vm4, %v813_v59, 0  ;;  %v706_v2 = vpack.c.bf16 %v690_v57, %v690_v57 }
 0x3cb   :  { %827 = vmatpush.bf16.msrb.mxu0 %v818_v61 }
 0x3cc   :  { %2252 = vmatmul.msk.bf16.vlgmr.msra.gmra.mxu2 %vm301_vm5, %v706_v2 }
 0x3ce   :  { %2250 = vmatmul.msk.bf16.vlgmr.msrb.gmra.mxu0 %vm301_vm5, %v704_v3 }
 0x3df   :  { %v549_v4 = vpop.xlane.xlu1 %548 }
 0x3e0   :  { %2479 = vrcp.f32 %v549_v4  ;;  %v582_v7 = vand.u32 2147483648, %v549_v4  ;;  %v580_v9 = vand.u32 2147483647, %v549_v4  ;;  %vm576_vm3 = vweird.f32 %v549_v4 }
 0x3e2   :  { %v583_v60 = vor.u32 1.1754944e-38, %v582_v7  ;;  %vm581_vm8 = vcmp.eq.f32.partialorder %v580_v9, 8.507059e+37 }
 0x3e6   :  { %v2480_v58 = vpop.eup %2479 }
 0x3e7   :  { %v572_v22 = vmul.f32 %v2480_v58, %v549_v4  ;;  %vm577_vm15 = vweird.f32 %v2480_v58 }
 0x3e8   :  { %vm578_vm6 = vmor %vm576_vm3, %vm577_vm15 }
 0x3e9   :  { %v573_v5 = vsub.f32 1.0, %v572_v22  ;;  %v2434_v22 = vld [vmem:[#allocation7 + $0x51] ss:$0 sm:$0xff] }
 0x3eb   :  { %v574_v8 = vmul.f32 %v2480_v58, %v573_v5 }
 0x3ed   :  { %v575_v12 = vadd.f32 %v2480_v58, %v574_v8 }
 0x3ef   :  { %v579_v0 = vsel %vm578_vm6, %v2480_v58, %v575_v12 }
 0x3f0   :  { %v584_v14 = vsel %vm581_vm8, %v583_v60, %v579_v0 }
 0x3f1   :  { %v683_v15 = vmul.f32 %v2921_v25, %v584_v14 }
 0x3f3   :  { %691 = vst.msk [vmem:[%s3307_s4] sm:$0xff] %vm301_vm5, %v683_v15  ;;  %v699_v17 = vpack.c.bf16 %v683_v15, %v683_v15  ;;  %v2643_v15 = vmov 32.0  }
 0x3f4   :  { %v561_v18 = vpop.xlane.xlu0 %560 }
 0x3f5   :  { %2481 = vrcp.f32 %v561_v18  ;;  %2245 = vmatmul.msk.bf16.vlgmr.msra.gmra.mxu3 %vm301_vm5, %v699_v17  ;;  %v638_v24 = vand.u32 2147483648, %v561_v18  ;;  %v636_v28 = vand.u32 2147483647, %v561_v18  ;;  %vm632_vm11 = vweird.f32 %v561_v18 }
 0x3f6   :  { %935 = vmatpush.bf16.msra.mxu3 %v2368_v50  ;;  %2483 = vrcp.f32 %v2643_v15 }
 0x3f7   :  { %v639_v25 = vor.u32 1.1754944e-38, %v638_v24  ;;  %vm637_vm0 = vcmp.eq.f32.partialorder %v636_v28, 8.507059e+37 }
 0x3fa   :  { %936 = vmatpush.bf16.msra.mxu3 %v2367_v52  ;;  %v2435_v52 = vld [vmem:[#allocation7 + $0x52] ss:$0 sm:$0xff] }
 0x3fb   :  { %v2482_v20 = vpop.eup %2481 }
 0x3fc   :  { %v628_v21 = vmul.f32 %v2482_v20, %v561_v18  ;;  %vm633_vm10 = vweird.f32 %v2482_v20  ;;  %v2484_v17 = vpop.eup %2483 }
 0x3fd   :  { %vm634_vm13 = vmor %vm632_vm11, %vm633_vm10  ;;  %v954_v18 = vmul.f32 32.0, %v2484_v17  ;;  %vm958_vm14 = vweird.f32 %v2484_v17 }
 0x3fe   :  { %v629_v23 = vsub.f32 1.0, %v628_v21 }
 0x400   :  { %v630_v26 = vmul.f32 %v2482_v20, %v629_v23 }
 0x402   :  { %v631_v29 = vadd.f32 %v2482_v20, %v630_v26 }
 0x404   :  { %v635_v30 = vsel %vm634_vm13, %v2482_v20, %v631_v29  ;;  %v955_v20 = vsub.f32 1.0, %v954_v18 }
 0x405   :  { %v640_v31 = vsel %vm637_vm0, %v639_v25, %v635_v30 }
 0x406   :  { %v687_v38 = vmul.f32 %v2926_v13, %v640_v31  ;;  %v956_v21 = vmul.f32 %v2484_v17, %v955_v20 }
 0x408   :  { %695 = vst.msk [vmem:[%s3307_s4 + $0x20] sm:$0xff] %vm301_vm5, %v687_v38  ;;  %v703_v33 = vpack.c.bf16 %v687_v38, %v687_v38  ;;  %v957_v23 = vadd.f32 %v2484_v17, %v956_v21 }
 0x40a   :  { %2249 = vmatmul.msk.bf16.vlgmr.msrb.gmra.mxu3 %vm301_vm5, %v703_v33  ;;  %v3004_v24 = vsel %vm958_vm14, %v2484_v17, %v957_v23 }
 0x42f   :  { %v745_v10 = vpop.f32.mrf.mxu0 }
 0x431   :  { %v766_v32 = vpop.f32.mrf.mxu1 }
 0x437   :  { %v747_v42 = vpop.f32.mrf.mxu0 }
 0x439   :  { %v768_v6 = vpop.f32.mrf.mxu1 }
 0x43f   :  { %v787_v34 = vpop.f32.mrf.mxu2 }
 0x441   :  { %v850_v36 = vpop.f32.mrf.mxu1 }
 0x442   :  { %v2408_v45 = vpack.i.bf16 %v850_v36, %v766_v32  ;;  %v2370_v32 = vld [vmem:[#allocation4 + $0x28] sm:$0xff] }
 0x443   :  { %1040 = vmatpush.bf16.msra.mxu0 %v2370_v32  ;;  %v2376_v32 = vld [vmem:[#allocation4 + $0x58] sm:$0xff] }
 0x444   :  { %1176 = vmatpush.bf16.msrb.mxu2 %v2376_v32 }
 0x447   :  { %v789_v37 = vpop.f32.mrf.mxu2 }
 0x449   :  { %v852_v39 = vpop.f32.mrf.mxu1 }
 0x44b   :  { %v829_v40 = vpop.f32.mrf.mxu0 }
 0x44c   :  { %v2403_v41 = vpack.i.bf16 %v829_v40, %v745_v10 }
 0x44e   :  { %2404 = vrot.lane.b32.xlu2 %v2403_v41, %s2635_s5 }
 0x44f   :  { %v871_v13 = vpop.f32.mrf.mxu2 }
 0x450   :  { %v2413_v43 = vpack.i.bf16 %v871_v13, %v787_v34  ;;  %v2369_v34 = vld [vmem:[#allocation4 + $0x20] sm:$0xff] }
 0x451   :  { %1041 = vmatpush.bf16.msra.mxu0 %v2369_v34  ;;  %v2375_v34 = vld [vmem:[#allocation4 + $0x50] sm:$0xff] }
 0x452   :  { %2414 = vrot.lane.b32.xlu1 %v2413_v43, %s2641_s14  ;;  %1177 = vmatpush.bf16.msrb.mxu2 %v2375_v34 }
 0x453   :  { %v831_v44 = vpop.f32.mrf.mxu0 }
 0x456   :  { %2409 = vrot.lane.b32.xlu2 %v2408_v45, %s2642_s15 }
 0x457   :  { %v873_v46 = vpop.f32.mrf.mxu2 }
 0x478   :  { %v724_v47 = vpop.f32.mrf.mxu3 }
 0x480   :  { %v726_v48 = vpop.f32.mrf.mxu3 }
 0x48d   :  { %v808_v49 = vpop.f32.mrf.mxu3 }
 0x495   :  { %v810_v51 = vpop.f32.mrf.mxu3 }
 0x4a8   :  { %v2405_v53 = vpop.permute.xlu2 %2404 }
 0x4a9   :  { %v2407_v54 = vunpack.i.h.bf16 %v2405_v53  ;;  %v2406_v19 = vunpack.i.l.bf16 %v2405_v53 }
 0x4ab   :  { %v904_v35 = vsel %vm301_vm5, %v808_v49, %v2407_v54  ;;  %v887_v27 = vsel %vm301_vm5, %v724_v47, %v2406_v19  ;;  %v2436_v19 = vld [vmem:[#allocation7 + $0x53] ss:$0 sm:$0xff] }
 0x4b0   :  { %v2410_v16 = vpop.permute.xlu2 %2409 }
 0x4b1   :  { %v2412_v1 = vunpack.i.h.bf16 %v2410_v16  ;;  %v2411_v55 = vunpack.i.l.bf16 %v2410_v16 }
 0x4b3   :  { %v889_v61 = vsel %vm888_vm1, %v887_v27, %v2411_v55  ;;  %v905_v2 = vsel %vm888_vm1, %v904_v35, %v2412_v1 }
 0x4c4   :  { %v2415_v56 = vpop.permute.xlu1 %2414 }
 0x4c5   :  { %v2417_v57 = vunpack.i.h.bf16 %v2415_v56  ;;  %v2416_v59 = vunpack.i.l.bf16 %v2415_v56 }
 0x4c7   :  { %v906_v3 = vsel %vm890_vm9, %v905_v2, %v2417_v57  ;;  %v891_v4 = vsel %vm890_vm9, %v889_v61, %v2416_v59  ;;  %v2374_v59 = vld [vmem:[#allocation4 + $0x48] sm:$0xff]  ;;  %v2373_v61 = vld [vmem:[#allocation4 + $0x40] sm:$0xff]  ;;  %v2372_v2 = vld [vmem:[#allocation4 + $0x38] sm:$0xff] }
 0x4c8   :  { %v911_v58 = vpack.c.bf16 %v906_v3, %v891_v4  ;;  %1084 = vmatpush.bf16.msrb.mxu1 %v2374_v59  ;;  %v2371_v3 = vld [vmem:[#allocation4 + $0x30] sm:$0xff]  ;;  %v2441_v59 = vld [vmem:[#allocation7 + $0x58] ss:$0 sm:$0xff] }
 0x4ca   :  { %2261 = vmatmul.msk.bf16.vlgmr.msra.gmra.mxu3 %vm220_vm2, %v911_v58  ;;  %v2437_v58 = vld [vmem:[#allocation7 + $0x54] ss:$0 sm:$0xff] }
 0x4cc   :  { %1085 = vmatpush.bf16.msrb.mxu1 %v2373_v61 }
 0x4d0   :  { %1086 = vmatpush.bf16.msrb.mxu1 %v2372_v2 }
 0x4d4   :  { %1087 = vmatpush.bf16.msrb.mxu1 %v2371_v3 }
 0x54d   :  { %v938_v5 = vpop.f32.mrf.mxu3 }
 0x54e   :  { %v939_v7 = vadd.f32 %v2434_v22, %v938_v5 }
 0x550   :  { %v943_v8 = vadd.f32 %v939_v7, %v2774_v62 }
 0x552   :  { %v947_v9 = vsel %vm220_vm2, %v943_v8, 0.0 }
 0x553   :  { %948 = vadd.xlane.f32.xlu2 %v947_v9 }
 0x555   :  { %v940_v12 = vpop.f32.mrf.mxu3 }
 0x556   :  { %v941_v60 = vadd.f32 %v2434_v22, %v940_v12 }
 0x558   :  { %v944_v0 = vadd.f32 %v941_v60, %v2776_v63  ;;  %v2438_v60 = vld [vmem:[#allocation7 + $0x55] ss:$0 sm:$0xff] }
 0x55a   :  { %v950_v14 = vsel %vm220_vm2, %v944_v0, 0.0 }
 0x55b   :  { %951 = vadd.xlane.f32.xlu0 %v950_v14 }
 0x5c6   :  { %v949_v62 = vpop.xlane.xlu2 %948 }
 0x5c7   :  { %v960_v26 = vmul.f32 %v3004_v24, %v949_v62 }
 0x5c9   :  { %v962_v28 = vsub.f32 %v943_v8, %v960_v26 }
 0x5cb   :  { %v964_v29 = vmul.f32 %v962_v28, %v962_v28 }
 0x5cd   :  { %v966_v63 = vsel %vm220_vm2, %v964_v29, 0.0 }
 0x5ce   :  { %v952_v25 = vpop.xlane.xlu0 %951  ;;  %967 = vadd.xlane.f32.xlu0 %v966_v63 }
 0x5cf   :  { %v961_v30 = vmul.f32 %v3004_v24, %v952_v25 }
 0x5d1   :  { %v963_v31 = vsub.f32 %v944_v0, %v961_v30 }
 0x5d3   :  { %v965_v38 = vmul.f32 %v963_v31, %v963_v31 }
 0x5d5   :  { %v969_v33 = vsel %vm220_vm2, %v965_v38, 0.0 }
 0x5d6   :  { %970 = vadd.xlane.f32.xlu1 %v969_v33 }
 0x641   :  { %v968_v10 = vpop.xlane.xlu0 %967 }
 0x642   :  { %v972_v42 = vmul.f32 %v968_v10, %v3004_v24 }
 0x644   :  { %v974_v6 = vadd.f32 1e-05, %v972_v42 }
 0x646   :  { %2485 = vrsqrt.f32 %v974_v6  ;;  %vm982_vm3 = vweird.f32 %v974_v6 }
 0x649   :  { %v971_v36 = vpop.xlane.xlu1 %970 }
 0x64a   :  { %v973_v37 = vmul.f32 %v971_v36, %v3004_v24 }
 0x64c   :  { %v2486_v39 = vpop.eup %2485  ;;  %v975_v40 = vadd.f32 1e-05, %v973_v37 }
 0x64d   :  { %v977_v41 = vmul.f32 %v2486_v39, %v974_v6  ;;  %vm983_vm15 = vweird.f32 %v2486_v39 }
 0x64e   :  { %2487 = vrsqrt.f32 %v975_v40  ;;  %vm984_vm6 = vmor %vm982_vm3, %vm983_vm15  ;;  %vm992_vm10 = vweird.f32 %v975_v40 }
 0x64f   :  { %v978_v13 = vmul.f32 %v2486_v39, %v977_v41 }
 0x651   :  { %v979_v43 = vmul.f32 0.5, %v978_v13 }
 0x653   :  { %v980_v44 = vsub.f32 1.5, %v979_v43 }
 0x654   :  { %v2488_v45 = vpop.eup %2487 }
 0x655   :  { %v981_v46 = vmul.f32 %v2486_v39, %v980_v44  ;;  %v987_v47 = vmul.f32 %v2488_v45, %v975_v40  ;;  %vm993_vm8 = vweird.f32 %v2488_v45 }
 0x656   :  { %vm994_vm11 = vmor %vm992_vm10, %vm993_vm8 }
 0x657   :  { %v988_v48 = vmul.f32 %v2488_v45, %v987_v47  ;;  %v985_v49 = vsel %vm984_vm6, %v2486_v39, %v981_v46 }
 0x658   :  { %v996_v53 = vmul.f32 %v985_v49, %v962_v28 }
 0x659   :  { %v989_v50 = vmul.f32 0.5, %v988_v48 }
 0x65a   :  { %v999_v1 = vmul.f32 %v2435_v52, %v996_v53 }
 0x65b   :  { %v990_v51 = vsub.f32 1.5, %v989_v50 }
 0x65c   :  { %v1002_v35 = vadd.f32 %v2436_v19, %v999_v1 }
 0x65d   :  { %v991_v16 = vmul.f32 %v2488_v45, %v990_v51 }
 0x65f   :  { %v995_v54 = vsel %vm994_vm11, %v2488_v45, %v991_v16 }
 0x660   :  { %v997_v55 = vmul.f32 %v995_v54, %v963_v31 }
 0x662   :  { %v1000_v56 = vmul.f32 %v2435_v52, %v997_v55  ;;  %v2439_v52 = vld [vmem:[#allocation7 + $0x56] ss:$0 sm:$0xff] }
 0x664   :  { %v1003_v27 = vadd.f32 %v2436_v19, %v1000_v56  ;;  %v2440_v19 = vld [vmem:[#allocation7 + $0x57] ss:$0 sm:$0xff] }
 0x666   :  { %v1016_v57 = vpack.c.bf16 %v1003_v27, %v1002_v35 }
 0x668   :  { %2270 = vmatmul.msk.bf16.vlgmr.msra.gmra.mxu0 %vm220_vm2, %v1016_v57 }
 0x6e5   :  { %v1043_v4 = vpop.f32.mrf.mxu0 }
 0x6e6   :  { %v1044_v22 = vadd.f32 %v2437_v58, %v1043_v4 }
 0x6e8   :  { %v1048_v8 = vmax.f32 %v1044_v22, 0.0 }
 0x6ed   :  { %v1045_v5 = vpop.f32.mrf.mxu0 }
 0x6ee   :  { %v1046_v7 = vadd.f32 %v2437_v58, %v1045_v5 }
 0x6f0   :  { %v1049_v9 = vmax.f32 %v1046_v7, 0.0 }
 0x6f2   :  { %v1050_v12 = vpack.c.bf16 %v1049_v9, %v1048_v8 }
 0x6f4   :  { %2287 = vmatmul.msk.bf16.vlgmr.msrb.gmra.mxu1 %vm168_vm12, %v1050_v12 }
 0x771   :  { %v1089_v0 = vpop.f32.mrf.mxu1 }
 0x772   :  { %v1090_v14 = vadd.f32 %v2438_v60, %v1089_v0 }
 0x774   :  { %v1094_v15 = vadd.f32 %v1090_v14, %v1002_v35 }
 0x776   :  { %v1098_v17 = vsel %vm220_vm2, %v1094_v15, 0.0 }
 0x777   :  { %1099 = vadd.xlane.f32.xlu0 %v1098_v17 }
 0x779   :  { %v1091_v18 = vpop.f32.mrf.mxu1 }
 0x77a   :  { %v1092_v20 = vadd.f32 %v2438_v60, %v1091_v18 }
 0x77c   :  { %v1095_v21 = vadd.f32 %v1092_v20, %v1003_v27 }
 0x77e   :  { %v1101_v23 = vsel %vm220_vm2, %v1095_v21, 0.0 }
 0x77f   :  { %1102 = vadd.xlane.f32.xlu0 %v1101_v23 }
 0x7ea   :  { %v1100_v62 = vpop.xlane.xlu0 %1099 }
 0x7eb   :  { %v1104_v26 = vmul.f32 %v1100_v62, %v3004_v24 }
 0x7ed   :  { %v1106_v28 = vsub.f32 %v1094_v15, %v1104_v26 }
 0x7ef   :  { %v1108_v29 = vmul.f32 %v1106_v28, %v1106_v28 }
 0x7f1   :  { %v1110_v63 = vsel %vm220_vm2, %v1108_v29, 0.0 }
 0x7f2   :  { %1111 = vadd.xlane.f32.xlu0 %v1110_v63  ;;  %v1103_v25 = vpop.xlane.xlu0 %1102 }
 0x7f3   :  { %v1105_v30 = vmul.f32 %v1103_v25, %v3004_v24 }
 0x7f5   :  { %v1107_v31 = vsub.f32 %v1095_v21, %v1105_v30 }
 0x7f7   :  { %v1109_v38 = vmul.f32 %v1107_v31, %v1107_v31 }
 0x7f9   :  { %v1113_v33 = vsel %vm220_vm2, %v1109_v38, 0.0 }
 0x7fa   :  { %1114 = vadd.xlane.f32.xlu2 %v1113_v33 }
 0x865   :  { %v1112_v10 = vpop.xlane.xlu0 %1111 }
 0x866   :  { %v1116_v42 = vmul.f32 %v1112_v10, %v3004_v24 }
 0x868   :  { %v1118_v6 = vadd.f32 1e-05, %v1116_v42 }
 0x86a   :  { %2489 = vrsqrt.f32 %v1118_v6  ;;  %vm1126_vm0 = vweird.f32 %v1118_v6 }
 0x86d   :  { %v1115_v36 = vpop.xlane.xlu2 %1114 }
 0x86e   :  { %v1117_v37 = vmul.f32 %v1115_v36, %v3004_v24 }
 0x870   :  { %v2490_v39 = vpop.eup %2489  ;;  %v1119_v40 = vadd.f32 1e-05, %v1117_v37 }
 0x871   :  { %v1121_v41 = vmul.f32 %v2490_v39, %v1118_v6  ;;  %vm1127_vm13 = vweird.f32 %v2490_v39 }
 0x872   :  { %2491 = vrsqrt.f32 %v1119_v40  ;;  %vm1128_vm14 = vmor %vm1126_vm0, %vm1127_vm13  ;;  %vm1136_vm3 = vweird.f32 %v1119_v40 }
 0x873   :  { %v1122_v13 = vmul.f32 %v2490_v39, %v1121_v41 }
 0x875   :  { %v1123_v43 = vmul.f32 0.5, %v1122_v13 }
 0x877   :  { %v1124_v44 = vsub.f32 1.5, %v1123_v43 }
 0x878   :  { %v2492_v45 = vpop.eup %2491 }
 0x879   :  { %v1125_v46 = vmul.f32 %v2490_v39, %v1124_v44  ;;  %v1131_v47 = vmul.f32 %v2492_v45, %v1119_v40  ;;  %vm1137_vm15 = vweird.f32 %v2492_v45 }
 0x87a   :  { %vm1138_vm6 = vmor %vm1136_vm3, %vm1137_vm15 }
 0x87b   :  { %v1132_v48 = vmul.f32 %v2492_v45, %v1131_v47  ;;  %v1129_v49 = vsel %vm1128_vm14, %v2490_v39, %v1125_v46 }
 0x87c   :  { %v1140_v53 = vmul.f32 %v1129_v49, %v1106_v28 }
 0x87d   :  { %v1133_v50 = vmul.f32 0.5, %v1132_v48 }
 0x87e   :  { %v1143_v1 = vmul.f32 %v2439_v52, %v1140_v53 }
 0x87f   :  { %v1134_v51 = vsub.f32 1.5, %v1133_v50 }
 0x880   :  { %v3022_v35 = vadd.f32 %v2440_v19, %v1143_v1 }
 0x881   :  { %v1135_v16 = vmul.f32 %v2492_v45, %v1134_v51 }
 0x883   :  { %v1139_v54 = vsel %vm1138_vm6, %v2492_v45, %v1135_v16 }
 0x884   :  { %v1141_v55 = vmul.f32 %v1139_v54, %v1107_v31 }
 0x886   :  { %v1144_v56 = vmul.f32 %v2439_v52, %v1141_v55 }
 0x888   :  { %v3024_v27 = vadd.f32 %v2440_v19, %v1144_v56 }
 0x88a   :  { %v1148_v57 = vpack.c.bf16 %v3024_v27, %v3022_v35 }
 0x88c   :  { %2296 = vmatmul.msk.bf16.vlgmr.msrb.gmra.mxu2 %vm220_vm2, %v1148_v57 }
 0x90f   :  { %v1179_v61 = vpop.f32.mrf.mxu2 }
 0x910   :  { %v1180_v2 = vadd.f32 %v2441_v59, %v1179_v61 }
 0x912   :  { %1218 = vrot.lane.b32.xlu1 %v1180_v2, %s2637_s20  ;;  %1215 = vrot.lane.b32.xlu2 %v1180_v2, %s2639_s22  ;;  %v3035_v58 = vmul.f32 0.35355338, %v1180_v2  ;;  %v1234_v6 = vpack.c.bf16 %v1180_v2, %v1180_v2 }
 0x913   :  { %1221 = vrot.lane.b32.xlu0 %v1180_v2, %s2638_s21 }
 0x914   :  { %v1243_v34 = vunpack.c.l.b16 %v1234_v6 }
 0x916   :  { %v3079_v36 = vpack.c.b16 %v1243_v34, %v1243_v34 }
 0x917   :  { %v1181_v3 = vpop.f32.mrf.mxu2 }
 0x918   :  { %v1182_v4 = vadd.f32 %v2441_v59, %v1181_v3  ;;  %v1206_v59 = vpack.c.bf16 %v3035_v58, %v3035_v58 }
 0x91a   :  { %1225 = vrot.lane.b32.xlu2 %v1182_v4, %s2639_s22  ;;  %v3041_v22 = vmul.f32 0.35355338, %v1182_v4  ;;  %v1238_v5 = vpack.c.bf16 %v1182_v4, %v1182_v4 }
 0x91b   :  { %1231 = vrot.lane.b32.xlu0 %v1182_v4, %s2638_s21 }
 0x91c   :  { %v1339_v7 = vunpack.c.l.b16 %v1238_v5 }
 0x91e   :  { %v3047_v8 = vpack.c.b16 %v1339_v7, %v1339_v7  ;;  %v1210_v7 = vpack.c.bf16 %v3041_v22, %v3041_v22 }
 0x923   :  { %1228 = vrot.lane.b32.xlu0 %v1182_v4, %s2637_s20 }
 0x92b   :  { %1193 = vrot.lane.b32.xlu0 %v3035_v58, %s2638_s21 }
 0x933   :  { %1187 = vrot.lane.b32.xlu0 %v3035_v58, %s2639_s22 }
 0x93b   :  { %1203 = vrot.lane.b32.xlu0 %v3041_v22, %s2638_s21 }
 0x943   :  { %1197 = vrot.lane.b32.xlu0 %v3041_v22, %s2639_s22 }
 0x94b   :  { %1341 = vrot.lane.b32.xlu0 %v3047_v8, %s2640_s23 }
 0x96c   :  { %v1216_v9 = vpop.permute.xlu2 %1215 }
 0x96d   :  { %v1235_v12 = vpack.c.bf16 %v1216_v9, %v1216_v9 }
 0x96f   :  { %v1267_v60 = vunpack.c.l.b16 %v1235_v12 }
 0x971   :  { %v3051_v0 = vpack.c.b16 %v1267_v60, %v1267_v60 }
 0x973   :  { %1269 = vrot.lane.b32.xlu1 %v3051_v0, %s2640_s23 }
 0x974   :  { %v1226_v28 = vpop.permute.xlu2 %1225 }
 0x975   :  { %v1239_v63 = vpack.c.bf16 %v1226_v28, %v1226_v28 }
 0x977   :  { %v1363_v31 = vunpack.c.l.b16 %v1239_v63 }
 0x979   :  { %v3067_v33 = vpack.c.b16 %v1363_v31, %v1363_v31 }
 0x984   :  { %v1219_v17 = vpop.permute.xlu1 %1218 }
 0x985   :  { %v1222_v14 = vpop.permute.xlu0 %1221  ;;  %v1236_v20 = vpack.c.bf16 %v1219_v17, %v1219_v17 }
 0x986   :  { %v1237_v15 = vpack.c.bf16 %v1222_v14, %v1222_v14 }
 0x987   :  { %v1291_v62 = vunpack.c.l.b16 %v1236_v20 }
 0x988   :  { %v1315_v18 = vunpack.c.l.b16 %v1237_v15 }
 0x989   :  { %v3059_v25 = vpack.c.b16 %v1291_v62, %v1291_v62 }
 0x98a   :  { %v3055_v21 = vpack.c.b16 %v1315_v18, %v1315_v18 }
 0x98c   :  { %1317 = vrot.lane.b32.xlu2 %v3055_v21, %s2640_s23 }
 0x98d   :  { %v1232_v23 = vpop.permute.xlu0 %1231 }
 0x98e   :  { %v1241_v26 = vpack.c.bf16 %v1232_v23, %v1232_v23 }
 0x990   :  { %v1411_v29 = vunpack.c.l.b16 %v1241_v26 }
 0x992   :  { %v3061_v30 = vpack.c.b16 %v1411_v29, %v1411_v29 }
 0x994   :  { %1293 = vrot.lane.b32.xlu2 %v3059_v25, %s2640_s23  ;;  %1413 = vrot.lane.b32.xlu1 %v3061_v30, %s2640_s23 }
 0x995   :  { %v1229_v38 = vpop.permute.xlu0 %1228 }
 0x996   :  { %v1240_v10 = vpack.c.bf16 %v1229_v38, %v1229_v38 }
 0x998   :  { %v1387_v32 = vunpack.c.l.b16 %v1240_v10 }
 0x99a   :  { %v3073_v42 = vpack.c.b16 %v1387_v32, %v1387_v32 }
 0x99c   :  { %1365 = vrot.lane.b32.xlu1 %v3067_v33, %s2640_s23  ;;  %1190 = vrot.lane.b32.xlu2 %v3035_v58, %s2637_s20 }
 0x99d   :  { %v1194_v37 = vpop.permute.xlu0 %1193 }
 0x99e   :  { %v1209_v45 = vpack.c.bf16 %v1194_v37, %v1194_v37 }
 0x9a4   :  { %1200 = vrot.lane.b32.xlu1 %v3041_v22, %s2637_s20  ;;  %1389 = vrot.lane.b32.xlu2 %v3073_v42, %s2640_s23 }
 0x9a5   :  { %v1188_v13 = vpop.permute.xlu0 %1187 }
 0x9a6   :  { %v1207_v44 = vpack.c.bf16 %v1188_v13, %v1188_v13 }
 0x9ac   :  { %1245 = vrot.lane.b32.xlu2 %v3079_v36, %s2640_s23 }
 0x9ad   :  { %v1204_v48 = vpop.permute.xlu0 %1203 }
 0x9ae   :  { %v1213_v57 = vpack.c.bf16 %v1204_v48, %v1204_v48 }
 0x9b5   :  { %v1198_v51 = vpop.permute.xlu0 %1197 }
 0x9b6   :  { %v1211_v3 = vpack.c.bf16 %v1198_v51, %v1198_v51 }
 0x9bd   :  { %v1342_v16 = vpop.permute.xlu0 %1341 }
 0x9be   :  { %v1347_v56 = vsel %vm301_vm5, %v1342_v16, 0 }
 0x9e5   :  { %v1270_v39 = vpop.permute.xlu1 %1269 }
 0x9e6   :  { %v1275_v40 = vsel %vm301_vm5, %v1270_v39, 0  ;;  %v1318_v41 = vpop.permute.xlu2 %1317 }
 0x9e7   :  { %v1323_v43 = vsel %vm301_vm5, %v1318_v41, 0  ;;  %1284 = vmatpush.bf16.xpose.msrb.mxu0 %v1275_v40 }
 0x9e8   :  { %1332 = vmatpush.bf16.xpose.msra.mxu2 %v1323_v43 }
 0x9ee   :  { %v1294_v46 = vpop.permute.xlu2 %1293  ;;  %2298 = vmatmul.msk.bf16.vlgmr.msrb.gmra.mxu0 %vm301_vm5, %v1207_v44 }
 0x9ef   :  { %v1299_v47 = vsel %vm301_vm5, %v1294_v46, 0  ;;  %2300 = vmatmul.msk.bf16.vlgmr.msra.gmra.mxu2 %vm301_vm5, %v1209_v45 }
 0x9f0   :  { %1308 = vmatpush.bf16.xpose.msra.mxu1 %v1299_v47 }
 0x9f6   :  { %v1191_v49 = vpop.permute.xlu2 %1190 }
 0x9f7   :  { %v1208_v50 = vpack.c.bf16 %v1191_v49, %v1191_v49 }
 0x9f9   :  { %2299 = vmatmul.msk.bf16.vlgmr.msra.gmra.mxu1 %vm301_vm5, %v1208_v50 }
 0x9fe   :  { %v1390_v52 = vpop.permute.xlu2 %1389 }
 0x9ff   :  { %v1395_v53 = vsel %vm301_vm5, %v1390_v52, 0 }
 0xa00   :  { %1404 = vmatpush.bf16.xpose.msrb.mxu1 %v1395_v53 }
 0xa06   :  { %v1414_v54 = vpop.permute.xlu1 %1413  ;;  %v1246_v19 = vpop.permute.xlu2 %1245 }
 0xa07   :  { %v1419_v1 = vsel %vm301_vm5, %v1414_v54, 0  ;;  %v1251_v55 = vsel %vm301_vm5, %v1246_v19, 0 }
 0xa08   :  { %1260 = vmatpush.bf16.xpose.msrb.mxu3 %v1251_v55  ;;  %1428 = vmatpush.bf16.xpose.msrb.mxu2 %v1419_v1 }
 0xa0e   :  { %v1366_v61 = vpop.permute.xlu1 %1365 }
 0xa0f   :  { %v1371_v2 = vsel %vm301_vm5, %v1366_v61, 0  ;;  %2297 = vmatmul.msk.bf16.vlgmr.msrb.gmra.mxu3 %vm301_vm5, %v1206_v59  ;;  %2304 = vmatmul.msk.bf16.vlgmr.msrb.gmra.mxu2 %vm301_vm5, %v1213_v57 }
 0xa10   :  { %1356 = vmatpush.bf16.xpose.msra.mxu3 %v1347_v56  ;;  %1380 = vmatpush.bf16.xpose.msra.mxu0 %v1371_v2 }
 0xa16   :  { %v1201_v4 = vpop.permute.xlu1 %1200 }
 0xa17   :  { %v1212_v5 = vpack.c.bf16 %v1201_v4, %v1201_v4  ;;  %2302 = vmatmul.msk.bf16.vlgmr.msra.gmra.mxu0 %vm301_vm5, %v1211_v3 }
 0xa19   :  { %2303 = vmatmul.msk.bf16.vlgmr.msrb.gmra.mxu1 %vm301_vm5, %v1212_v5 }
 0xa1f   :  { %2301 = vmatmul.msk.bf16.vlgmr.msra.gmra.mxu3 %vm301_vm5, %v1210_v7 }
 0xa6b   :  { %v1286_v58 = vpop.f32.mrf.mxu0 }
 0xa6c   :  { %v1435_v9 = vsel %vm2841_vm7, %v1286_v58, -1e+09 }
 0xa6d   :  { %v1445_v12 = vsel %vm301_vm5, %v1435_v9, -inf }
 0xa6e   :  { %1446 = vmax.xlane.f32.xlu2 %v1445_v12 }
 0xa72   :  { %v1334_v60 = vpop.f32.mrf.mxu2 }
 0xa73   :  { %v1288_v14 = vpop.f32.mrf.mxu0  ;;  %v1437_v31 = vsel %vm2841_vm7, %v1334_v60, -1e+09 }
 0xa74   :  { %v1451_v6 = vsel %vm301_vm5, %v1437_v31, -inf }
 0xa76   :  { %v1310_v15 = vpop.f32.mrf.mxu1 }
 0xa77   :  { %v1436_v43 = vsel %vm2841_vm7, %v1310_v15, -1e+09 }
 0xa78   :  { %v1448_v45 = vsel %vm301_vm5, %v1436_v43, -inf }
 0xa7a   :  { %v1336_v17 = vpop.f32.mrf.mxu2 }
 0xa7e   :  { %v1312_v18 = vpop.f32.mrf.mxu1 }
 0xa92   :  { %v1262_v20 = vpop.f32.mrf.mxu3  ;;  %v1430_v23 = vpop.f32.mrf.mxu2 }
 0xa93   :  { %v3108_v62 = vsel %vm2841_vm7, %v1262_v20, -1e+09  ;;  %v1441_v37 = vsel %vm2841_vm7, %v1430_v23, -1e+09 }
 0xa94   :  { %v1382_v22 = vpop.f32.mrf.mxu0  ;;  %v1442_v26 = vsel %vm301_vm5, %v3108_v62, -inf  ;;  %v1463_v41 = vsel %vm301_vm5, %v1441_v37, -inf }
 0xa95   :  { %v3114_v28 = vsel %vm2841_vm7, %v1382_v22, -1e+09  ;;  %1443 = vmax.xlane.f32.xlu1 %v1442_v26 }
 0xa96   :  { %v1406_v29 = vpop.f32.mrf.mxu1  ;;  %v1457_v63 = vsel %vm301_vm5, %v3114_v28, -inf }
 0xa97   :  { %1458 = vmax.xlane.f32.xlu2 %v1457_v63  ;;  %v1440_v46 = vsel %vm2841_vm7, %v1406_v29, -1e+09 }
 0xa98   :  { %v1460_v47 = vsel %vm301_vm5, %v1440_v46, -inf }
 0xa9a   :  { %v1264_v38 = vpop.f32.mrf.mxu3  ;;  %v1432_v10 = vpop.f32.mrf.mxu2 }
 0xa9c   :  { %v1384_v32 = vpop.f32.mrf.mxu0 }
 0xa9d   :  { %1452 = vmax.xlane.f32.xlu1 %v1451_v6 }
 0xa9e   :  { %v1408_v34 = vpop.f32.mrf.mxu1 }
 0xaa2   :  { %v1358_v39 = vpop.f32.mrf.mxu3 }
 0xaa3   :  { %v3125_v40 = vsel %vm2841_vm7, %v1358_v39, -1e+09 }
 0xaa4   :  { %v1454_v13 = vsel %vm301_vm5, %v3125_v40, -inf }
 0xaa5   :  { %1464 = vmax.xlane.f32.xlu1 %v1463_v41  ;;  %1455 = vmax.xlane.f32.xlu0 %v1454_v13 }
 0xaaa   :  { %v1360_v44 = vpop.f32.mrf.mxu3 }
 0xaad   :  { %1449 = vmax.xlane.f32.xlu0 %v1448_v45 }
 0xaaf   :  { %1672 = vrot.lane.b32.xlu2 %v3051_v0, %s2631_s26 }
 0xab5   :  { %1461 = vmax.xlane.f32.xlu0 %v1460_v47 }
 0xabe   :  { %1714 = vrot.lane.b32.xlu1 %v3055_v21, %s2631_s26 }
 0xae1   :  { %v1447_v48 = vpop.xlane.xlu2 %1446 }
 0xae2   :  { %v1467_v49 = vsub.f32 %v1435_v9, %v1447_v48 }
 0xae4   :  { %v1476_v50 = vmul.f32 1.442695, %v1467_v49 }
 0xae6   :  { %2493 = vpow2.f32 %v1476_v50 }
 0xaec   :  { %v3140_v51 = vpop.eup %2493 }
 0xaed   :  { %v1493_v52 = vsel %vm301_vm5, %v3140_v51, 0.0 }
 0xaee   :  { %1494 = vadd.xlane.f32.xlu1 %v1493_v52 }
 0xb07   :  { %1798 = vrot.lane.b32.xlu1 %v3061_v30, %s2631_s26 }
 0xb08   :  { %v1444_v53 = vpop.xlane.xlu1 %1443 }
 0xb09   :  { %v1466_v26 = vsub.f32 %v3108_v62, %v1444_v53 }
 0xb0a   :  { %v1459_v11 = vpop.xlane.xlu2 %1458 }
 0xb0b   :  { %v1471_v61 = vsub.f32 %v3114_v28, %v1459_v11  ;;  %v1474_v38 = vmul.f32 1.442695, %v1466_v26 }
 0xb0f   :  { %1777 = vrot.lane.b32.xlu1 %v3073_v42, %s2631_s26 }
 0xb10   :  { %v1453_v54 = vpop.xlane.xlu1 %1452 }
 0xb11   :  { %v1469_v30 = vsub.f32 %v1437_v31, %v1453_v54 }
 0xb12   :  { %v1673_v0 = vpop.permute.xlu2 %1672 }
 0xb13   :  { %v1678_v21 = vsel %vm152_vm4, %v1673_v0, 0  ;;  %v1480_v56 = vmul.f32 1.442695, %v1469_v30 }
 0xb14   :  { %1687 = vmatpush.bf16.msrb.mxu0 %v1678_v21 }
 0xb17   :  { %1651 = vrot.lane.b32.xlu1 %v3079_v36, %s2631_s26 }
 0xb18   :  { %v1456_v16 = vpop.xlane.xlu0 %1455  ;;  %v1465_v42 = vpop.xlane.xlu1 %1464 }
 0xb19   :  { %v1473_v36 = vsub.f32 %v1441_v37, %v1465_v42  ;;  %v1470_v63 = vsub.f32 %v3125_v40, %v1456_v16 }
 0xb1b   :  { %v1488_v5 = vmul.f32 1.442695, %v1473_v36 }
 0xb1f   :  { %1735 = vrot.lane.b32.xlu1 %v3047_v8, %s2631_s26  ;;  %v1484_v8 = vmul.f32 1.442695, %v1471_v61 }
 0xb20   :  { %v1450_v19 = vpop.xlane.xlu0 %1449 }
 0xb21   :  { %v1468_v1 = vsub.f32 %v1436_v43, %v1450_v19 }
 0xb23   :  { %v1478_v55 = vmul.f32 1.442695, %v1468_v1 }
 0xb25   :  { %2495 = vpow2.f32 %v1478_v55 }
 0xb26   :  { %2497 = vpow2.f32 %v1480_v56 }
 0xb28   :  { %v1462_v57 = vpop.xlane.xlu0 %1461 }
 0xb29   :  { %v1472_v59 = vsub.f32 %v1440_v46, %v1462_v57 }
 0xb2b   :  { %v3154_v2 = vpop.eup %2495  ;;  %v1486_v3 = vmul.f32 1.442695, %v1472_v59 }
 0xb2c   :  { %v1496_v4 = vsel %vm301_vm5, %v3154_v2, 0.0  ;;  %v3158_v58 = vpop.eup %2497 }
 0xb2d   :  { %2499 = vpow2.f32 %v1486_v3  ;;  %1497 = vadd.xlane.f32.xlu2 %v1496_v4  ;;  %v1499_v60 = vsel %vm301_vm5, %v3158_v58, 0.0 }
 0xb2e   :  { %2501 = vpow2.f32 %v1484_v8 }
 0xb2f   :  { %2503 = vpow2.f32 %v1488_v5 }
 0xb30   :  { %v1715_v7 = vpop.permute.xlu1 %1714 }
 0xb31   :  { %v1720_v9 = vsel %vm152_vm4, %v1715_v7, 0 }
 0xb32   :  { %1729 = vmatpush.bf16.msra.mxu2 %v1720_v9 }
 0xb33   :  { %v3161_v12 = vpop.eup %2499 }
 0xb34   :  { %v1508_v14 = vsel %vm301_vm5, %v3161_v12, 0.0  ;;  %v3167_v15 = vpop.eup %2501 }
 0xb35   :  { %1500 = vadd.xlane.f32.xlu2 %v1499_v60  ;;  %1509 = vadd.xlane.f32.xlu0 %v1508_v14  ;;  %v3169_v17 = vpop.eup %2503  ;;  %v1505_v18 = vsel %vm301_vm5, %v3167_v15, 0.0 }
 0xb36   :  { %v1511_v20 = vsel %vm301_vm5, %v3169_v17, 0.0 }
 0xb3d   :  { %1506 = vadd.xlane.f32.xlu2 %v1505_v18  ;;  %1512 = vadd.xlane.f32.xlu0 %v1511_v20 }
 0xb51   :  { %1693 = vrot.lane.b32.xlu0 %v3059_v25, %s2631_s26  ;;  %v1482_v25 = vmul.f32 1.442695, %v1470_v63 }
 0xb55   :  { %1756 = vrot.lane.b32.xlu2 %v3067_v33, %s2631_s26 }
 0xb61   :  { %v1495_v23 = vpop.xlane.xlu1 %1494 }
 0xb62   :  { %2505 = vrcp.f32 %v1495_v23  ;;  %v1539_v31 = vand.u32 2147483648, %v1495_v23  ;;  %v1537_v32 = vand.u32 2147483647, %v1495_v23  ;;  %vm1533_vm8 = vweird.f32 %v1495_v23 }
 0xb63   :  { %2507 = vpow2.f32 %v1474_v38 }
 0xb64   :  { %v1540_v34 = vor.u32 1.1754944e-38, %v1539_v31  ;;  %vm1538_vm11 = vcmp.eq.f32.partialorder %v1537_v32, 8.507059e+37  ;;  %2509 = vpow2.f32 %v1482_v25 }
 0xb68   :  { %v2506_v22 = vpop.eup %2505 }
 0xb69   :  { %v1529_v28 = vmul.f32 %v2506_v22, %v1495_v23  ;;  %vm1534_vm7 = vweird.f32 %v2506_v22  ;;  %v3186_v40 = vpop.eup %2507 }
 0xb6a   :  { %vm1535_vm10 = vmor %vm1533_vm8, %vm1534_vm7  ;;  %v3189_v13 = vpop.eup %2509  ;;  %v1490_v44 = vsel %vm301_vm5, %v3186_v40, 0.0 }
 0xb6b   :  { %v1530_v29 = vsub.f32 1.0, %v1529_v28  ;;  %v1502_v45 = vsel %vm301_vm5, %v3189_v13, 0.0 }
 0xb6d   :  { %v1531_v10 = vmul.f32 %v2506_v22, %v1530_v29 }
 0xb6f   :  { %v1532_v6 = vadd.f32 %v2506_v22, %v1531_v10 }
 0xb71   :  { %v1536_v33 = vsel %vm1535_vm10, %v2506_v22, %v1532_v6 }
 0xb72   :  { %v1541_v37 = vsel %vm1538_vm11, %v1540_v34, %v1536_v33 }
 0xb73   :  { %v1627_v62 = vmul.f32 %v3140_v51, %v1541_v37 }
 0xb75   :  { %2306 = vst.msk [vmem:[%s3307_s4 + $0x48] sm:$0xff] %vm301_vm5, %v1627_v62  ;;  %v1644_v39 = vpack.c.bf16 %v1627_v62, %v1627_v62 }
 0xb77   :  { %2314 = vmatmul.msk.bf16.vlgmr.msrb.gmra.mxu0 %vm301_vm5, %v1644_v39 }
 0xb79   :  { %v1799_v41 = vpop.permute.xlu1 %1798 }
 0xb7a   :  { %v1804_v43 = vsel %vm152_vm4, %v1799_v41, 0 }
 0xb7b   :  { %1491 = vadd.xlane.f32.xlu0 %v1490_v44  ;;  %1813 = vmatpush.bf16.msrb.mxu2 %v1804_v43 }
 0xb7e   :  { %1503 = vadd.xlane.f32.xlu2 %v1502_v45 }
 0xb81   :  { %v3196_v46 = vpop.permute.xlu1 %1777 }
 0xb89   :  { %v1652_v47 = vpop.permute.xlu1 %1651 }
 0xb8a   :  { %v1657_v48 = vsel %vm152_vm4, %v1652_v47, 0 }
 0xb8b   :  { %1666 = vmatpush.bf16.msrb.mxu3 %v1657_v48 }
 0xb91   :  { %v1736_v49 = vpop.permute.xlu1 %1735 }
 0xb92   :  { %v1741_v50 = vsel %vm152_vm4, %v1736_v49, 0 }
 0xb93   :  { %1750 = vmatpush.bf16.msra.mxu3 %v1741_v50 }
 0xba0   :  { %v1498_v51 = vpop.xlane.xlu2 %1497 }
 0xba1   :  { %2511 = vrcp.f32 %v1498_v51  ;;  %v1553_v16 = vand.u32 2147483648, %v1498_v51  ;;  %v1551_v19 = vand.u32 2147483647, %v1498_v51  ;;  %vm1547_vm0 = vweird.f32 %v1498_v51 }
 0xba3   :  { %v1554_v55 = vor.u32 1.1754944e-38, %v1553_v16  ;;  %vm1552_vm15 = vcmp.eq.f32.partialorder %v1551_v19, 8.507059e+37 }
 0xba7   :  { %v2512_v52 = vpop.eup %2511 }
 0xba8   :  { %v1543_v11 = vmul.f32 %v2512_v52, %v1498_v51  ;;  %v1501_v0 = vpop.xlane.xlu2 %1500  ;;  %v1510_v21 = vpop.xlane.xlu0 %1509  ;;  %vm1548_vm13 = vweird.f32 %v2512_v52 }
 0xba9   :  { %2513 = vrcp.f32 %v1501_v0  ;;  %vm1549_vm14 = vmor %vm1547_vm0, %vm1548_vm13  ;;  %v1567_v5 = vand.u32 2147483648, %v1501_v0  ;;  %v1565_v60 = vand.u32 2147483647, %v1501_v0  ;;  %v1609_v14 = vand.u32 2147483648, %v1510_v21 }
 0xbaa   :  { %v1544_v53 = vsub.f32 1.0, %v1543_v11  ;;  %2515 = vrcp.f32 %v1510_v21  ;;  %v1607_v20 = vand.u32 2147483647, %v1510_v21  ;;  %vm1561_vm7 = vweird.f32 %v1501_v0 }
 0xbab   :  { %v1568_v22 = vor.u32 1.1754944e-38, %v1567_v5  ;;  %vm1603_vm10 = vweird.f32 %v1510_v21  ;;  %vm1566_vm11 = vcmp.eq.f32.partialorder %v1565_v60, 8.507059e+37  ;;  %v1610_v29 = vor.u32 1.1754944e-38, %v1609_v14 }
 0xbac   :  { %v1545_v54 = vmul.f32 %v2512_v52, %v1544_v53  ;;  %vm1608_vm0 = vcmp.eq.f32.partialorder %v1607_v20, 8.507059e+37 }
 0xbae   :  { %v1546_v1 = vadd.f32 %v2512_v52, %v1545_v54 }
 0xbaf   :  { %v2514_v30 = vpop.eup %2513 }
 0xbb0   :  { %v2516_v56 = vpop.eup %2515  ;;  %v1550_v42 = vsel %vm1549_vm14, %v2512_v52, %v1546_v1  ;;  %v1557_v57 = vmul.f32 %v2514_v30, %v1501_v0  ;;  %v1507_v59 = vpop.xlane.xlu2 %1506  ;;  %vm1562_vm3 = vweird.f32 %v2514_v30 }
 0xbb1   :  { %v3200_v61 = vpop.xlane.xlu0 %1512  ;;  %v1555_v36 = vsel %vm1552_vm15, %v1554_v55, %v1550_v42  ;;  %v1599_v3 = vmul.f32 %v2516_v56, %v1510_v21  ;;  %2517 = vrcp.f32 %v1507_v59  ;;  %vm1604_vm6 = vweird.f32 %v2516_v56  ;;  %vm1563_vm8 = vmor %vm1561_vm7, %vm1562_vm3 }
 0xbb2   :  { %v3203_v4 = vmul.f32 %v3154_v2, %v1555_v36  ;;  %v1558_v8 = vsub.f32 1.0, %v1557_v57  ;;  %2519 = vrcp.f32 %v3200_v61  ;;  %vm1605_vm13 = vmor %vm1603_vm10, %vm1604_vm6  ;;  %v1593_v39 = vand.u32 2147483647, %v1507_v59 }
 0xbb3   :  { %v1600_v7 = vsub.f32 1.0, %v1599_v3  ;;  %v1595_v41 = vand.u32 2147483648, %v1507_v59  ;;  %vm1589_vm15 = vweird.f32 %v1507_v59  ;;  %v1621_v48 = vand.u32 2147483647, %v3200_v61 }
 0xbb4   :  { %2307 = vst.msk [vmem:[%s3307_s4 + $0x50] sm:$0xff] %vm301_vm5, %v3203_v4  ;;  %v1559_v9 = vmul.f32 %v2514_v30, %v1558_v8  ;;  %vm1594_vm7 = vcmp.eq.f32.partialorder %v1593_v39, 8.507059e+37 }
 0xbb5   :  { %v1601_v18 = vmul.f32 %v2516_v56, %v1600_v7  ;;  %v1596_v49 = vor.u32 1.1754944e-38, %v1595_v41 }
 0xbb6   :  { %v1560_v2 = vadd.f32 %v2514_v30, %v1559_v9 }
 0xbb7   :  { %v2518_v23 = vpop.eup %2517  ;;  %v1602_v26 = vadd.f32 %v2516_v56, %v1601_v18 }
 0xbb8   :  { %v1564_v28 = vsel %vm1563_vm8, %v2514_v30, %v1560_v2  ;;  %v1585_v63 = vmul.f32 %v2518_v23, %v1507_v59  ;;  %v1757_v31 = vpop.permute.xlu2 %1756  ;;  %v2520_v38 = vpop.eup %2519  ;;  %vm1590_vm14 = vweird.f32 %v2518_v23  ;;  %vm1617_vm8 = vweird.f32 %v3200_v61 }
 0xbb9   :  { %v1569_v10 = vsel %vm1566_vm11, %v1568_v22, %v1564_v28  ;;  %v1606_v32 = vsel %vm1605_vm13, %v2516_v56, %v1602_v26  ;;  %v1762_v6 = vsel %vm152_vm4, %v1757_v31, 0  ;;  %v1613_v37 = vmul.f32 %v2520_v38, %v3200_v61  ;;  %vm1591_vm6 = vmor %vm1589_vm15, %vm1590_vm14 }
 0xbba   :  { %v1629_v25 = vmul.f32 %v3158_v58, %v1569_v10  ;;  %v1611_v34 = vsel %vm1608_vm0, %v1610_v29, %v1606_v32  ;;  %v1586_v33 = vsub.f32 1.0, %v1585_v63  ;;  %1771 = vmatpush.bf16.msra.mxu0 %v1762_v6  ;;  %v1623_v58 = vand.u32 2147483648, %v3200_v61 }
 0xbbb   :  { %v1632_v62 = vmul.f32 %v3161_v12, %v1611_v34  ;;  %v1614_v44 = vsub.f32 1.0, %v1613_v37  ;;  %vm1618_vm3 = vweird.f32 %v2520_v38  ;;  %vm1622_vm11 = vcmp.eq.f32.partialorder %v1621_v48, 8.507059e+37 }
 0xbbc   :  { %2308 = vst.msk [vmem:[%s3307_s4 + $0x58] sm:$0xff] %vm301_vm5, %v1629_v25  ;;  %v1587_v43 = vmul.f32 %v2518_v23, %v1586_v33  ;;  %v1646_v45 = vpack.c.bf16 %v1629_v25, %v1629_v25  ;;  %vm1619_vm10 = vmor %vm1617_vm8, %vm1618_vm3  ;;  %v1624_v11 = vor.u32 1.1754944e-38, %v1623_v58  ;;  %v1783_v30 = vsel %vm152_vm4, %v3196_v46, 0 }
 0xbbd   :  { %2311 = vst.msk [vmem:[%s3307_s4 + $0x70] sm:$0xff] %vm301_vm5, %v1632_v62  ;;  %v1615_v47 = vmul.f32 %v2520_v38, %v1614_v44  ;;  %v1649_v55 = vpack.c.bf16 %v1632_v62, %v1632_v62 }
 0xbbe   :  { %v1588_v12 = vadd.f32 %v2518_v23, %v1587_v43  ;;  %2316 = vmatmul.msk.bf16.vlgmr.msra.gmra.mxu2 %vm301_vm5, %v1646_v45 }
 0xbbf   :  { %v1616_v51 = vadd.f32 %v2520_v38, %v1615_v47 }
 0xbc0   :  { %v1592_v50 = vsel %vm1591_vm6, %v2518_v23, %v1588_v12 }
 0xbc1   :  { %v1597_v52 = vsel %vm1594_vm7, %v1596_v49, %v1592_v50  ;;  %v1620_v21 = vsel %vm1619_vm10, %v2520_v38, %v1616_v51  ;;  %v2378_v49 = vld [vmem:[#allocation4 + $0x68] sm:$0xff]  ;;  %v2377_v50 = vld [vmem:[#allocation4 + $0x60] sm:$0xff] }
 0xbc2   :  { %v1631_v0 = vmul.f32 %v3167_v15, %v1597_v52  ;;  %v1625_v53 = vsel %vm1622_vm11, %v1624_v11, %v1620_v21  ;;  %v1645_v15 = vpack.c.bf16 %v3203_v4, %v3203_v4 }
 0xbc3   :  { %v1694_v16 = vpop.permute.xlu0 %1693  ;;  %v1633_v54 = vmul.f32 %v3169_v17, %v1625_v53 }
 0xbc4   :  { %2310 = vst.msk [vmem:[%s3307_s4 + $0x68] sm:$0xff] %vm301_vm5, %v1631_v0  ;;  %v1699_v19 = vsel %vm152_vm4, %v1694_v16, 0  ;;  %v1648_v1 = vpack.c.bf16 %v1631_v0, %v1631_v0 }
 0xbc5   :  { %1708 = vmatpush.bf16.msra.mxu1 %v1699_v19  ;;  %2312 = vst.msk [vmem:[%s3307_s4 + $0x78] sm:$0xff] %vm301_vm5, %v1633_v54  ;;  %v1650_v17 = vpack.c.bf16 %v1633_v54, %v1633_v54 }
 0xbc6   :  { %2318 = vmatmul.msk.bf16.vlgmr.msra.gmra.mxu0 %vm301_vm5, %v1648_v1 }
 0xbc8   :  { %2315 = vmatmul.msk.bf16.vlgmr.msra.gmra.mxu1 %vm301_vm5, %v1645_v15 }
 0xbc9   :  { %1792 = vmatpush.bf16.msrb.mxu1 %v1783_v30 }
 0xbce   :  { %2320 = vmatmul.msk.bf16.vlgmr.msrb.gmra.mxu2 %vm301_vm5, %v1650_v17 }
 0xbd8   :  { %2319 = vmatmul.msk.bf16.vlgmr.msrb.gmra.mxu1 %vm301_vm5, %v1649_v55 }
 0xbee   :  { %v1492_v46 = vpop.xlane.xlu0 %1491 }
 0xbef   :  { %2521 = vrcp.f32 %v1492_v46  ;;  %v1525_v3 = vand.u32 2147483648, %v1492_v46  ;;  %v1523_v5 = vand.u32 2147483647, %v1492_v46  ;;  %vm1519_vm13 = vweird.f32 %v1492_v46 }
 0xbf1   :  { %v1504_v56 = vpop.xlane.xlu2 %1503  ;;  %v1526_v18 = vor.u32 1.1754944e-38, %v1525_v3  ;;  %vm1524_vm15 = vcmp.eq.f32.partialorder %v1523_v5, 8.507059e+37 }
 0xbf2   :  { %2523 = vrcp.f32 %v1504_v56  ;;  %v1581_v60 = vand.u32 2147483648, %v1504_v56  ;;  %v1579_v2 = vand.u32 2147483647, %v1504_v56  ;;  %vm1575_vm3 = vweird.f32 %v1504_v56 }
 0xbf4   :  { %v1689_v42 = vpop.f32.mrf.mxu0  ;;  %v1582_v29 = vor.u32 1.1754944e-38, %v1581_v60  ;;  %vm1580_vm7 = vcmp.eq.f32.partialorder %v1579_v2, 8.507059e+37 }
 0xbf5   :  { %v2522_v57 = vpop.eup %2521 }
 0xbf6   :  { %v1515_v59 = vmul.f32 %v2522_v57, %v1492_v46  ;;  %vm1520_vm4 = vweird.f32 %v2522_v57 }
 0xbf7   :  { %vm1521_vm0 = vmor %vm1519_vm13, %vm1520_vm4 }
 0xbf8   :  { %v2524_v61 = vpop.eup %2523  ;;  %v1516_v36 = vsub.f32 1.0, %v1515_v59 }
 0xbf9   :  { %v1571_v8 = vmul.f32 %v2524_v61, %v1504_v56  ;;  %vm1576_vm14 = vweird.f32 %v2524_v61 }
 0xbfa   :  { %v1517_v4 = vmul.f32 %v2522_v57, %v1516_v36  ;;  %vm1577_vm6 = vmor %vm1575_vm3, %vm1576_vm14 }
 0xbfb   :  { %v1572_v7 = vsub.f32 1.0, %v1571_v8 }
 0xbfc   :  { %v1518_v9 = vadd.f32 %v2522_v57, %v1517_v4  ;;  %v1691_v14 = vpop.f32.mrf.mxu0 }
 0xbfd   :  { %v1573_v20 = vmul.f32 %v2524_v61, %v1572_v7 }
 0xbfe   :  { %v1522_v23 = vsel %vm1521_vm0, %v2522_v57, %v1518_v9 }
 0xbff   :  { %v1527_v22 = vsel %vm1524_vm15, %v1526_v18, %v1522_v23  ;;  %v1574_v26 = vadd.f32 %v2524_v61, %v1573_v20 }
 0xc00   :  { %v1626_v28 = vmul.f32 %v3186_v40, %v1527_v22 }
 0xc01   :  { %v1578_v63 = vsel %vm1577_vm6, %v2524_v61, %v1574_v26 }
 0xc02   :  { %2305 = vst.msk [vmem:[%s3307_s4 + $0x40] sm:$0xff] %vm301_vm5, %v1626_v28  ;;  %v1583_v31 = vsel %vm1580_vm7, %v1582_v29, %v1578_v63  ;;  %v1643_v38 = vpack.c.bf16 %v1626_v28, %v1626_v28  ;;  %v2380_v28 = vld [vmem:[#allocation4 + $0x78] sm:$0xff]  ;;  %v2379_v63 = vld [vmem:[#allocation4 + $0x70] sm:$0xff] }
 0xc03   :  { %v1630_v10 = vmul.f32 %v3189_v13, %v1583_v31  ;;  %1975 = vmatpush.bf16.msrb.mxu0 %v2380_v28 }
 0xc04   :  { %2313 = vmatmul.msk.bf16.vlgmr.msrb.gmra.mxu3 %vm301_vm5, %v1643_v38 }
 0xc05   :  { %2309 = vst.msk [vmem:[%s3307_s4 + $0x60] sm:$0xff] %vm301_vm5, %v1630_v10  ;;  %v1647_v40 = vpack.c.bf16 %v1630_v10, %v1630_v10  ;;  %1877 = vmatpush.bf16.msrb.mxu3 %v2378_v49  ;;  %s2644_s4 = smov [#allocation9]  }
 0xc06   :  { %s2175_s2 = sshll.u32 %s2644_s4, 4  ;;  %s2176_s2 = int_to_ptr.vmem [resolvable:$true] %s2175_s2 }
 0xc07   :  { %1976 = vmatpush.bf16.msrb.mxu0 %v2379_v63 }
 0xc09   :  { %1878 = vmatpush.bf16.msrb.mxu3 %v2377_v50 }
 0xc14   :  { %2317 = vmatmul.msk.bf16.vlgmr.msra.gmra.mxu3 %vm301_vm5, %v1647_v40 }
 0xc41   :  { %v1731_v32 = vpop.f32.mrf.mxu2 }
 0xc43   :  { %v1773_v6 = vpop.f32.mrf.mxu0 }
 0xc44   :  { %v2418_v25 = vpack.i.bf16 %v1773_v6, %v1689_v42  ;;  %v2442_v42 = vld [vmem:[#allocation7 + $0x59] ss:$0 sm:$0xff] }
 0xc45   :  { %v1710_v34 = vpop.f32.mrf.mxu1 }
 0xc46   :  { %2419 = vrot.lane.b32.xlu1 %v2418_v25, %s2635_s5 }
 0xc49   :  { %v1733_v33 = vpop.f32.mrf.mxu2 }
 0xc4b   :  { %v1775_v37 = vpop.f32.mrf.mxu0 }
 0xc4d   :  { %v1712_v62 = vpop.f32.mrf.mxu1 }
 0xc51   :  { %v1815_v13 = vpop.f32.mrf.mxu2 }
 0xc52   :  { %v2428_v39 = vpack.i.bf16 %v1815_v13, %v1731_v32 }
 0xc54   :  { %2429 = vrot.lane.b32.xlu0 %v2428_v39, %s2641_s14 }
 0xc55   :  { %v1794_v41 = vpop.f32.mrf.mxu1 }
 0xc56   :  { %v2423_v43 = vpack.i.bf16 %v1794_v41, %v1710_v34 }
 0xc58   :  { %2424 = vrot.lane.b32.xlu1 %v2423_v43, %s2642_s15 }
 0xc59   :  { %v1817_v44 = vpop.f32.mrf.mxu2 }
 0xc5a   :  { %v2443_v44 = vld [vmem:[#allocation7 + $0x5a] ss:$0 sm:$0xff] }
 0xc5d   :  { %v1796_v45 = vpop.f32.mrf.mxu1 }
 0xc87   :  { %v1668_v58 = vpop.f32.mrf.mxu3 }
 0xc8f   :  { %v1670_v12 = vpop.f32.mrf.mxu3 }
 0xc97   :  { %v1752_v47 = vpop.f32.mrf.mxu3 }
 0xc9f   :  { %v1754_v48 = vpop.f32.mrf.mxu3 }
 0xcb8   :  { %v2420_v51 = vpop.permute.xlu1 %2419 }
 0xcb9   :  { %v2422_v52 = vunpack.i.h.bf16 %v2420_v51  ;;  %v2421_v11 = vunpack.i.l.bf16 %v2420_v51 }
 0xcbb   :  { %v1831_v54 = vsel %vm301_vm5, %v1668_v58, %v2421_v11  ;;  %v1846_v19 = vsel %vm301_vm5, %v1752_v47, %v2422_v52  ;;  %v2444_v47 = vld [vmem:[#allocation7 + $0x5b] ss:$0 sm:$0xff] }
 0xcc6   :  { %v2430_v0 = vpop.permute.xlu0 %2429 }
 0xcc7   :  { %v2432_v1 = vunpack.i.h.bf16 %v2430_v0  ;;  %v2431_v30 = vunpack.i.l.bf16 %v2430_v0  ;;  %v2384_v0 = vld [vmem:[#allocation4 + $0x98] sm:$0xff] }
 0xcc8   :  { %2019 = vmatpush.bf16.msra.mxu1 %v2384_v0 }
 0xcca   :  { %v2425_v21 = vpop.permute.xlu1 %2424 }
 0xccb   :  { %v2427_v53 = vunpack.i.h.bf16 %v2425_v21  ;;  %v2426_v16 = vunpack.i.l.bf16 %v2425_v21  ;;  %v2383_v21 = vld [vmem:[#allocation4 + $0x90] sm:$0xff] }
 0xccc   :  { %2020 = vmatpush.bf16.msra.mxu1 %v2383_v21 }
 0xccd   :  { %v1832_v15 = vsel %vm888_vm1, %v1831_v54, %v2426_v16  ;;  %v1847_v17 = vsel %vm888_vm1, %v1846_v19, %v2427_v53  ;;  %v2382_v53 = vld [vmem:[#allocation4 + $0x88] sm:$0xff]  ;;  %v2381_v16 = vld [vmem:[#allocation4 + $0x80] sm:$0xff] }
 0xcce   :  { %v1833_v55 = vsel %vm890_vm9, %v1832_v15, %v2431_v30  ;;  %v1848_v46 = vsel %vm890_vm9, %v1847_v17, %v2432_v1  ;;  %v2445_v19 = vld [vmem:[#allocation7 + $0x5c] ss:$0 sm:$0xff] }
 0xccf   :  { %v1853_v56 = vpack.c.bf16 %v1848_v46, %v1833_v55 }
 0xcd0   :  { %2021 = vmatpush.bf16.msra.mxu1 %v2382_v53 }
 0xcd1   :  { %2329 = vmatmul.msk.bf16.vlgmr.msrb.gmra.mxu3 %vm220_vm2, %v1853_v56  ;;  %v2446_v56 = vld [vmem:[#allocation7 + $0x5d] ss:$0 sm:$0xff] }
 0xcd4   :  { %2022 = vmatpush.bf16.msra.mxu1 %v2381_v16 }
 0xd54   :  { %v1880_v57 = vpop.f32.mrf.mxu3 }
 0xd55   :  { %v1881_v59 = vadd.f32 %v2442_v42, %v1880_v57 }
 0xd57   :  { %v1885_v61 = vadd.f32 %v1881_v59, %v3022_v35 }
 0xd59   :  { %v1889_v36 = vsel %vm220_vm2, %v1885_v61, 0.0 }
 0xd5a   :  { %1890 = vadd.xlane.f32.xlu1 %v1889_v36 }
 0xd5c   :  { %v1882_v3 = vpop.f32.mrf.mxu3 }
 0xd5d   :  { %v1883_v8 = vadd.f32 %v2442_v42, %v1882_v3 }
 0xd5f   :  { %v1886_v4 = vadd.f32 %v1883_v8, %v3024_v27 }
 0xd61   :  { %v1892_v5 = vsel %vm220_vm2, %v1886_v4, 0.0 }
 0xd62   :  { %1893 = vadd.xlane.f32.xlu2 %v1892_v5 }
 0xdcd   :  { %v1891_v7 = vpop.xlane.xlu1 %1890 }
 0xdce   :  { %v1895_v9 = vmul.f32 %v1891_v7, %v3004_v24 }
 0xdd0   :  { %v1897_v60 = vsub.f32 %v1885_v61, %v1895_v9 }
 0xdd2   :  { %v1899_v14 = vmul.f32 %v1897_v60, %v1897_v60 }
 0xdd4   :  { %v1901_v18 = vsel %vm220_vm2, %v1899_v14, 0.0 }
 0xdd5   :  { %v1894_v20 = vpop.xlane.xlu2 %1893  ;;  %1902 = vadd.xlane.f32.xlu2 %v1901_v18 }
 0xdd6   :  { %v1896_v35 = vmul.f32 %v1894_v20, %v3004_v24 }
 0xdd8   :  { %v1898_v2 = vsub.f32 %v1886_v4, %v1896_v35 }
 0xdda   :  { %v1900_v23 = vmul.f32 %v1898_v2, %v1898_v2 }
 0xddc   :  { %v1904_v22 = vsel %vm220_vm2, %v1900_v23, 0.0 }
 0xddd   :  { %1905 = vadd.xlane.f32.xlu0 %v1904_v22 }
 0xe48   :  { %v1903_v27 = vpop.xlane.xlu2 %1902 }
 0xe49   :  { %v1907_v26 = vmul.f32 %v1903_v27, %v3004_v24 }
 0xe4b   :  { %v1909_v29 = vadd.f32 1e-05, %v1907_v26 }
 0xe4d   :  { %2525 = vrsqrt.f32 %v1909_v29  ;;  %vm1917_vm1 = vweird.f32 %v1909_v29 }
 0xe50   :  { %v1906_v31 = vpop.xlane.xlu0 %1905 }
 0xe51   :  { %v1908_v38 = vmul.f32 %v1906_v31, %v3004_v24 }
 0xe53   :  { %v2526_v10 = vpop.eup %2525  ;;  %v1910_v40 = vadd.f32 1e-05, %v1908_v38 }
 0xe54   :  { %v1912_v32 = vmul.f32 %v2526_v10, %v1909_v29  ;;  %vm1918_vm5 = vweird.f32 %v2526_v10 }
 0xe55   :  { %2527 = vrsqrt.f32 %v1910_v40  ;;  %vm1919_vm9 = vmor %vm1917_vm1, %vm1918_vm5  ;;  %vm1927_vm10 = vweird.f32 %v1910_v40 }
 0xe56   :  { %v1913_v6 = vmul.f32 %v2526_v10, %v1912_v32 }
 0xe58   :  { %v1914_v25 = vmul.f32 0.5, %v1913_v6 }
 0xe5a   :  { %v1915_v34 = vsub.f32 1.5, %v1914_v25 }
 0xe5b   :  { %v2528_v33 = vpop.eup %2527 }
 0xe5c   :  { %v1916_v37 = vmul.f32 %v2526_v10, %v1915_v34  ;;  %v1922_v62 = vmul.f32 %v2528_v33, %v1910_v40  ;;  %vm1928_vm8 = vweird.f32 %v2528_v33 }
 0xe5d   :  { %vm1929_vm11 = vmor %vm1927_vm10, %vm1928_vm8 }
 0xe5e   :  { %v1923_v13 = vmul.f32 %v2528_v33, %v1922_v62  ;;  %v1920_v39 = vsel %vm1919_vm9, %v2526_v10, %v1916_v37 }
 0xe5f   :  { %v1931_v45 = vmul.f32 %v1920_v39, %v1897_v60  ;;  %v2448_v39 = vld [vmem:[#allocation7 + $0x5f] ss:$0 sm:$0xff] }
 0xe60   :  { %v1924_v41 = vmul.f32 0.5, %v1923_v13 }
 0xe61   :  { %v1934_v48 = vmul.f32 %v2443_v44, %v1931_v45 }
 0xe62   :  { %v1925_v43 = vsub.f32 1.5, %v1924_v41 }
 0xe63   :  { %v1937_v51 = vadd.f32 %v2444_v47, %v1934_v48 }
 0xe64   :  { %v1926_v58 = vmul.f32 %v2528_v33, %v1925_v43 }
 0xe66   :  { %v1930_v12 = vsel %vm1929_vm11, %v2528_v33, %v1926_v58  ;;  %v2447_v33 = vld [vmem:[#allocation7 + $0x5e] ss:$0 sm:$0xff] }
 0xe67   :  { %v1932_v49 = vmul.f32 %v1930_v12, %v1898_v2 }
 0xe69   :  { %v1935_v50 = vmul.f32 %v2443_v44, %v1932_v49 }
 0xe6b   :  { %v1938_v52 = vadd.f32 %v2444_v47, %v1935_v50 }
 0xe6d   :  { %v1951_v11 = vpack.c.bf16 %v1938_v52, %v1937_v51 }
 0xe6f   :  { %2338 = vmatmul.msk.bf16.vlgmr.msrb.gmra.mxu0 %vm220_vm2, %v1951_v11 }
 0xeec   :  { %v1978_v54 = vpop.f32.mrf.mxu0 }
 0xeed   :  { %v1979_v1 = vadd.f32 %v2445_v19, %v1978_v54 }
 0xeef   :  { %v1983_v17 = vmax.f32 %v1979_v1, 0.0 }
 0xef4   :  { %v1980_v30 = vpop.f32.mrf.mxu0 }
 0xef5   :  { %v1981_v15 = vadd.f32 %v2445_v19, %v1980_v30 }
 0xef7   :  { %v1984_v55 = vmax.f32 %v1981_v15, 0.0 }
 0xef9   :  { %v1985_v46 = vpack.c.bf16 %v1984_v55, %v1983_v17  ;;  %v2386_v55 = vld [vmem:[#allocation4 + $0xa8] sm:$0xff] }
 0xefa   :  { %2161 = vmatpush.bf16.msra.mxu2 %v2386_v55 }
 0xefb   :  { %2355 = vmatmul.msk.bf16.vlgmr.msra.gmra.mxu1 %vm168_vm12, %v1985_v46 }
 0xf78   :  { %v2024_v42 = vpop.f32.mrf.mxu1 }
 0xf79   :  { %v2025_v57 = vadd.f32 %v2446_v56, %v2024_v42 }
 0xf7b   :  { %v2029_v59 = vadd.f32 %v2025_v57, %v1937_v51 }
 0xf7d   :  { %v2033_v61 = vsel %vm220_vm2, %v2029_v59, 0.0 }
 0xf7e   :  { %2034 = vadd.xlane.f32.xlu2 %v2033_v61 }
 0xf80   :  { %v2026_v36 = vpop.f32.mrf.mxu1 }
 0xf81   :  { %v2027_v3 = vadd.f32 %v2446_v56, %v2026_v36  ;;  %v2385_v56 = vld [vmem:[#allocation4 + $0xa0] sm:$0xff] }
 0xf82   :  { %2162 = vmatpush.bf16.msra.mxu2 %v2385_v56 }
 0xf83   :  { %v2030_v8 = vadd.f32 %v2027_v3, %v1938_v52 }
 0xf85   :  { %v2036_v4 = vsel %vm220_vm2, %v2030_v8, 0.0 }
 0xf86   :  { %2037 = vadd.xlane.f32.xlu2 %v2036_v4 }
 0xff1   :  { %v2035_v5 = vpop.xlane.xlu2 %2034 }
 0xff2   :  { %v2039_v7 = vmul.f32 %v2035_v5, %v3004_v24 }
 0xff4   :  { %v2041_v9 = vsub.f32 %v2029_v59, %v2039_v7 }
 0xff6   :  { %v2043_v60 = vmul.f32 %v2041_v9, %v2041_v9 }
 0xff8   :  { %v2045_v14 = vsel %vm220_vm2, %v2043_v60, 0.0 }
 0xff9   :  { %2046 = vadd.xlane.f32.xlu2 %v2045_v14  ;;  %v2038_v18 = vpop.xlane.xlu2 %2037 }
 0xffa   :  { %v2040_v20 = vmul.f32 %v2038_v18, %v3004_v24 }
 0xffc   :  { %v2042_v35 = vsub.f32 %v2030_v8, %v2040_v20 }
 0xffe   :  { %v2044_v2 = vmul.f32 %v2042_v35, %v2042_v35 }
0x1000   :  { %v2048_v23 = vsel %vm220_vm2, %v2044_v2, 0.0 }
0x1001   :  { %2049 = vadd.xlane.f32.xlu1 %v2048_v23 }
0x106c   :  { %v2047_v22 = vpop.xlane.xlu2 %2046 }
0x106d   :  { %v2051_v27 = vmul.f32 %v2047_v22, %v3004_v24  ;;  %v2450_v22 = vld [vmem:[#allocation7 + $0x61] ss:$0 sm:$0xff] }
0x106f   :  { %v2053_v26 = vadd.f32 1e-05, %v2051_v27 }
0x1071   :  { %2529 = vrsqrt.f32 %v2053_v26  ;;  %vm2061_vm4 = vweird.f32 %v2053_v26 }
0x1074   :  { %v2050_v28 = vpop.xlane.xlu1 %2049 }
0x1075   :  { %v2052_v29 = vmul.f32 %v2050_v28, %v3004_v24 }
0x1077   :  { %v2530_v63 = vpop.eup %2529  ;;  %v2054_v31 = vadd.f32 1e-05, %v2052_v29 }
0x1078   :  { %v2056_v38 = vmul.f32 %v2530_v63, %v2053_v26  ;;  %vm2062_vm12 = vweird.f32 %v2530_v63 }
0x1079   :  { %2531 = vrsqrt.f32 %v2054_v31  ;;  %vm2063_vm13 = vmor %vm2061_vm4, %vm2062_vm12  ;;  %vm2071_vm14 = vweird.f32 %v2054_v31 }
0x107a   :  { %v2057_v10 = vmul.f32 %v2530_v63, %v2056_v38 }
0x107c   :  { %v2058_v40 = vmul.f32 0.5, %v2057_v10 }
0x107e   :  { %v2059_v32 = vsub.f32 1.5, %v2058_v40 }
0x107f   :  { %v2532_v6 = vpop.eup %2531 }
0x1080   :  { %v2060_v25 = vmul.f32 %v2530_v63, %v2059_v32  ;;  %v2066_v34 = vmul.f32 %v2532_v6, %v2054_v31  ;;  %vm2072_vm0 = vweird.f32 %v2532_v6 }
0x1081   :  { %vm2073_vm15 = vmor %vm2071_vm14, %vm2072_vm0 }
0x1082   :  { %v2067_v37 = vmul.f32 %v2532_v6, %v2066_v34  ;;  %v2064_v62 = vsel %vm2063_vm13, %v2530_v63, %v2060_v25 }
0x1083   :  { %v2075_v13 = vmul.f32 %v2064_v62, %v2041_v9 }
0x1084   :  { %v2068_v41 = vmul.f32 0.5, %v2067_v37 }
0x1085   :  { %v2078_v43 = vmul.f32 %v2447_v33, %v2075_v13 }
0x1086   :  { %v2069_v44 = vsub.f32 1.5, %v2068_v41 }
0x1087   :  { %v2081_v45 = vadd.f32 %v2448_v39, %v2078_v43 }
0x1088   :  { %v2070_v58 = vmul.f32 %v2532_v6, %v2069_v44 }
0x1089   :  { %v2085_v12 = vsel %vm220_vm2, %v2081_v45, 0.0 }
0x108a   :  { %2086 = vadd.xlane.f32.xlu2 %v2085_v12  ;;  %v2074_v47 = vsel %vm2073_vm15, %v2532_v6, %v2070_v58 }
0x108b   :  { %v2076_v48 = vmul.f32 %v2074_v47, %v2042_v35  ;;  %v2449_v35 = vld [vmem:[#allocation7 + $0x60] ss:$0 sm:$0xff] }
0x108d   :  { %v2079_v49 = vmul.f32 %v2447_v33, %v2076_v48 }
0x108f   :  { %v2082_v50 = vadd.f32 %v2448_v39, %v2079_v49 }
0x1091   :  { %v2088_v51 = vsel %vm220_vm2, %v2082_v50, 0.0 }
0x1092   :  { %2089 = vadd.xlane.f32.xlu1 %v2088_v51 }
0x10fd   :  { %v2087_v52 = vpop.xlane.xlu2 %2086 }
0x10fe   :  { %v2091_v11 = vmul.f32 %v2087_v52, %v3004_v24 }
0x1100   :  { %v2093_v0 = vsub.f32 %v2081_v45, %v2091_v11 }
0x1102   :  { %v2095_v21 = vmul.f32 %v2093_v0, %v2093_v0 }
0x1104   :  { %v2097_v53 = vsel %vm220_vm2, %v2095_v21, 0.0 }
0x1105   :  { %v2090_v16 = vpop.xlane.xlu1 %2089  ;;  %2098 = vadd.xlane.f32.xlu2 %v2097_v53 }
0x1106   :  { %v2092_v54 = vmul.f32 %v2090_v16, %v3004_v24 }
0x1108   :  { %v2094_v19 = vsub.f32 %v2082_v50, %v2092_v54 }
0x110a   :  { %v2096_v1 = vmul.f32 %v2094_v19, %v2094_v19 }
0x110c   :  { %v2100_v30 = vsel %vm220_vm2, %v2096_v1, 0.0 }
0x110d   :  { %2101 = vadd.xlane.f32.xlu1 %v2100_v30 }
0x1178   :  { %v2099_v15 = vpop.xlane.xlu2 %2098 }
0x1179   :  { %v2103_v17 = vmul.f32 %v2099_v15, %v3004_v24 }
0x117b   :  { %v2105_v46 = vadd.f32 1e-05, %v2103_v17 }
0x117d   :  { %2533 = vrsqrt.f32 %v2105_v46  ;;  %vm2113_vm6 = vweird.f32 %v2105_v46 }
0x1180   :  { %v2102_v42 = vpop.xlane.xlu1 %2101 }
0x1181   :  { %v2104_v57 = vmul.f32 %v2102_v42, %v3004_v24 }
0x1183   :  { %v2534_v59 = vpop.eup %2533  ;;  %v2106_v61 = vadd.f32 1e-05, %v2104_v57 }
0x1184   :  { %v2108_v36 = vmul.f32 %v2534_v59, %v2105_v46  ;;  %vm2114_vm3 = vweird.f32 %v2534_v59 }
0x1185   :  { %2535 = vrsqrt.f32 %v2106_v61  ;;  %vm2115_vm7 = vmor %vm2113_vm6, %vm2114_vm3  ;;  %vm2123_vm1 = vweird.f32 %v2106_v61 }
0x1186   :  { %v2109_v3 = vmul.f32 %v2534_v59, %v2108_v36 }
0x1188   :  { %v2110_v8 = vmul.f32 0.5, %v2109_v3 }
0x118a   :  { %v2111_v4 = vsub.f32 1.5, %v2110_v8 }
0x118b   :  { %v2536_v5 = vpop.eup %2535 }
0x118c   :  { %v2112_v7 = vmul.f32 %v2534_v59, %v2111_v4  ;;  %v2118_v9 = vmul.f32 %v2536_v5, %v2106_v61  ;;  %vm2124_vm5 = vweird.f32 %v2536_v5 }
0x118d   :  { %vm2125_vm9 = vmor %vm2123_vm1, %vm2124_vm5 }
0x118e   :  { %v2119_v60 = vmul.f32 %v2536_v5, %v2118_v9  ;;  %v2116_v14 = vsel %vm2115_vm7, %v2534_v59, %v2112_v7 }
0x118f   :  { %v2127_v24 = vmul.f32 %v2116_v14, %v2093_v0 }
0x1190   :  { %v2120_v18 = vmul.f32 0.5, %v2119_v60 }
0x1191   :  { %v2130_v27 = vmul.f32 %v2449_v35, %v2127_v24 }
0x1192   :  { %v2121_v20 = vsub.f32 1.5, %v2120_v18 }
0x1193   :  { %v2133_v29 = vadd.f32 %v2450_v22, %v2130_v27 }
0x1194   :  { %v2122_v2 = vmul.f32 %v2536_v5, %v2121_v20 }
0x1196   :  { %v2126_v23 = vsel %vm2125_vm9, %v2536_v5, %v2122_v2 }
0x1197   :  { %v2128_v26 = vmul.f32 %v2126_v23, %v2094_v19 }
0x1199   :  { %v2131_v28 = vmul.f32 %v2449_v35, %v2128_v26 }
0x119b   :  { %v2134_v63 = vadd.f32 %v2450_v22, %v2131_v28 }
0x119d   :  { %v2139_v31 = vpack.c.bf16 %v2134_v63, %v2133_v29 }
0x119f   :  { %2364 = vmatmul.msk.bf16.vlgmr.msra.gmra.mxu2 %vm220_vm2, %v2139_v31 }
0x1222   :  { %v2164_v38 = vpop.f32.mrf.mxu2 }
0x1223   :  { %2169 = vst [vmem:[#allocation9] sm:$0xff] %v2164_v38 }
0x122a   :  { %v2166_v10 = vpop.f32.mrf.mxu2 }
0x122b   :  { %2170 = vst [vmem:[#allocation9 + $0x8] sm:$0xff] %v2166_v10 }
0x122c   :  { %2183 = dma.vmem_to_hbm [thread:$0]  %s2176_s2, 256, %s2178_s8, [#allocation6], %s2634_s30, %s2634_s30, %s2635_s5  }
0x122d   :  { %2627 = dma.done.wait [#allocation6], 256  }
0x122e   :  { %2628 = vsyncadd [#allocation6], 4294967040 }
0x122f   :  { %2192 = vsyncpa [#allocation5], 1 }
0x1230   :  { %2193 = vsyncpa [#allocation8], 1 }
0x1231   :  { %2194 = vsyncpa [#allocation6], 1 }

</bundles_post_ra>
